<compile_context>
chip_gen: v7x
topology: tpu7x:2x2x1
jax: 0.10.0
libtpu: 0.0.40
codegen_flags: <defaults>
</compile_context>

<pallas_src>
import functools

import jax
import jax.numpy as jnp
from jax.experimental import pallas as pl
from jax.experimental.pallas import tpu as pltpu


def _round_up(x, m):
    return (x + m - 1) // m * m


def word_shallow_kernel(emb_ref, wcat_ref, bcat_ref, fc_ref, out_ref, *,
                        ks, d, wp, tb):
    """One grid step processes TB samples (both embedding branches).

    emb_ref : (1, 2*TB, Dp, C) f32  rows [0,TB) = static branch, [TB,2TB) = non-static;
                                    per sample the (Dp, C) slab is emb.T zero-padded.
    wcat_ref: (sum_k k*C, F)   f32  im2col conv weights, rows (dk major, c minor),
                                    the three k-blocks stacked.
    bcat_ref: (len(ks), F)     f32  conv biases.
    fc_ref  : (len(ks)*F+1, NCP)    rows [0,3F) = fc weight (k-major reorder),
                                    last row = fc bias; lanes zero-padded to NCP=128.
    out_ref : (TB, NCP)        f32  lane-dense output slab.
    """
    c = emb_ref.shape[3]
    f = wcat_ref.shape[1]
    rows = tb * wp

    # Conv-width index within each sample's Wp-row group (hoisted out of the k loop).
    wio = jax.lax.broadcasted_iota(jnp.int32, (1, wp, 1), 1)

    maxima = []
    row0 = 0
    for ki, k in enumerate(ks):
        kc = k * c
        # im2col: k sublane-shifted slabs stacked along the contraction (lane) axis.
        slabs = [emb_ref[0, :, dk:dk + wp, :] for dk in range(k)]   # each (2TB, Wp, C)
        x = jnp.concatenate(slabs, axis=2)                          # (2TB, Wp, k*C)
        x = x.reshape(2 * rows, kc)                                 # leading-dim merge
        wk = wcat_ref[row0:row0 + kc, :]                            # (k*C, F)
        row0 += kc
        # One deep matmul covers both branches and the whole batch tile.
        y = jnp.dot(x, wk, preferred_element_type=jnp.float32)      # (2*TB*Wp, F)
        y = jnp.maximum(y + bcat_ref[ki:ki + 1, :], 0.0)            # bias + per-branch ReLU
        z = y[:rows, :] + y[rows:, :]                               # static + non-static
        z3 = z.reshape(tb, wp, f)                                   # (TB, Wp, F)
        z3 = jnp.where(wio <= d - k, z3, 0.0)                       # mask padded widths
        maxima.append(jnp.max(z3, axis=1))                          # max over width -> (TB, F)

    act = jnp.concatenate(maxima, axis=1)                           # (TB, 3F)
    nf3 = act.shape[1]
    out = jnp.dot(act, fc_ref[:nf3, :], preferred_element_type=jnp.float32)
    out_ref[...] = out + fc_ref[nf3:nf3 + 1, :]


@functools.partial(jax.jit, static_argnames=("batch_tile",))
def word_shallow_forward(x_idx, params, *, batch_tile=128):
    ks = (3, 4, 5)

    # ---- plain-JAX glue: embedding lookup + parameter / layout preparation ----
    es = params["emb_static"][x_idx].astype(jnp.float32)      # (B, C, D)
    en = params["emb_non_static"][x_idx].astype(jnp.float32)  # (B, C, D)
    B, C, D = es.shape
    F = params["conv3_b"].shape[0]
    nc = params["fc_b"].shape[0]

    wp = _round_up(D - min(ks) + 1, 8)        # padded conv width (rows per sample)
    dp = _round_up(wp + max(ks) - 1, 8)       # padded emb positions per sample
    tb = min(_round_up(B, 8), _round_up(batch_tile, 8))   # samples per grid step
    b_pad = _round_up(B, tb)
    nt = b_pad // tb
    ncp = _round_up(nc, 128)                  # lane-dense output slab width

    # (B, C, D) -> (B_pad, Dp, C): emb position on sublanes, channels on lanes.
    def prep(e):
        e = jnp.swapaxes(e, 1, 2)                                   # (B, D, C)
        return jnp.pad(e, ((0, b_pad - B), (0, dp - D), (0, 0)))    # (B_pad, Dp, C)

    emb = jnp.stack([prep(es), prep(en)], axis=0)                   # (2, B_pad, Dp, C)
    emb = (emb.reshape(2, nt, tb, dp, C)
              .transpose(1, 0, 2, 3, 4)
              .reshape(nt, 2 * tb, dp, C))                          # per tile: [static | non-static]

    # Conv weights (F, C, 1, k) -> im2col (k*C, F); the three k-blocks in one slab.
    wcat = jnp.concatenate(
        [jnp.transpose(params[f"conv{k}_w"][:, :, 0, :], (2, 1, 0)).reshape(k * C, F)
         for k in ks], axis=0)                                      # (sum k*C, F)
    bcat = jnp.stack([params[f"conv{k}_b"] for k in ks], axis=0)    # (3, F)

    # fc weight: PyTorch flatten order is [f*3 + ki]; kernel activation is [ki*F + f].
    fcw = jnp.concatenate([params["fc_w"][:, ki::3] for ki in range(len(ks))],
                          axis=1).T                                 # (3F, nc)
    fc_all = jnp.concatenate([fcw, params["fc_b"][None, :]], axis=0)  # (3F+1, nc)
    fc_all = jnp.pad(fc_all, ((0, 0), (0, ncp - nc)))               # (3F+1, 128)

    kernel = functools.partial(word_shallow_kernel, ks=ks, d=D, wp=wp, tb=tb)
    out = pl.pallas_call(
        kernel,
        out_shape=jax.ShapeDtypeStruct((b_pad, ncp), jnp.float32),
        grid_spec=pltpu.PrefetchScalarGridSpec(
            num_scalar_prefetch=0,
            grid=(nt,),
            in_specs=[
                pl.BlockSpec((1, 2 * tb, dp, C), lambda i: (i, 0, 0, 0)),  # embeddings
                pl.BlockSpec(wcat.shape, lambda i: (0, 0)),                # conv weights
                pl.BlockSpec(bcat.shape, lambda i: (0, 0)),                # conv biases
                pl.BlockSpec(fc_all.shape, lambda i: (0, 0)),              # fc weight + bias
            ],
            out_specs=pl.BlockSpec((tb, ncp), lambda i: (i, 0)),
        ),
        compiler_params=pltpu.CompilerParams(
            dimension_semantics=("parallel",)),   # batch tiles are independent (v7x: 2 TCs)
    )(emb, wcat, bcat, fc_all)
    return out[:B, :nc]


def reference_forward(x_idx, params):
    """Pure-JAX mirror of the PyTorch forward (eval mode)."""
    es = params["emb_static"][x_idx]       # (B, C, D)
    en = params["emb_non_static"][x_idx]   # (B, C, D)

    def branch(e, w, b):
        e4 = e[:, :, None, :]              # NCHW: (B, C, 1, D)
        y = jax.lax.conv_general_dilated(
            e4, w, (1, 1), "VALID",
            dimension_numbers=("NCHW", "OIHW", "NCHW"))
        return jax.nn.relu(y + b[None, :, None, None])

    feats = []
    for k in (3, 4, 5):
        w, b = params[f"conv{k}_w"], params[f"conv{k}_b"]
        xk = branch(es, w, b) + branch(en, w, b)      # (B, F, 1, W_out)
        feats.append(jnp.max(xk, axis=-1))            # (B, F, 1)
    out = jnp.concatenate(feats, axis=-1)             # (B, F, 3)
    out = out.reshape(out.shape[0], -1)               # (B, 3F) interleaved
    return out @ params["fc_w"].T + params["fc_b"]


if __name__ == "__main__":
    # Small synthetic configuration consistent with the module's __init__.
    VOCAB, EMB_DIM = 50, 32          # embedding_dim
    MAX_SEQ_LEN = 8                  # conv in-channels
    N_FILTERS = 16                   # num_per_filters
    NUM_CLASS = 4
    BATCH = 24

    key = jax.random.PRNGKey(0)
    keys = jax.random.split(key, 10)
    # Both embedding tables start from the same "pretrained" matrix, as in __init__.
    emb_tbl = 0.1 * jax.random.normal(keys[0], (VOCAB, EMB_DIM), jnp.float32)
    params = {
        "emb_static": emb_tbl,
        "emb_non_static": emb_tbl,
        "conv3_w": 0.1 * jax.random.normal(keys[1], (N_FILTERS, MAX_SEQ_LEN, 1, 3), jnp.float32),
        "conv3_b": 0.1 * jax.random.normal(keys[2], (N_FILTERS,), jnp.float32),
        "conv4_w": 0.1 * jax.random.normal(keys[3], (N_FILTERS, MAX_SEQ_LEN, 1, 4), jnp.float32),
        "conv4_b": 0.1 * jax.random.normal(keys[4], (N_FILTERS,), jnp.float32),
        "conv5_w": 0.1 * jax.random.normal(keys[5], (N_FILTERS, MAX_SEQ_LEN, 1, 5), jnp.float32),
        "conv5_b": 0.1 * jax.random.normal(keys[6], (N_FILTERS,), jnp.float32),
        "fc_w": 0.1 * jax.random.normal(keys[7], (NUM_CLASS, N_FILTERS * 3), jnp.float32),
        "fc_b": 0.1 * jax.random.normal(keys[8], (NUM_CLASS,), jnp.float32),
    }
    x_idx = jax.random.randint(keys[9], (BATCH, MAX_SEQ_LEN), 0, VOCAB)

    # batch_tile=8 -> 3 grid steps of 8 samples each (exercises the tiled grid).
    out = word_shallow_forward(x_idx, params, batch_tile=8)
    out = jax.block_until_ready(out)
    ref = jax.block_until_ready(reference_forward(x_idx, params))

    assert out.shape == (BATCH, NUM_CLASS), out.shape
    assert bool(jnp.allclose(out, ref, atol=1e-4, rtol=1e-4)), (out, ref)
    print("KERNEL_OK")
</pallas_src>

<mosaic_0001>
module attributes {stable_mosaic.version = 11 : i64} {
  func.func @word_shallow_kernel(%arg0: i32, %arg1: memref<1x16x40x8xf32, #tpu.memory_space<vmem>>, %arg2: memref<96x16xf32, #tpu.memory_space<vmem>>, %arg3: memref<3x16xf32, #tpu.memory_space<vmem>>, %arg4: memref<49x128xf32, #tpu.memory_space<vmem>>, %arg5: memref<8x128xf32, #tpu.memory_space<vmem>>) attributes {dimension_semantics = [#tpu.dimension_semantics<parallel>], iteration_bounds = array<i64: 3>, scalar_prefetch = 0 : i64, scratch_operands = 0 : i64, tpu.core_type = #tpu.core_type<tc>, window_params = [{transform_indices = @transform_0, window_bounds = array<i64: 1, 16, 40, 8>}, {pipeline_mode = #tpu.pipeline_mode<synchronous>, transform_indices = @transform_1, window_bounds = array<i64: 96, 16>}, {pipeline_mode = #tpu.pipeline_mode<synchronous>, transform_indices = @transform_2, window_bounds = array<i64: 3, 16>}, {pipeline_mode = #tpu.pipeline_mode<synchronous>, transform_indices = @transform_3, window_bounds = array<i64: 49, 128>}, {transform_indices = @transform_4, window_bounds = array<i64: 8, 128>}]} {
    %0 = tpu.iota {dimensions = array<i32: 1>} : vector<1x32x1xi32>
    %c0 = arith.constant 0 : index
    %c0_0 = arith.constant 0 : index
    %c0_1 = arith.constant 0 : index
    %c0_2 = arith.constant 0 : index
    %1 = vector.load %arg1[%c0, %c0_0, %c0_1, %c0_2] : memref<1x16x40x8xf32, #tpu.memory_space<vmem>>, vector<1x16x32x8xf32>
    %2 = vector.shape_cast %1 : vector<1x16x32x8xf32> to vector<16x32x8xf32>
    %c0_3 = arith.constant 0 : index
    %c0_4 = arith.constant 0 : index
    %c1 = arith.constant 1 : index
    %c0_5 = arith.constant 0 : index
    %3 = vector.load %arg1[%c0_3, %c0_4, %c1, %c0_5] : memref<1x16x40x8xf32, #tpu.memory_space<vmem>>, vector<1x16x32x8xf32>
    %4 = vector.shape_cast %3 : vector<1x16x32x8xf32> to vector<16x32x8xf32>
    %c0_6 = arith.constant 0 : index
    %c0_7 = arith.constant 0 : index
    %c2 = arith.constant 2 : index
    %c0_8 = arith.constant 0 : index
    %5 = vector.load %arg1[%c0_6, %c0_7, %c2, %c0_8] : memref<1x16x40x8xf32, #tpu.memory_space<vmem>>, vector<1x16x32x8xf32>
    %6 = vector.shape_cast %5 : vector<1x16x32x8xf32> to vector<16x32x8xf32>
    %7 = tpu.concatenate %2, %4, %6 in 2 : vector<16x32x8xf32>, vector<16x32x8xf32>, vector<16x32x8xf32> -> vector<16x32x24xf32>
    %8 = vector.shape_cast %7 : vector<16x32x24xf32> to vector<512x24xf32>
    %c0_9 = arith.constant 0 : index
    %c0_10 = arith.constant 0 : index
    %9 = vector.load %arg2[%c0_9, %c0_10] : memref<96x16xf32, #tpu.memory_space<vmem>>, vector<24x16xf32>
    %cst = arith.constant dense<0.000000e+00> : vector<512x16xf32>
    %10 = tpu.matmul %8, %9, %cst {dimension_numbers = #tpu.dot_dimension_numbers<[1], [0], [0], [1], [0, 0, 1, 1], [], []>} : vector<512x24xf32>, vector<24x16xf32>, vector<512x16xf32> -> vector<512x16xf32>
    %c0_11 = arith.constant 0 : index
    %c0_12 = arith.constant 0 : index
    %11 = vector.load %arg3[%c0_11, %c0_12] : memref<3x16xf32, #tpu.memory_space<vmem>>, vector<1x16xf32>
    %12 = vector.broadcast %11 : vector<1x16xf32> to vector<512x16xf32>
    %13 = arith.addf %10, %12 : vector<512x16xf32>
    %cst_13 = arith.constant 0.000000e+00 : f32
    %14 = vector.broadcast %cst_13 : f32 to vector<512x16xf32>
    %15 = arith.maximumf %13, %14 : vector<512x16xf32>
    %16 = vector.extract_strided_slice %15 {offsets = [0, 0], sizes = [256, 16], strides = [1, 1]} : vector<512x16xf32> to vector<256x16xf32>
    %17 = vector.extract_strided_slice %15 {offsets = [256, 0], sizes = [256, 16], strides = [1, 1]} : vector<512x16xf32> to vector<256x16xf32>
    %18 = arith.addf %16, %17 : vector<256x16xf32>
    %19 = vector.shape_cast %18 : vector<256x16xf32> to vector<8x32x16xf32>
    %c29_i32 = arith.constant 29 : i32
    %20 = vector.broadcast %c29_i32 : i32 to vector<1x32x1xi32>
    %21 = arith.cmpi sle, %0, %20 : vector<1x32x1xi32>
    %cst_14 = arith.constant 0.000000e+00 : f32
    %22 = vector.shape_cast %21 : vector<1x32x1xi1> to vector<1x32x1xi1>
    %23 = vector.broadcast %22 : vector<1x32x1xi1> to vector<8x32x16xi1>
    %24 = vector.broadcast %cst_14 : f32 to vector<8x32x16xf32>
    %25 = arith.select %23, %19, %24 : vector<8x32x16xi1>, vector<8x32x16xf32>
    %cst_15 = arith.constant dense<0xFF800000> : vector<8x16xf32>
    %26 = vector.multi_reduction <maximumf>, %25, %cst_15 [1] : vector<8x32x16xf32> to vector<8x16xf32>
    %c0_16 = arith.constant 0 : index
    %c0_17 = arith.constant 0 : index
    %c0_18 = arith.constant 0 : index
    %c0_19 = arith.constant 0 : index
    %27 = vector.load %arg1[%c0_16, %c0_17, %c0_18, %c0_19] : memref<1x16x40x8xf32, #tpu.memory_space<vmem>>, vector<1x16x32x8xf32>
    %28 = vector.shape_cast %27 : vector<1x16x32x8xf32> to vector<16x32x8xf32>
    %c0_20 = arith.constant 0 : index
    %c0_21 = arith.constant 0 : index
    %c1_22 = arith.constant 1 : index
    %c0_23 = arith.constant 0 : index
    %29 = vector.load %arg1[%c0_20, %c0_21, %c1_22, %c0_23] : memref<1x16x40x8xf32, #tpu.memory_space<vmem>>, vector<1x16x32x8xf32>
    %30 = vector.shape_cast %29 : vector<1x16x32x8xf32> to vector<16x32x8xf32>
    %c0_24 = arith.constant 0 : index
    %c0_25 = arith.constant 0 : index
    %c2_26 = arith.constant 2 : index
    %c0_27 = arith.constant 0 : index
    %31 = vector.load %arg1[%c0_24, %c0_25, %c2_26, %c0_27] : memref<1x16x40x8xf32, #tpu.memory_space<vmem>>, vector<1x16x32x8xf32>
    %32 = vector.shape_cast %31 : vector<1x16x32x8xf32> to vector<16x32x8xf32>
    %c0_28 = arith.constant 0 : index
    %c0_29 = arith.constant 0 : index
    %c3 = arith.constant 3 : index
    %c0_30 = arith.constant 0 : index
    %33 = vector.load %arg1[%c0_28, %c0_29, %c3, %c0_30] : memref<1x16x40x8xf32, #tpu.memory_space<vmem>>, vector<1x16x32x8xf32>
    %34 = vector.shape_cast %33 : vector<1x16x32x8xf32> to vector<16x32x8xf32>
    %35 = tpu.concatenate %28, %30, %32, %34 in 2 : vector<16x32x8xf32>, vector<16x32x8xf32>, vector<16x32x8xf32>, vector<16x32x8xf32> -> vector<16x32x32xf32>
    %36 = vector.shape_cast %35 : vector<16x32x32xf32> to vector<512x32xf32>
    %c24 = arith.constant 24 : index
    %c0_31 = arith.constant 0 : index
    %37 = vector.load %arg2[%c24, %c0_31] : memref<96x16xf32, #tpu.memory_space<vmem>>, vector<32x16xf32>
    %cst_32 = arith.constant dense<0.000000e+00> : vector<512x16xf32>
    %38 = tpu.matmul %36, %37, %cst_32 {dimension_numbers = #tpu.dot_dimension_numbers<[1], [0], [0], [1], [0, 0, 1, 1], [], []>} : vector<512x32xf32>, vector<32x16xf32>, vector<512x16xf32> -> vector<512x16xf32>
    %c1_33 = arith.constant 1 : index
    %c0_34 = arith.constant 0 : index
    %39 = vector.load %arg3[%c1_33, %c0_34] : memref<3x16xf32, #tpu.memory_space<vmem>>, vector<1x16xf32>
    %40 = vector.broadcast %39 : vector<1x16xf32> to vector<512x16xf32>
    %41 = arith.addf %38, %40 : vector<512x16xf32>
    %cst_35 = arith.constant 0.000000e+00 : f32
    %42 = vector.broadcast %cst_35 : f32 to vector<512x16xf32>
    %43 = arith.maximumf %41, %42 : vector<512x16xf32>
    %44 = vector.extract_strided_slice %43 {offsets = [0, 0], sizes = [256, 16], strides = [1, 1]} : vector<512x16xf32> to vector<256x16xf32>
    %45 = vector.extract_strided_slice %43 {offsets = [256, 0], sizes = [256, 16], strides = [1, 1]} : vector<512x16xf32> to vector<256x16xf32>
    %46 = arith.addf %44, %45 : vector<256x16xf32>
    %47 = vector.shape_cast %46 : vector<256x16xf32> to vector<8x32x16xf32>
    %c28_i32 = arith.constant 28 : i32
    %48 = vector.broadcast %c28_i32 : i32 to vector<1x32x1xi32>
    %49 = arith.cmpi sle, %0, %48 : vector<1x32x1xi32>
    %cst_36 = arith.constant 0.000000e+00 : f32
    %50 = vector.shape_cast %49 : vector<1x32x1xi1> to vector<1x32x1xi1>
    %51 = vector.broadcast %50 : vector<1x32x1xi1> to vector<8x32x16xi1>
    %52 = vector.broadcast %cst_36 : f32 to vector<8x32x16xf32>
    %53 = arith.select %51, %47, %52 : vector<8x32x16xi1>, vector<8x32x16xf32>
    %cst_37 = arith.constant dense<0xFF800000> : vector<8x16xf32>
    %54 = vector.multi_reduction <maximumf>, %53, %cst_37 [1] : vector<8x32x16xf32> to vector<8x16xf32>
    %c0_38 = arith.constant 0 : index
    %c0_39 = arith.constant 0 : index
    %c0_40 = arith.constant 0 : index
    %c0_41 = arith.constant 0 : index
    %55 = vector.load %arg1[%c0_38, %c0_39, %c0_40, %c0_41] : memref<1x16x40x8xf32, #tpu.memory_space<vmem>>, vector<1x16x32x8xf32>
    %56 = vector.shape_cast %55 : vector<1x16x32x8xf32> to vector<16x32x8xf32>
    %c0_42 = arith.constant 0 : index
    %c0_43 = arith.constant 0 : index
    %c1_44 = arith.constant 1 : index
    %c0_45 = arith.constant 0 : index
    %57 = vector.load %arg1[%c0_42, %c0_43, %c1_44, %c0_45] : memref<1x16x40x8xf32, #tpu.memory_space<vmem>>, vector<1x16x32x8xf32>
    %58 = vector.shape_cast %57 : vector<1x16x32x8xf32> to vector<16x32x8xf32>
    %c0_46 = arith.constant 0 : index
    %c0_47 = arith.constant 0 : index
    %c2_48 = arith.constant 2 : index
    %c0_49 = arith.constant 0 : index
    %59 = vector.load %arg1[%c0_46, %c0_47, %c2_48, %c0_49] : memref<1x16x40x8xf32, #tpu.memory_space<vmem>>, vector<1x16x32x8xf32>
    %60 = vector.shape_cast %59 : vector<1x16x32x8xf32> to vector<16x32x8xf32>
    %c0_50 = arith.constant 0 : index
    %c0_51 = arith.constant 0 : index
    %c3_52 = arith.constant 3 : index
    %c0_53 = arith.constant 0 : index
    %61 = vector.load %arg1[%c0_50, %c0_51, %c3_52, %c0_53] : memref<1x16x40x8xf32, #tpu.memory_space<vmem>>, vector<1x16x32x8xf32>
    %62 = vector.shape_cast %61 : vector<1x16x32x8xf32> to vector<16x32x8xf32>
    %c0_54 = arith.constant 0 : index
    %c0_55 = arith.constant 0 : index
    %c4 = arith.constant 4 : index
    %c0_56 = arith.constant 0 : index
    %63 = vector.load %arg1[%c0_54, %c0_55, %c4, %c0_56] : memref<1x16x40x8xf32, #tpu.memory_space<vmem>>, vector<1x16x32x8xf32>
    %64 = vector.shape_cast %63 : vector<1x16x32x8xf32> to vector<16x32x8xf32>
    %65 = tpu.concatenate %56, %58, %60, %62, %64 in 2 : vector<16x32x8xf32>, vector<16x32x8xf32>, vector<16x32x8xf32>, vector<16x32x8xf32>, vector<16x32x8xf32> -> vector<16x32x40xf32>
    %66 = vector.shape_cast %65 : vector<16x32x40xf32> to vector<512x40xf32>
    %c56 = arith.constant 56 : index
    %c0_57 = arith.constant 0 : index
    %67 = vector.load %arg2[%c56, %c0_57] : memref<96x16xf32, #tpu.memory_space<vmem>>, vector<40x16xf32>
    %cst_58 = arith.constant dense<0.000000e+00> : vector<512x16xf32>
    %68 = tpu.matmul %66, %67, %cst_58 {dimension_numbers = #tpu.dot_dimension_numbers<[1], [0], [0], [1], [0, 0, 1, 1], [], []>} : vector<512x40xf32>, vector<40x16xf32>, vector<512x16xf32> -> vector<512x16xf32>
    %c2_59 = arith.constant 2 : index
    %c0_60 = arith.constant 0 : index
    %69 = vector.load %arg3[%c2_59, %c0_60] : memref<3x16xf32, #tpu.memory_space<vmem>>, vector<1x16xf32>
    %70 = vector.broadcast %69 : vector<1x16xf32> to vector<512x16xf32>
    %71 = arith.addf %68, %70 : vector<512x16xf32>
    %cst_61 = arith.constant 0.000000e+00 : f32
    %72 = vector.broadcast %cst_61 : f32 to vector<512x16xf32>
    %73 = arith.maximumf %71, %72 : vector<512x16xf32>
    %74 = vector.extract_strided_slice %73 {offsets = [0, 0], sizes = [256, 16], strides = [1, 1]} : vector<512x16xf32> to vector<256x16xf32>
    %75 = vector.extract_strided_slice %73 {offsets = [256, 0], sizes = [256, 16], strides = [1, 1]} : vector<512x16xf32> to vector<256x16xf32>
    %76 = arith.addf %74, %75 : vector<256x16xf32>
    %77 = vector.shape_cast %76 : vector<256x16xf32> to vector<8x32x16xf32>
    %c27_i32 = arith.constant 27 : i32
    %78 = vector.broadcast %c27_i32 : i32 to vector<1x32x1xi32>
    %79 = arith.cmpi sle, %0, %78 : vector<1x32x1xi32>
    %cst_62 = arith.constant 0.000000e+00 : f32
    %80 = vector.shape_cast %79 : vector<1x32x1xi1> to vector<1x32x1xi1>
    %81 = vector.broadcast %80 : vector<1x32x1xi1> to vector<8x32x16xi1>
    %82 = vector.broadcast %cst_62 : f32 to vector<8x32x16xf32>
    %83 = arith.select %81, %77, %82 : vector<8x32x16xi1>, vector<8x32x16xf32>
    %cst_63 = arith.constant dense<0xFF800000> : vector<8x16xf32>
    %84 = vector.multi_reduction <maximumf>, %83, %cst_63 [1] : vector<8x32x16xf32> to vector<8x16xf32>
    %85 = tpu.concatenate %26, %54, %84 in 1 : vector<8x16xf32>, vector<8x16xf32>, vector<8x16xf32> -> vector<8x48xf32>
    %c0_64 = arith.constant 0 : index
    %c0_65 = arith.constant 0 : index
    %86 = vector.load %arg4[%c0_64, %c0_65] : memref<49x128xf32, #tpu.memory_space<vmem>>, vector<48x128xf32>
    %cst_66 = arith.constant dense<0.000000e+00> : vector<8x128xf32>
    %87 = tpu.matmul %85, %86, %cst_66 {dimension_numbers = #tpu.dot_dimension_numbers<[1], [0], [0], [1], [0, 0, 1, 1], [], []>} : vector<8x48xf32>, vector<48x128xf32>, vector<8x128xf32> -> vector<8x128xf32>
    %c48 = arith.constant 48 : index
    %c0_67 = arith.constant 0 : index
    %88 = vector.load %arg4[%c48, %c0_67] : memref<49x128xf32, #tpu.memory_space<vmem>>, vector<1x128xf32>
    %89 = vector.broadcast %88 : vector<1x128xf32> to vector<8x128xf32>
    %90 = arith.addf %87, %89 : vector<8x128xf32>
    %c0_68 = arith.constant 0 : index
    %c0_69 = arith.constant 0 : index
    %91 = vector.load %arg5[%c0_68, %c0_69] : memref<8x128xf32, #tpu.memory_space<vmem>>, vector<8x128xf32>
    tpu.vector_store %arg5[%c0_68, %c0_69], %90 {strides = array<i32>} : memref<8x128xf32, #tpu.memory_space<vmem>>, vector<8x128xf32>,
    return
  }
  func.func @transform_0(%arg0: i32) -> (i32, i32, i32, i32) {
    %c0_i32 = arith.constant 0 : i32
    %c0_i32_0 = arith.constant 0 : i32
    %c0_i32_1 = arith.constant 0 : i32
    %c0_i32_2 = arith.constant 0 : i32
    return %arg0, %c0_i32, %c0_i32_0, %c0_i32_1 : i32, i32, i32, i32
  }
  func.func @transform_1(%arg0: i32) -> (i32, i32) {
    %c0_i32 = arith.constant 0 : i32
    %c0_i32_0 = arith.constant 0 : i32
    %c0_i32_1 = arith.constant 0 : i32
    return %c0_i32, %c0_i32_0 : i32, i32
  }
  func.func @transform_2(%arg0: i32) -> (i32, i32) {
    %c0_i32 = arith.constant 0 : i32
    %c0_i32_0 = arith.constant 0 : i32
    %c0_i32_1 = arith.constant 0 : i32
    return %c0_i32, %c0_i32_0 : i32, i32
  }
  func.func @transform_3(%arg0: i32) -> (i32, i32) {
    %c0_i32 = arith.constant 0 : i32
    %c0_i32_0 = arith.constant 0 : i32
    %c0_i32_1 = arith.constant 0 : i32
    return %c0_i32, %c0_i32_0 : i32, i32
  }
  func.func @transform_4(%arg0: i32) -> (i32, i32) {
    %c0_i32 = arith.constant 0 : i32
    %c0_i32_0 = arith.constant 0 : i32
    return %arg0, %c0_i32 : i32, i32
  }
}

</mosaic_0001>

<bundles_post_ra>
// kernel: word_shallow_forward.1
= control target key start
LH: loop header
LB: loop body
LE: loop exit
PB: predicated region body
PF: predicated region fallthrough
CT: control target
= control target key end

     0   :  { %s5332_s15 = smov 0   ;;  %s7647_s0 = inlined_call_operand.vmem [shape: f32[3,16,40,8], index: 0, kind: input, shape index: {}]   ;;  %s7648_s1 = inlined_call_operand.vmem [shape: f32[96,16], index: 1, kind: input, shape index: {}]   ;;  %s7649_s2 = inlined_call_operand.vmem [shape: f32[3,16], index: 2, kind: input, shape index: {}]   ;;  %s7650_s3 = inlined_call_operand.vmem [shape: f32[49,128], index: 3, kind: input, shape index: {}]   ;;  %s7651_s4 = inlined_call_operand.vmem [shape: f32[24,128], index: 4, kind: output, shape index: {}]  }
   0x1 LB: > { %s4496_s16 = sadd.s32 4294967295, %s5298_s15   ;;  %p4500_p0 = scmp.ge.s32.totalorder %s5298_s15, 1  ;;  %s5298_s15 = sphi %s5332_s15, %s14_s15  }
   0x2   : > { %p162_p1 = scmp.lt.s32.totalorder %s5298_s15, 4 }
   0x4   : > { %p163_p2 = pnand %p4500_p0, %p162_p1 }
   0x6   : > { %166 = sbr.rel (%p163_p2) target bundleno = 1217 (0x4c1), region = 36 }
   0xd   : > { %p187_p3 = scmp.lt.s32.totalorder %s4496_s16, 2  ;;  %v1035_v0 = vld [vmem:[%s7648_s1] sm:$0xff]  ;;  %v1036_v1 = vld [vmem:[%s7648_s1 + $0x8] sm:$0xff]  ;;  %v1037_v3 = vld [vmem:[%s7648_s1 + $0x10] sm:$0xff]  ;;  %s5300_s27 = smov 16   ;;  %vm905_vm0 = vcmask 64512  }
   0xe   : > { %v5240_v2 = vpack.c.bf16 %v1036_v1, %v1035_v0  ;;  %s5301_s28 = smov 8   ;;  %vm970_vm1 = vcmask 130048   ;;  %vm1043_vm2 = vcmask 195584   ;;  %s5303_s24 = smov 32   ;;  %vm2258_vm3 = vcmask 261120  }
   0xf   : > { %s7790_s16 = smov (!%p187_p3, %s4496_s16), 2  ;;  %vm3474_vm4 = vcmask 326656   ;;  %vm4304_vm6 = vcmask 1041409   ;;  %vm4306_vm7 = vcmask 1042434   ;;  %vm4308_vm8 = vcmask 1043459  }
  0x10   : > { %5241 = vmatprep.subr.bf16.mxu0 %v5240_v2  ;;  %5269 = vmatprep.subr.bf16.mxu1 %v5240_v2  ;;  %s5273_s23 = smul.u32 640, %s7790_s16  ;;  %vm4310_vm9 = vcmask 1044484   ;;  %vm4312_vm10 = vcmask 1045509   ;;  %vm4314_vm11 = vcmask 1046534   ;;  %vm4316_vm12 = vcmask 1047559   ;;  %s4502_s29 = sshll.u32 %s7790_s16, 3 }
  0x11   : > { %5243 = vmatpush3.bf16.msra.mxu0 %v5240_v2  ;;  %5271 = vmatpush3.bf16.msra.mxu1 %v5240_v2  ;;  %vm5305_vm15 = vmmov 0   ;;  %s195_s6 = scalar_lea.vmem %s7651_s4, %s4502_s29 }
  0x12   : > { %4917 = vmatprep.subr.mxu0 %v1037_v3  ;;  %5270 = vmatprep.subr.mxu1 %v1037_v3  ;;  %s5355_s26 = scalar_lea.vmem %s7647_s0, %s5273_s23  ;;  %s5302_s23 = smov 24  }
  0x13   : > { %v329_v4 = vld [vmem:[%s5355_s26 + $0x2] sm:$0xff]  ;;  %v330_v6 = vld [vmem:[%s5355_s26 + $0xa] sm:$0xff]  ;;  %v268_v8 = vld [vmem:[%s5355_s26 + $0x19] sm:$0xff] }
  0x14   : > { %v265_v5 = vld [vmem:[%s5355_s26 + $0x1] sm:$0xff]  ;;  %713 = vrot.lane.b32.xlu1 %v329_v4, %s5300_s27  ;;  %v266_v7 = vld [vmem:[%s5355_s26 + $0x9] sm:$0xff]  ;;  %v267_v9 = vld [vmem:[%s5355_s26 + $0x11] sm:$0xff] }
  0x15   : > { %457 = vrot.lane.b32.xlu0 %v265_v5, %s5301_s28  ;;  %4918 = vmatpush3.msra.mxu0 %v1037_v3  ;;  %v332_v10 = vld [vmem:[%s5355_s26 + $0x1a] sm:$0xff]  ;;  %v331_v11 = vld [vmem:[%s5355_s26 + $0x12] sm:$0xff]  ;;  %v269_v12 = vld [vmem:[%s5355_s26 + $0x29] sm:$0xff] }
  0x16   : > { %5272 = vmatpush3.msra.mxu1 %v1037_v3  ;;  %v299_v13 = vld [vmem:[%s5355_s26 + $0x151] sm:$0xff]  ;;  %v300_v15 = vld [vmem:[%s5355_s26 + $0x159] sm:$0xff]  ;;  %v301_v21 = vld [vmem:[%s5355_s26 + $0x169] sm:$0xff] }
  0x17   : > { %v363_v14 = vld [vmem:[%s5355_s26 + $0x152] sm:$0xff]  ;;  %v333_v16 = vld [vmem:[%s5355_s26 + $0x2a] sm:$0xff]  ;;  %v364_v19 = vld [vmem:[%s5355_s26 + $0x15a] sm:$0xff] }
  0x18   : > { %715 = vrot.lane.b32.xlu1 %v330_v6, %s5300_s27  ;;  %v270_v17 = vld [vmem:[%s5355_s26 + $0x31] sm:$0xff]  ;;  %v271_v20 = vld [vmem:[%s5355_s26 + $0x39] sm:$0xff]  ;;  %v272_v25 = vld [vmem:[%s5355_s26 + $0x41] sm:$0xff] }
  0x19   : > { %459 = vrot.lane.b32.xlu0 %v266_v7, %s5301_s28  ;;  %v334_v18 = vld [vmem:[%s5355_s26 + $0x32] sm:$0xff]  ;;  %v365_v22 = vld [vmem:[%s5355_s26 + $0x16a] sm:$0xff]  ;;  %v335_v24 = vld [vmem:[%s5355_s26 + $0x3a] sm:$0xff] }
  0x1a   : > { %v302_v23 = vld [vmem:[%s5355_s26 + $0x171] sm:$0xff]  ;;  %v336_v26 = vld [vmem:[%s5355_s26 + $0x42] sm:$0xff]  ;;  %v303_v29 = vld [vmem:[%s5355_s26 + $0x179] sm:$0xff] }
  0x1b   : > { %v366_v27 = vld [vmem:[%s5355_s26 + $0x172] sm:$0xff]  ;;  %v367_v30 = vld [vmem:[%s5355_s26 + $0x17a] sm:$0xff]  ;;  %v368_v35 = vld [vmem:[%s5355_s26 + $0x182] sm:$0xff] }
  0x1c   : > { %463 = vrot.lane.b32.xlu1 %v268_v8, %s5301_s28  ;;  %v273_v28 = vld [vmem:[%s5355_s26 + $0x51] sm:$0xff]  ;;  %v304_v31 = vld [vmem:[%s5355_s26 + $0x181] sm:$0xff]  ;;  %v274_v33 = vld [vmem:[%s5355_s26 + $0x59] sm:$0xff] }
  0x1d   : > { %461 = vrot.lane.b32.xlu0 %v267_v9, %s5301_s28  ;;  %v337_v32 = vld [vmem:[%s5355_s26 + $0x52] sm:$0xff]  ;;  %v338_v34 = vld [vmem:[%s5355_s26 + $0x5a] sm:$0xff]  ;;  %v339_v40 = vld [vmem:[%s5355_s26 + $0x62] sm:$0xff] }
  0x1e   : > { %v275_v36 = vld [vmem:[%s5355_s26 + $0x61] sm:$0xff]  ;;  %v305_v37 = vld [vmem:[%s5355_s26 + $0x191] sm:$0xff]  ;;  %v306_v39 = vld [vmem:[%s5355_s26 + $0x199] sm:$0xff] }
  0x1f   : > { %v369_v38 = vld [vmem:[%s5355_s26 + $0x192] sm:$0xff]  ;;  %v276_v41 = vld [vmem:[%s5355_s26 + $0x69] sm:$0xff]  ;;  %v370_v43 = vld [vmem:[%s5355_s26 + $0x19a] sm:$0xff] }
  0x20   : > { %719 = vrot.lane.b32.xlu1 %v332_v10, %s5300_s27  ;;  %v340_v42 = vld [vmem:[%s5355_s26 + $0x6a] sm:$0xff]  ;;  %v277_v44 = vld [vmem:[%s5355_s26 + $0x79] sm:$0xff]  ;;  %v307_v45 = vld [vmem:[%s5355_s26 + $0x1a1] sm:$0xff] }
  0x21   : > { %717 = vrot.lane.b32.xlu0 %v331_v11, %s5300_s27  ;;  %v371_v46 = vld [vmem:[%s5355_s26 + $0x1a2] sm:$0xff]  ;;  %v341_v48 = vld [vmem:[%s5355_s26 + $0x7a] sm:$0xff]  ;;  %v372_v51 = vld [vmem:[%s5355_s26 + $0x1aa] sm:$0xff] }
  0x22   : > { %v308_v47 = vld [vmem:[%s5355_s26 + $0x1a9] sm:$0xff]  ;;  %v278_v49 = vld [vmem:[%s5355_s26 + $0x81] sm:$0xff]  ;;  %v309_v53 = vld [vmem:[%s5355_s26 + $0x1b9] sm:$0xff] }
  0x23   : > { %v342_v50 = vld [vmem:[%s5355_s26 + $0x82] sm:$0xff]  ;;  %v373_v54 = vld [vmem:[%s5355_s26 + $0x1ba] sm:$0xff]  ;;  %v343_v56 = vld [vmem:[%s5355_s26 + $0x8a] sm:$0xff] }
  0x24   : > { %465 = vrot.lane.b32.xlu1 %v269_v12, %s5301_s28  ;;  %v279_v52 = vld [vmem:[%s5355_s26 + $0x89] sm:$0xff]  ;;  %v310_v55 = vld [vmem:[%s5355_s26 + $0x1c1] sm:$0xff]  ;;  %v280_v57 = vld [vmem:[%s5355_s26 + $0x91] sm:$0xff] }
  0x25   : > { %525 = vrot.lane.b32.xlu0 %v299_v13, %s5301_s28  ;;  %v344_v58 = vld [vmem:[%s5355_s26 + $0x92] sm:$0xff]  ;;  %v374_v59 = vld [vmem:[%s5355_s26 + $0x1c2] sm:$0xff]  ;;  %v375_v63 = vld [vmem:[%s5355_s26 + $0x1ca] sm:$0xff] }
  0x26   : > { %v281_v60 = vld [vmem:[%s5355_s26 + $0xa1] sm:$0xff]  ;;  %v311_v61 = vld [vmem:[%s5355_s26 + $0x1c9] sm:$0xff]  ;;  %v312_v0 = vld [vmem:[%s5355_s26 + $0x1d1] sm:$0xff] }
  0x27   : > { %v201_v62 = vld [vmem:[%s5355_s26] sm:$0xff]  ;;  %v202_v5 = vld [vmem:[%s5355_s26 + $0x8] sm:$0xff]  ;;  %v376_v13 = vld [vmem:[%s5355_s26 + $0x1d2] sm:$0xff] }
  0x28   : > { %781 = vrot.lane.b32.xlu1 %v363_v14, %s5300_s27  ;;  %v345_v6 = vld [vmem:[%s5355_s26 + $0xa2] sm:$0xff]  ;;  %v346_v12 = vld [vmem:[%s5355_s26 + $0xaa] sm:$0xff] }
  0x29   : > { %527 = vrot.lane.b32.xlu0 %v300_v15, %s5301_s28  ;;  %v282_v7 = vld [vmem:[%s5355_s26 + $0xa9] sm:$0xff] }
  0x2c   : > { %721 = vrot.lane.b32.xlu1 %v333_v16, %s5300_s27  ;;  %v204_v16 = vld [vmem:[%s5355_s26 + $0x18] sm:$0xff] }
  0x2d   : > { %467 = vrot.lane.b32.xlu0 %v270_v17, %s5301_s28  ;;  %v203_v17 = vld [vmem:[%s5355_s26 + $0x10] sm:$0xff] }
  0x30   : > { %723 = vrot.lane.b32.xlu1 %v334_v18, %s5300_s27  ;;  %v283_v18 = vld [vmem:[%s5355_s26 + $0xb1] sm:$0xff] }
  0x31   : > { %783 = vrot.lane.b32.xlu0 %v364_v19, %s5300_s27  ;;  %v313_v19 = vld [vmem:[%s5355_s26 + $0x1e1] sm:$0xff] }
  0x34   : > { %469 = vrot.lane.b32.xlu1 %v271_v20, %s5301_s28 }
  0x35   : > { %529 = vrot.lane.b32.xlu0 %v301_v21, %s5301_s28 }
  0x38   : > { %785 = vrot.lane.b32.xlu1 %v365_v22, %s5300_s27 }
  0x39   : > { %531 = vrot.lane.b32.xlu0 %v302_v23, %s5301_s28 }
  0x3c   : > { %725 = vrot.lane.b32.xlu1 %v335_v24, %s5300_s27 }
  0x3d   : > { %471 = vrot.lane.b32.xlu0 %v272_v25, %s5301_s28 }
  0x40   : > { %727 = vrot.lane.b32.xlu1 %v336_v26, %s5300_s27  ;;  %v377_v26 = vld [vmem:[%s5355_s26 + $0x1e2] sm:$0xff] }
  0x41   : > { %787 = vrot.lane.b32.xlu0 %v366_v27, %s5300_s27  ;;  %v314_v27 = vld [vmem:[%s5355_s26 + $0x1e9] sm:$0xff] }
  0x44   : > { %473 = vrot.lane.b32.xlu1 %v273_v28, %s5301_s28 }
  0x45   : > { %533 = vrot.lane.b32.xlu0 %v303_v29, %s5301_s28 }
  0x48   : > { %789 = vrot.lane.b32.xlu1 %v367_v30, %s5300_s27  ;;  %v235_v30 = vld [vmem:[%s5355_s26 + $0x150] sm:$0xff] }
  0x49   : > { %535 = vrot.lane.b32.xlu0 %v304_v31, %s5301_s28  ;;  %v347_v31 = vld [vmem:[%s5355_s26 + $0xb2] sm:$0xff] }
  0x4c   : > { %729 = vrot.lane.b32.xlu1 %v337_v32, %s5300_s27  ;;  %v284_v32 = vld [vmem:[%s5355_s26 + $0xb9] sm:$0xff] }
  0x4d   : > { %475 = vrot.lane.b32.xlu0 %v274_v33, %s5301_s28 }
  0x50   : > { %731 = vrot.lane.b32.xlu1 %v338_v34, %s5300_s27 }
  0x51   : > { %791 = vrot.lane.b32.xlu0 %v368_v35, %s5300_s27 }
  0x54   : > { %477 = vrot.lane.b32.xlu1 %v275_v36, %s5301_s28  ;;  %v205_v36 = vld [vmem:[%s5355_s26 + $0x28] sm:$0xff] }
  0x55   : > { %537 = vrot.lane.b32.xlu0 %v305_v37, %s5301_s28 }
  0x58   : > { %793 = vrot.lane.b32.xlu1 %v369_v38, %s5300_s27  ;;  %v348_v38 = vld [vmem:[%s5355_s26 + $0xba] sm:$0xff] }
  0x59   : > { %539 = vrot.lane.b32.xlu0 %v306_v39, %s5301_s28  ;;  %v378_v39 = vld [vmem:[%s5355_s26 + $0x1ea] sm:$0xff] }
  0x5c   : > { %733 = vrot.lane.b32.xlu1 %v339_v40, %s5300_s27 }
  0x5d   : > { %479 = vrot.lane.b32.xlu0 %v276_v41, %s5301_s28 }
  0x60   : > { %735 = vrot.lane.b32.xlu1 %v340_v42, %s5300_s27 }
  0x61   : > { %795 = vrot.lane.b32.xlu0 %v370_v43, %s5300_s27  ;;  %v236_v43 = vld [vmem:[%s5355_s26 + $0x158] sm:$0xff] }
  0x64   : > { %481 = vrot.lane.b32.xlu1 %v277_v44, %s5301_s28 }
  0x65   : > { %541 = vrot.lane.b32.xlu0 %v307_v45, %s5301_s28  ;;  %v206_v45 = vld [vmem:[%s5355_s26 + $0x30] sm:$0xff] }
  0x68   : > { %797 = vrot.lane.b32.xlu1 %v371_v46, %s5300_s27  ;;  %v285_v46 = vld [vmem:[%s5355_s26 + $0xc9] sm:$0xff] }
  0x69   : > { %543 = vrot.lane.b32.xlu0 %v308_v47, %s5301_s28  ;;  %v315_v47 = vld [vmem:[%s5355_s26 + $0x1f1] sm:$0xff] }
  0x6c   : > { %737 = vrot.lane.b32.xlu1 %v341_v48, %s5300_s27 }
  0x6d   : > { %483 = vrot.lane.b32.xlu0 %v278_v49, %s5301_s28 }
  0x70   : > { %739 = vrot.lane.b32.xlu1 %v342_v50, %s5300_s27 }
  0x71   : > { %799 = vrot.lane.b32.xlu0 %v372_v51, %s5300_s27 }
  0x74   : > { %485 = vrot.lane.b32.xlu1 %v279_v52, %s5301_s28 }
  0x75   : > { %545 = vrot.lane.b32.xlu0 %v309_v53, %s5301_s28 }
  0x78   : > { %801 = vrot.lane.b32.xlu1 %v373_v54, %s5300_s27  ;;  %v379_v54 = vld [vmem:[%s5355_s26 + $0x1f2] sm:$0xff] }
  0x79   : > { %547 = vrot.lane.b32.xlu0 %v310_v55, %s5301_s28  ;;  %v316_v55 = vld [vmem:[%s5355_s26 + $0x1f9] sm:$0xff] }
  0x7c   : > { %741 = vrot.lane.b32.xlu1 %v343_v56, %s5300_s27 }
  0x7d   : > { %487 = vrot.lane.b32.xlu0 %v280_v57, %s5301_s28 }
  0x80   : > { %743 = vrot.lane.b32.xlu1 %v344_v58, %s5300_s27  ;;  %v237_v58 = vld [vmem:[%s5355_s26 + $0x168] sm:$0xff] }
  0x81   : > { %803 = vrot.lane.b32.xlu0 %v374_v59, %s5300_s27  ;;  %v349_v59 = vld [vmem:[%s5355_s26 + $0xca] sm:$0xff] }
  0x84   : > { %489 = vrot.lane.b32.xlu1 %v281_v60, %s5301_s28  ;;  %v286_v60 = vld [vmem:[%s5355_s26 + $0xd1] sm:$0xff] }
  0x85   : > { %549 = vrot.lane.b32.xlu0 %v311_v61, %s5301_s28 }
  0x86   : > { %v714_v1 = vpop.permute.xlu1 %713 }
  0x87   : > { %v458_v2 = vpop.permute.xlu0 %457 }
  0x88   : > { %v906_v3 = vsel %vm905_vm0, %v201_v62, %v458_v2  ;;  %805 = vrot.lane.b32.xlu1 %v375_v63, %s5300_s27  ;;  %v350_v2 = vld [vmem:[%s5355_s26 + $0xd2] sm:$0xff] }
  0x89   : > { %551 = vrot.lane.b32.xlu0 %v312_v0, %s5301_s28  ;;  %v5480_v4 = vsel %vm970_vm1, %v906_v3, %v714_v1  ;;  %v207_v0 = vld [vmem:[%s5355_s26 + $0x38] sm:$0xff] }
  0x8a   : > { %4919 = vmatprep.mubr.msk.f32.mxu0 %vm1043_vm2, %v5480_v4  ;;  %v716_v8 = vpop.permute.xlu1 %715  ;;  %v380_v3 = vld [vmem:[%s5355_s26 + $0x1fa] sm:$0xff] }
  0x8b   : > { %v460_v9 = vpop.permute.xlu0 %459 }
  0x8c   : > { %v907_v10 = vsel %vm905_vm0, %v202_v5, %v460_v9  ;;  %745 = vrot.lane.b32.xlu1 %v345_v6, %s5300_s27 }
  0x8d   : > { %491 = vrot.lane.b32.xlu0 %v282_v7, %s5301_s28  ;;  %v5491_v11 = vsel %vm970_vm1, %v907_v10, %v716_v8  ;;  %v238_v8 = vld [vmem:[%s5355_s26 + $0x170] sm:$0xff]  ;;  %v208_v10 = vld [vmem:[%s5355_s26 + $0x40] sm:$0xff] }
  0x8e   : > { %4920 = vmatmul.mubr.msk.f32.vlgmr.msra.gmra.mrb[0].mxu0 %vm1043_vm2, %v5491_v11  ;;  %v464_v14 = vpop.permute.xlu1 %463 }
  0x8f   : > { %v462_v15 = vpop.permute.xlu0 %461  ;;  %v909_v20 = vsel %vm905_vm0, %v204_v16, %v464_v14 }
  0x90   : > { %747 = vrot.lane.b32.xlu1 %v346_v12, %s5300_s27  ;;  %v908_v21 = vsel %vm905_vm0, %v203_v17, %v462_v15  ;;  %v287_v12 = vld [vmem:[%s5355_s26 + $0xd9] sm:$0xff] }
  0x91   : > { %807 = vrot.lane.b32.xlu0 %v376_v13, %s5300_s27  ;;  %v317_v13 = vld [vmem:[%s5355_s26 + $0x209] sm:$0xff] }
  0x92   : > { %v720_v22 = vpop.permute.xlu1 %719 }
  0x93   : > { %v718_v23 = vpop.permute.xlu0 %717  ;;  %v5506_v24 = vsel %vm970_vm1, %v909_v20, %v720_v22  ;;  %v381_v20 = vld [vmem:[%s5355_s26 + $0x20a] sm:$0xff] }
  0x94   : > { %v5509_v25 = vsel %vm970_vm1, %v908_v21, %v718_v23  ;;  %493 = vrot.lane.b32.xlu1 %v283_v18, %s5301_s28  ;;  %v318_v21 = vld [vmem:[%s5355_s26 + $0x211] sm:$0xff] }
  0x95   : > { %553 = vrot.lane.b32.xlu0 %v313_v19, %s5301_s28  ;;  %4922 = vmatprep.mubr.msk.f32.mxu0 %vm1043_vm2, %v5509_v25 }
  0x96   : > { %4923 = vmatmul.mubr.msk.f32.gmra.mrb[2].mxu0 %vm1043_vm2, %v5506_v24  ;;  %v466_v28 = vpop.permute.xlu1 %465 }
  0x97   : > { %v526_v29 = vpop.permute.xlu0 %525  ;;  %v910_v40 = vsel %vm905_vm0, %v205_v36, %v466_v28  ;;  %v288_v28 = vld [vmem:[%s5355_s26 + $0xe1] sm:$0xff] }
  0x98   : > { %809 = vrot.lane.b32.xlu1 %v377_v26, %s5300_s27  ;;  %v940_v33 = vsel %vm905_vm0, %v235_v30, %v526_v29  ;;  %v239_v26 = vld [vmem:[%s5355_s26 + $0x178] sm:$0xff] }
  0x99   : > { %555 = vrot.lane.b32.xlu0 %v314_v27, %s5301_s28  ;;  %v351_v27 = vld [vmem:[%s5355_s26 + $0xda] sm:$0xff] }
  0x9a   : > { %v782_v34 = vpop.permute.xlu1 %781 }
  0x9b   : > { %v528_v35 = vpop.permute.xlu0 %527  ;;  %v5527_v37 = vsel %vm970_vm1, %v940_v33, %v782_v34  ;;  %v352_v34 = vld [vmem:[%s5355_s26 + $0xe2] sm:$0xff] }
  0x9c   : > { %749 = vrot.lane.b32.xlu1 %v347_v31, %s5300_s27  ;;  %4970 = vmatprep.mubr.msk.f32.mxu1 %vm1043_vm2, %v5527_v37  ;;  %v941_v48 = vsel %vm905_vm0, %v236_v43, %v528_v35  ;;  %v382_v35 = vld [vmem:[%s5355_s26 + $0x212] sm:$0xff] }
  0x9d   : > { %495 = vrot.lane.b32.xlu0 %v284_v32, %s5301_s28  ;;  %v209_v32 = vld [vmem:[%s5355_s26 + $0x50] sm:$0xff] }
  0x9e   : > { %v722_v41 = vpop.permute.xlu1 %721  ;;  %v289_v43 = vld [vmem:[%s5355_s26 + $0xf1] sm:$0xff] }
  0x9f   : > { %v468_v42 = vpop.permute.xlu0 %467  ;;  %v5538_v44 = vsel %vm970_vm1, %v910_v40, %v722_v41  ;;  %v240_v40 = vld [vmem:[%s5355_s26 + $0x180] sm:$0xff] }
  0xa0   : > { %751 = vrot.lane.b32.xlu1 %v348_v38, %s5300_s27  ;;  %4925 = vmatprep.mubr.msk.f32.mxu0 %vm1043_vm2, %v5538_v44  ;;  %v911_v49 = vsel %vm905_vm0, %v206_v45, %v468_v42  ;;  %v210_v42 = vld [vmem:[%s5355_s26 + $0x58] sm:$0xff] }
  0xa1   : > { %811 = vrot.lane.b32.xlu0 %v378_v39, %s5300_s27  ;;  %v319_v45 = vld [vmem:[%s5355_s26 + $0x219] sm:$0xff] }
  0xa2   : > { %v724_v50 = vpop.permute.xlu1 %723 }
  0xa3   : > { %v784_v51 = vpop.permute.xlu0 %783  ;;  %v5550_v52 = vsel %vm970_vm1, %v911_v49, %v724_v50 }
  0xa4   : > { %v5553_v53 = vsel %vm970_vm1, %v941_v48, %v784_v51  ;;  %497 = vrot.lane.b32.xlu1 %v285_v46, %s5301_s28  ;;  %4926 = vmatmul.mubr.msk.f32.gmra.mrb[4].mxu0 %vm1043_vm2, %v5550_v52 }
  0xa5   : > { %557 = vrot.lane.b32.xlu0 %v315_v47, %s5301_s28  ;;  %4971 = vmatmul.mubr.msk.f32.vlgmr.msra.gmra.mrb[0].mxu1 %vm1043_vm2, %v5553_v53 }
  0xa6   : > { %v470_v56 = vpop.permute.xlu1 %469 }
  0xa7   : > { %v530_v57 = vpop.permute.xlu0 %529  ;;  %v912_v5 = vsel %vm905_vm0, %v207_v0, %v470_v56  ;;  %v211_v0 = vld [vmem:[%s5355_s26 + $0x60] sm:$0xff] }
  0xa8   : > { %813 = vrot.lane.b32.xlu1 %v379_v54, %s5300_s27  ;;  %v942_v61 = vsel %vm905_vm0, %v237_v58, %v530_v57  ;;  %v383_v54 = vld [vmem:[%s5355_s26 + $0x21a] sm:$0xff]  ;;  %v241_v58 = vld [vmem:[%s5355_s26 + $0x190] sm:$0xff] }
  0xa9   : > { %559 = vrot.lane.b32.xlu0 %v316_v55, %s5301_s28  ;;  %v320_v55 = vld [vmem:[%s5355_s26 + $0x221] sm:$0xff] }
  0xaa   : > { %v786_v62 = vpop.permute.xlu1 %785 }
  0xab   : > { %v532_v63 = vpop.permute.xlu0 %531  ;;  %v5571_v1 = vsel %vm970_vm1, %v942_v61, %v786_v62 }
  0xac   : > { %753 = vrot.lane.b32.xlu1 %v349_v59, %s5300_s27  ;;  %4973 = vmatprep.mubr.msk.f32.mxu1 %vm1043_vm2, %v5571_v1  ;;  %v943_v14 = vsel %vm905_vm0, %v238_v8, %v532_v63  ;;  %v353_v59 = vld [vmem:[%s5355_s26 + $0xf2] sm:$0xff] }
  0xad   : > { %499 = vrot.lane.b32.xlu0 %v286_v60, %s5301_s28  ;;  %v290_v60 = vld [vmem:[%s5355_s26 + $0xf9] sm:$0xff] }
  0xae   : > { %v726_v6 = vpop.permute.xlu1 %725 }
  0xaf   : > { %v472_v7 = vpop.permute.xlu0 %471  ;;  %v5582_v9 = vsel %vm970_vm1, %v912_v5, %v726_v6  ;;  %v384_v5 = vld [vmem:[%s5355_s26 + $0x222] sm:$0xff] }
  0xb0   : > { %755 = vrot.lane.b32.xlu1 %v350_v2, %s5300_s27  ;;  %4928 = vmatprep.mubr.msk.f32.mxu0 %vm1043_vm2, %v5582_v9  ;;  %v913_v15 = vsel %vm905_vm0, %v208_v10, %v472_v7  ;;  %v242_v10 = vld [vmem:[%s5355_s26 + $0x198] sm:$0xff] }
  0xb1   : > { %815 = vrot.lane.b32.xlu0 %v380_v3, %s5300_s27  ;;  %v354_v3 = vld [vmem:[%s5355_s26 + $0xfa] sm:$0xff] }
  0xb2   : > { %v728_v16 = vpop.permute.xlu1 %727 }
  0xb3   : > { %v788_v17 = vpop.permute.xlu0 %787  ;;  %v5594_v18 = vsel %vm970_vm1, %v913_v15, %v728_v16  ;;  %v321_v15 = vld [vmem:[%s5355_s26 + $0x231] sm:$0xff] }
  0xb4   : > { %v5597_v19 = vsel %vm970_vm1, %v943_v14, %v788_v17  ;;  %501 = vrot.lane.b32.xlu1 %v287_v12, %s5301_s28  ;;  %4929 = vmatmul.mubr.msk.f32.gmra.mrb[6].mxu0 %vm1043_vm2, %v5594_v18  ;;  %v291_v14 = vld [vmem:[%s5355_s26 + $0x101] sm:$0xff] }
  0xb5   : > { %561 = vrot.lane.b32.xlu0 %v317_v13, %s5301_s28  ;;  %4974 = vmatmul.mubr.msk.f32.gmra.mrb[2].mxu1 %vm1043_vm2, %v5597_v19  ;;  %v212_v13 = vld [vmem:[%s5355_s26 + $0x68] sm:$0xff] }
  0xb6   : > { %v474_v22 = vpop.permute.xlu1 %473 }
  0xb7   : > { %v534_v23 = vpop.permute.xlu0 %533  ;;  %v914_v36 = vsel %vm905_vm0, %v209_v32, %v474_v22  ;;  %v292_v32 = vld [vmem:[%s5355_s26 + $0x109] sm:$0xff] }
  0xb8   : > { %817 = vrot.lane.b32.xlu1 %v381_v20, %s5300_s27  ;;  %v944_v29 = vsel %vm905_vm0, %v239_v26, %v534_v23  ;;  %v385_v26 = vld [vmem:[%s5355_s26 + $0x232] sm:$0xff] }
  0xb9   : > { %563 = vrot.lane.b32.xlu0 %v318_v21, %s5301_s28 }
  0xba   : > { %v790_v30 = vpop.permute.xlu1 %789 }
  0xbb   : > { %v536_v31 = vpop.permute.xlu0 %535  ;;  %v5615_v33 = vsel %vm970_vm1, %v944_v29, %v790_v30  ;;  %v243_v30 = vld [vmem:[%s5355_s26 + $0x1a0] sm:$0xff] }
  0xbc   : > { %757 = vrot.lane.b32.xlu1 %v351_v27, %s5300_s27  ;;  %4976 = vmatprep.mubr.msk.f32.mxu1 %vm1043_vm2, %v5615_v33  ;;  %v945_v46 = vsel %vm905_vm0, %v240_v40, %v536_v31  ;;  %v322_v27 = vld [vmem:[%s5355_s26 + $0x239] sm:$0xff]  ;;  %v355_v31 = vld [vmem:[%s5355_s26 + $0x102] sm:$0xff]  ;;  %v356_v40 = vld [vmem:[%s5355_s26 + $0x10a] sm:$0xff] }
  0xbd   : > { %503 = vrot.lane.b32.xlu0 %v288_v28, %s5301_s28 }
  0xbe   : > { %v730_v38 = vpop.permute.xlu1 %729 }
  0xbf   : > { %v476_v39 = vpop.permute.xlu0 %475  ;;  %v5626_v41 = vsel %vm970_vm1, %v914_v36, %v730_v38  ;;  %v213_v38 = vld [vmem:[%s5355_s26 + $0x78] sm:$0xff] }
  0xc0   : > { %759 = vrot.lane.b32.xlu1 %v352_v34, %s5300_s27  ;;  %4931 = vmatprep.mubr.msk.f32.mxu0 %vm1043_vm2, %v5626_v41  ;;  %v915_v47 = vsel %vm905_vm0, %v210_v42, %v476_v39  ;;  %v386_v42 = vld [vmem:[%s5355_s26 + $0x23a] sm:$0xff] }
  0xc1   : > { %819 = vrot.lane.b32.xlu0 %v382_v35, %s5300_s27 }
  0xc2   : > { %v732_v48 = vpop.permute.xlu1 %731 }
  0xc3   : > { %v792_v49 = vpop.permute.xlu0 %791  ;;  %v5638_v50 = vsel %vm970_vm1, %v915_v47, %v732_v48  ;;  %v244_v47 = vld [vmem:[%s5355_s26 + $0x1a8] sm:$0xff] }
  0xc4   : > { %v5641_v51 = vsel %vm970_vm1, %v945_v46, %v792_v49  ;;  %505 = vrot.lane.b32.xlu1 %v289_v43, %s5301_s28  ;;  %4932 = vmatmul.mubr.msk.f32.gmra.mrb[8].mxu0 %vm1043_vm2, %v5638_v50  ;;  %v214_v49 = vld [vmem:[%s5355_s26 + $0x80] sm:$0xff] }
  0xc5   : > { %565 = vrot.lane.b32.xlu0 %v319_v45, %s5301_s28  ;;  %4977 = vmatmul.mubr.msk.f32.gmra.mrb[4].mxu1 %vm1043_vm2, %v5641_v51 }
  0xc6   : > { %v478_v56 = vpop.permute.xlu1 %477 }
  0xc7   : > { %v538_v57 = vpop.permute.xlu0 %537  ;;  %v916_v6 = vsel %vm905_vm0, %v211_v0, %v478_v56 }
  0xc8   : > { %821 = vrot.lane.b32.xlu1 %v383_v54, %s5300_s27  ;;  %v946_v61 = vsel %vm905_vm0, %v241_v58, %v538_v57  ;;  %v293_v54 = vld [vmem:[%s5355_s26 + $0x119] sm:$0xff] }
  0xc9   : > { %567 = vrot.lane.b32.xlu0 %v320_v55, %s5301_s28  ;;  %v323_v55 = vld [vmem:[%s5355_s26 + $0x241] sm:$0xff] }
  0xca   : > { %v794_v62 = vpop.permute.xlu1 %793 }
  0xcb   : > { %v540_v63 = vpop.permute.xlu0 %539  ;;  %v5659_v2 = vsel %vm970_vm1, %v946_v61, %v794_v62  ;;  %v387_v62 = vld [vmem:[%s5355_s26 + $0x242] sm:$0xff] }
  0xcc   : > { %761 = vrot.lane.b32.xlu1 %v353_v59, %s5300_s27  ;;  %4979 = vmatprep.mubr.msk.f32.mxu1 %vm1043_vm2, %v5659_v2  ;;  %v947_v16 = vsel %vm905_vm0, %v242_v10, %v540_v63  ;;  %v324_v63 = vld [vmem:[%s5355_s26 + $0x249] sm:$0xff] }
  0xcd   : > { %507 = vrot.lane.b32.xlu0 %v290_v60, %s5301_s28 }
  0xce   : > { %v734_v7 = vpop.permute.xlu1 %733 }
  0xcf   : > { %v480_v8 = vpop.permute.xlu0 %479  ;;  %v5670_v12 = vsel %vm970_vm1, %v916_v6, %v734_v7  ;;  %v357_v6 = vld [vmem:[%s5355_s26 + $0x11a] sm:$0xff] }
  0xd0   : > { %763 = vrot.lane.b32.xlu1 %v354_v3, %s5300_s27  ;;  %4934 = vmatprep.mubr.msk.f32.mxu0 %vm1043_vm2, %v5670_v12  ;;  %v917_v17 = vsel %vm905_vm0, %v212_v13, %v480_v8  ;;  %v294_v7 = vld [vmem:[%s5355_s26 + $0x121] sm:$0xff] }
  0xd1   : > { %823 = vrot.lane.b32.xlu0 %v384_v5, %s5300_s27  ;;  %v245_v5 = vld [vmem:[%s5355_s26 + $0x1b8] sm:$0xff] }
  0xd2   : > { %v736_v20 = vpop.permute.xlu1 %735 }
  0xd3   : > { %v796_v21 = vpop.permute.xlu0 %795  ;;  %v5682_v22 = vsel %vm970_vm1, %v917_v17, %v736_v20  ;;  %v388_v17 = vld [vmem:[%s5355_s26 + $0x24a] sm:$0xff] }
  0xd4   : > { %v5685_v23 = vsel %vm970_vm1, %v947_v16, %v796_v21  ;;  %509 = vrot.lane.b32.xlu1 %v291_v14, %s5301_s28  ;;  %4935 = vmatmul.mubr.msk.f32.gmra.mrb[10].mxu0 %vm1043_vm2, %v5682_v22  ;;  %v215_v14 = vld [vmem:[%s5355_s26 + $0x88] sm:$0xff] }
  0xd5   : > { %569 = vrot.lane.b32.xlu0 %v321_v15, %s5301_s28  ;;  %4980 = vmatmul.mubr.msk.f32.gmra.mrb[6].mxu1 %vm1043_vm2, %v5685_v23  ;;  %v358_v16 = vld [vmem:[%s5355_s26 + $0x122] sm:$0xff] }
  0xd6   : > { %v482_v28 = vpop.permute.xlu1 %481 }
  0xd7   : > { %v542_v29 = vpop.permute.xlu0 %541  ;;  %v918_v43 = vsel %vm905_vm0, %v213_v38, %v482_v28 }
  0xd8   : > { %825 = vrot.lane.b32.xlu1 %v385_v26, %s5300_s27  ;;  %v948_v34 = vsel %vm905_vm0, %v243_v30, %v542_v29  ;;  %v216_v29 = vld [vmem:[%s5355_s26 + $0x90] sm:$0xff] }
  0xd9   : > { %571 = vrot.lane.b32.xlu0 %v322_v27, %s5301_s28  ;;  %v246_v27 = vld [vmem:[%s5355_s26 + $0x1c0] sm:$0xff]  ;;  %v295_v30 = vld [vmem:[%s5355_s26 + $0x129] sm:$0xff] }
  0xda   : > { %v798_v35 = vpop.permute.xlu1 %797 }
  0xdb   : > { %v544_v36 = vpop.permute.xlu0 %543  ;;  %v5703_v39 = vsel %vm970_vm1, %v948_v34, %v798_v35 }
  0xdc   : > { %765 = vrot.lane.b32.xlu1 %v355_v31, %s5300_s27  ;;  %4982 = vmatprep.mubr.msk.f32.mxu1 %vm1043_vm2, %v5703_v39  ;;  %v949_v56 = vsel %vm905_vm0, %v244_v47, %v544_v36  ;;  %v325_v31 = vld [vmem:[%s5355_s26 + $0x259] sm:$0xff]  ;;  %v247_v47 = vld [vmem:[%s5355_s26 + $0x1c8] sm:$0xff] }
  0xdd   : > { %511 = vrot.lane.b32.xlu0 %v292_v32, %s5301_s28 }
  0xde   : > { %v738_v45 = vpop.permute.xlu1 %737 }
  0xdf   : > { %v484_v46 = vpop.permute.xlu0 %483  ;;  %v5714_v48 = vsel %vm970_vm1, %v918_v43, %v738_v45  ;;  %v326_v43 = vld [vmem:[%s5355_s26 + $0x261] sm:$0xff] }
  0xe0   : > { %767 = vrot.lane.b32.xlu1 %v356_v40, %s5300_s27  ;;  %4937 = vmatprep.mubr.msk.f32.mxu0 %vm1043_vm2, %v5714_v48  ;;  %v919_v57 = vsel %vm905_vm0, %v214_v49, %v484_v46  ;;  %v359_v49 = vld [vmem:[%s5355_s26 + $0x12a] sm:$0xff] }
  0xe1   : > { %827 = vrot.lane.b32.xlu0 %v386_v42, %s5300_s27  ;;  %v389_v42 = vld [vmem:[%s5355_s26 + $0x25a] sm:$0xff] }
  0xe2   : > { %v740_v58 = vpop.permute.xlu1 %739 }
  0xe3   : > { %v800_v59 = vpop.permute.xlu0 %799  ;;  %v5726_v60 = vsel %vm970_vm1, %v919_v57, %v740_v58  ;;  %v217_v58 = vld [vmem:[%s5355_s26 + $0xa0] sm:$0xff] }
  0xe4   : > { %v5729_v61 = vsel %vm970_vm1, %v949_v56, %v800_v59  ;;  %513 = vrot.lane.b32.xlu1 %v293_v54, %s5301_s28  ;;  %4938 = vmatmul.mubr.msk.f32.gmra.mrb[12].mxu0 %vm1043_vm2, %v5726_v60  ;;  %v296_v54 = vld [vmem:[%s5355_s26 + $0x131] sm:$0xff] }
  0xe5   : > { %573 = vrot.lane.b32.xlu0 %v323_v55, %s5301_s28  ;;  %4983 = vmatmul.mubr.msk.f32.gmra.mrb[8].mxu1 %vm1043_vm2, %v5729_v61 }
  0xe6   : > { %v486_v0 = vpop.permute.xlu1 %485 }
  0xe7   : > { %v546_v3 = vpop.permute.xlu0 %545  ;;  %v920_v20 = vsel %vm905_vm0, %v215_v14, %v486_v0  ;;  %v297_v14 = vld [vmem:[%s5355_s26 + $0x141] sm:$0xff] }
  0xe8   : > { %829 = vrot.lane.b32.xlu1 %v387_v62, %s5300_s27  ;;  %v950_v8 = vsel %vm905_vm0, %v245_v5, %v546_v3  ;;  %v360_v62 = vld [vmem:[%s5355_s26 + $0x132] sm:$0xff] }
  0xe9   : > { %575 = vrot.lane.b32.xlu0 %v324_v63, %s5301_s28  ;;  %v390_v63 = vld [vmem:[%s5355_s26 + $0x262] sm:$0xff]  ;;  %v248_v3 = vld [vmem:[%s5355_s26 + $0x1d0] sm:$0xff] }
  0xea   : > { %v802_v10 = vpop.permute.xlu1 %801 }
  0xeb   : > { %v548_v13 = vpop.permute.xlu0 %547  ;;  %v5747_v15 = vsel %vm970_vm1, %v950_v8, %v802_v10  ;;  %v218_v8 = vld [vmem:[%s5355_s26 + $0xa8] sm:$0xff]  ;;  %v2249_v10 = vld [vmem:[%s7648_s1 + $0x18] sm:$0xff] }
  0xec   : > { %7672 = vst [vmem:[#allocation2_spill] sm:$0xff] %v5747_v15  ;;  %769 = vrot.lane.b32.xlu1 %v357_v6, %s5300_s27  ;;  %4985 = vmatprep.mubr.msk.f32.mxu1 %vm1043_vm2, %v5747_v15  ;;  %v951_v32 = vsel %vm905_vm0, %v246_v27, %v548_v13  ;;  %v2250_v13 = vld [vmem:[%s7648_s1 + $0x20] sm:$0xff] }
  0xed   : > { %515 = vrot.lane.b32.xlu0 %v294_v7, %s5301_s28 }
  0xee   : > { %v742_v21 = vpop.permute.xlu1 %741 }
  0xef   : > { %v488_v26 = vpop.permute.xlu0 %487  ;;  %v5758_v28 = vsel %vm970_vm1, %v920_v20, %v742_v21  ;;  %v3464_v20 = vld [vmem:[%s7648_s1 + $0x38] sm:$0xff]  ;;  %v3465_v21 = vld [vmem:[%s7648_s1 + $0x40] sm:$0xff] }
  0xf0   : > { %771 = vrot.lane.b32.xlu1 %v358_v16, %s5300_s27  ;;  %4940 = vmatprep.mubr.msk.f32.mxu0 %vm1043_vm2, %v5758_v28  ;;  %v921_v34 = vsel %vm905_vm0, %v216_v29, %v488_v26  ;;  %v5244_v16 = vpack.c.bf16 %v2250_v13, %v2249_v10  ;;  %v392_v10 = vld [vmem:[%s5355_s26 + $0x272] sm:$0xff] }
  0xf1   : > { %831 = vrot.lane.b32.xlu0 %v388_v17, %s5300_s27  ;;  %v327_v17 = vld [vmem:[%s5355_s26 + $0x269] sm:$0xff] }
  0xf2   : > { %v744_v35 = vpop.permute.xlu1 %743  ;;  %5245 = vmatprep.subr.bf16.mxu1 %v5244_v16 }
  0xf3   : > { %v804_v36 = vpop.permute.xlu0 %803  ;;  %v5770_v38 = vsel %vm970_vm1, %v921_v34, %v744_v35  ;;  %5247 = vmatpush3.bf16.msra.mxu1 %v5244_v16  ;;  %v2251_v35 = vld [vmem:[%s7648_s1 + $0x28] sm:$0xff] }
  0xf4   : > { %v5773_v40 = vsel %vm970_vm1, %v951_v32, %v804_v36  ;;  %517 = vrot.lane.b32.xlu1 %v295_v30, %s5301_s28  ;;  %4941 = vmatmul.mubr.msk.f32.gmra.mrb[14].mxu0 %vm1043_vm2, %v5770_v38  ;;  %v2252_v36 = vld [vmem:[%s7648_s1 + $0x30] sm:$0xff] }
  0xf5   : > { %7673 = vst [vmem:[#allocation3_spill] sm:$0xff] %v5773_v40  ;;  %577 = vrot.lane.b32.xlu0 %v325_v31, %s5301_s28  ;;  %4986 = vmatmul.mubr.msk.f32.gmra.mrb[10].mxu1 %vm1043_vm2, %v5773_v40  ;;  %v5252_v31 = vpack.c.bf16 %v3465_v21, %v3464_v20  ;;  %v220_v21 = vld [vmem:[%s5355_s26 + $0xb8] sm:$0xff] }
  0xf6   : > { %v490_v45 = vpop.permute.xlu1 %489 }
  0xf7   : > { %v550_v46 = vpop.permute.xlu0 %549  ;;  %v922_v0 = vsel %vm905_vm0, %v217_v58, %v490_v45  ;;  %v328_v45 = vld [vmem:[%s5355_s26 + $0x271] sm:$0xff]  ;;  %5253 = vmatprep.subr.bf16.mxu0 %v5252_v31  ;;  %v298_v58 = vld [vmem:[%s5355_s26 + $0x149] sm:$0xff] }
  0xf8   : > { %833 = vrot.lane.b32.xlu1 %v389_v42, %s5300_s27  ;;  %v952_v55 = vsel %vm905_vm0, %v247_v47, %v550_v46  ;;  %v391_v42 = vld [vmem:[%s5355_s26 + $0x26a] sm:$0xff]  ;;  %5255 = vmatpush3.bf16.msra.mxu0 %v5252_v31 }
  0xf9   : > { %579 = vrot.lane.b32.xlu0 %v326_v43, %s5301_s28  ;;  %v5248_v43 = vpack.c.bf16 %v2252_v36, %v2251_v35  ;;  %v3466_v46 = vld [vmem:[%s7648_s1 + $0x48] sm:$0xff]  ;;  %v3467_v47 = vld [vmem:[%s7648_s1 + $0x50] sm:$0xff] }
  0xfa   : > { %v806_v56 = vpop.permute.xlu1 %805 }
  0xfb   : > { %v552_v57 = vpop.permute.xlu0 %551  ;;  %v5791_v59 = vsel %vm970_vm1, %v952_v55, %v806_v56  ;;  %5249 = vmatprep.subr.bf16.mxu1 %v5248_v43  ;;  %v5256_v55 = vpack.c.bf16 %v3467_v47, %v3466_v46  ;;  %v249_v56 = vld [vmem:[%s5355_s26 + $0x1e0] sm:$0xff] }
  0xfc   : > { %7674 = vst [vmem:[#allocation4_spill] sm:$0xff] %v5791_v59  ;;  %773 = vrot.lane.b32.xlu1 %v359_v49, %s5300_s27  ;;  %4988 = vmatprep.mubr.msk.f32.mxu1 %vm1043_vm2, %v5791_v59  ;;  %v953_v26 = vsel %vm905_vm0, %v248_v3, %v552_v57  ;;  %v361_v57 = vld [vmem:[%s5355_s26 + $0x142] sm:$0xff]  ;;  %v219_v3 = vld [vmem:[%s5355_s26 + $0xb0] sm:$0xff] }
  0xfd   : > { %519 = vrot.lane.b32.xlu0 %v296_v54, %s5301_s28  ;;  %5251 = vmatpush3.bf16.msra.mxu1 %v5248_v43  ;;  %v3081_v43 = vld [vmem:[%s5355_s26 + $0xc] sm:$0xff] }
  0xfe   : > { %v746_v5 = vpop.permute.xlu1 %745  ;;  %5257 = vmatprep.subr.bf16.mxu0 %v5256_v55 }
  0xff   : > { %v492_v6 = vpop.permute.xlu0 %491  ;;  %v5802_v7 = vsel %vm970_vm1, %v922_v0, %v746_v5  ;;  %5259 = vmatpush3.bf16.msra.mxu0 %v5256_v55  ;;  %v1867_v55 = vld [vmem:[%s5355_s26 + $0x13] sm:$0xff] }
 0x100   : > { %775 = vrot.lane.b32.xlu1 %v360_v62, %s5300_s27  ;;  %4943 = vmatprep.mubr.msk.f32.mxu0 %vm1043_vm2, %v5802_v7  ;;  %v923_v27 = vsel %vm905_vm0, %v218_v8, %v492_v6  ;;  %v3468_v6 = vld [vmem:[%s7648_s1 + $0x58] sm:$0xff]  ;;  %v362_v8 = vld [vmem:[%s5355_s26 + $0x14a] sm:$0xff] }
 0x101   : > { %835 = vrot.lane.b32.xlu0 %v390_v63, %s5300_s27  ;;  %5127 = vmatprep.subr.mxu0 %v3468_v6 }
 0x102   : > { %v748_v29 = vpop.permute.xlu1 %747 }
 0x103   : > { %v808_v30 = vpop.permute.xlu0 %807  ;;  %v5826_v32 = vsel %vm970_vm1, %v923_v27, %v748_v29  ;;  %5128 = vmatpush3.msra.mxu0 %v3468_v6  ;;  %v1865_v27 = vld [vmem:[%s5355_s26 + $0x3] sm:$0xff] }
 0x104   : > { %v5829_v34 = vsel %vm970_vm1, %v953_v26, %v808_v30  ;;  %521 = vrot.lane.b32.xlu1 %v297_v14, %s5301_s28  ;;  %4944 = vmatmul.mubr.msk.f32.gmra.mrb[16].mxu0 %vm1043_vm2, %v5826_v32  ;;  %v1866_v26 = vld [vmem:[%s5355_s26 + $0xb] sm:$0xff] }
 0x105   : > { %7675 = vst [vmem:[#allocation5_spill] sm:$0xff] %v5829_v34  ;;  %581 = vrot.lane.b32.xlu0 %v327_v17, %s5301_s28  ;;  %4989 = vmatmul.mubr.msk.f32.gmra.mrb[12].mxu1 %vm1043_vm2, %v5829_v34  ;;  %v250_v17 = vld [vmem:[%s5355_s26 + $0x1e8] sm:$0xff]  ;;  %v233_v34 = vld [vmem:[%s5355_s26 + $0x140] sm:$0xff] }
 0x106   : > { %v494_v49 = vpop.permute.xlu1 %493 }
 0x107   : > { %v554_v54 = vpop.permute.xlu0 %553  ;;  %v924_v13 = vsel %vm905_vm0, %v219_v3, %v494_v49  ;;  %v251_v49 = vld [vmem:[%s5355_s26 + $0x1f0] sm:$0xff] }
 0x108   : > { %837 = vrot.lane.b32.xlu1 %v391_v42, %s5300_s27  ;;  %v954_v62 = vsel %vm905_vm0, %v249_v56, %v554_v54  ;;  %v1868_v54 = vld [vmem:[%s5355_s26 + $0x1b] sm:$0xff] }
 0x109   : > { %583 = vrot.lane.b32.xlu0 %v328_v45, %s5301_s28  ;;  %v3080_v45 = vld [vmem:[%s5355_s26 + $0x4] sm:$0xff]  ;;  %v3082_v3 = vld [vmem:[%s5355_s26 + $0x14] sm:$0xff] }
 0x10a   : > { %v810_v63 = vpop.permute.xlu1 %809 }
 0x10b   : > { %v556_v0 = vpop.permute.xlu0 %555  ;;  %v5859_v5 = vsel %vm970_vm1, %v954_v62, %v810_v63  ;;  %v221_v62 = vld [vmem:[%s5355_s26 + $0xc8] sm:$0xff] }
 0x10c   : > { %7676 = vst [vmem:[#allocation6_spill] sm:$0xff] %v5859_v5  ;;  %777 = vrot.lane.b32.xlu1 %v361_v57, %s5300_s27  ;;  %4991 = vmatprep.mubr.msk.f32.mxu1 %vm1043_vm2, %v5859_v5  ;;  %v955_v29 = vsel %vm905_vm0, %v250_v17, %v556_v0  ;;  %v3083_v0 = vld [vmem:[%s5355_s26 + $0x1c] sm:$0xff]  ;;  %v1870_v17 = vld [vmem:[%s5355_s26 + $0x33] sm:$0xff] }
 0x10d   : > { %523 = vrot.lane.b32.xlu0 %v298_v58, %s5301_s28  ;;  %v1891_v5 = vld [vmem:[%s5355_s26 + $0x103] sm:$0xff] }
 0x10e   : > { %v750_v14 = vpop.permute.xlu1 %749 }
 0x10f   : > { %v496_v16 = vpop.permute.xlu0 %495  ;;  %v5873_v20 = vsel %vm970_vm1, %v924_v13, %v750_v14  ;;  %v252_v13 = vld [vmem:[%s5355_s26 + $0x1f8] sm:$0xff] }
 0x110   : > { %779 = vrot.lane.b32.xlu1 %v362_v8, %s5300_s27  ;;  %4946 = vmatprep.mubr.msk.f32.mxu0 %vm1043_vm2, %v5873_v20  ;;  %v925_v30 = vsel %vm905_vm0, %v220_v21, %v496_v16  ;;  %v222_v16 = vld [vmem:[%s5355_s26 + $0xd0] sm:$0xff] }
 0x111   : > { %839 = vrot.lane.b32.xlu0 %v392_v10, %s5300_s27  ;;  %v1869_v21 = vld [vmem:[%s5355_s26 + $0x2b] sm:$0xff] }
 0x112   : > { %v752_v31 = vpop.permute.xlu1 %751 }
 0x113   : > { %v812_v35 = vpop.permute.xlu0 %811  ;;  %v5885_v36 = vsel %vm970_vm1, %v925_v30, %v752_v31 }
 0x114   : > { %v5888_v42 = vsel %vm970_vm1, %v955_v29, %v812_v35  ;;  %1995 = vrot.lane.b32.xlu1 %v1866_v26, %s5302_s23  ;;  %4947 = vmatmul.mubr.msk.f32.gmra.mrb[18].mxu0 %vm1043_vm2, %v5885_v36 }
 0x115   : > { %7677 = vst [vmem:[#allocation7_spill] sm:$0xff] %v5888_v42  ;;  %1993 = vrot.lane.b32.xlu0 %v1865_v27, %s5302_s23  ;;  %4992 = vmatmul.mubr.msk.f32.gmra.mrb[14].mxu1 %vm1043_vm2, %v5888_v42 }
 0x116   : > { %v498_v46 = vpop.permute.xlu1 %497 }
 0x117   : > { %v558_v47 = vpop.permute.xlu0 %557  ;;  %v926_v6 = vsel %vm905_vm0, %v221_v62, %v498_v46  ;;  %v223_v62 = vld [vmem:[%s5355_s26 + $0xd8] sm:$0xff] }
 0x118   : > { %3210 = vrot.lane.b32.xlu1 %v3081_v43, %s5303_s24  ;;  %v956_v56 = vsel %vm905_vm0, %v251_v49, %v558_v47  ;;  %v3085_v43 = vld [vmem:[%s5355_s26 + $0x34] sm:$0xff]  ;;  %v253_v49 = vld [vmem:[%s5355_s26 + $0x208] sm:$0xff] }
 0x119   : > { %3208 = vrot.lane.b32.xlu0 %v3080_v45, %s5303_s24  ;;  %v3084_v45 = vld [vmem:[%s5355_s26 + $0x2c] sm:$0xff] }
 0x11a   : > { %v814_v57 = vpop.permute.xlu1 %813 }
 0x11b   : > { %v560_v58 = vpop.permute.xlu0 %559  ;;  %v5906_v63 = vsel %vm970_vm1, %v956_v56, %v814_v57 }
 0x11c   : > { %7678 = vst [vmem:[#allocation8_spill] sm:$0xff] %v5906_v63  ;;  %1999 = vrot.lane.b32.xlu1 %v1868_v54, %s5302_s23  ;;  %4994 = vmatprep.mubr.msk.f32.mxu1 %vm1043_vm2, %v5906_v63  ;;  %v957_v26 = vsel %vm905_vm0, %v252_v13, %v560_v58  ;;  %v1872_v54 = vld [vmem:[%s5355_s26 + $0x43] sm:$0xff] }
 0x11d   : > { %1997 = vrot.lane.b32.xlu0 %v1867_v55, %s5302_s23  ;;  %v1871_v55 = vld [vmem:[%s5355_s26 + $0x3b] sm:$0xff] }
 0x11e   : > { %v754_v8 = vpop.permute.xlu1 %753 }
 0x11f   : > { %v500_v10 = vpop.permute.xlu0 %499  ;;  %v5917_v14 = vsel %vm970_vm1, %v926_v6, %v754_v8  ;;  %v3086_v6 = vld [vmem:[%s5355_s26 + $0x3c] sm:$0xff] }
 0x120   : > { %3214 = vrot.lane.b32.xlu1 %v3083_v0, %s5303_s24  ;;  %4949 = vmatprep.mubr.msk.f32.mxu0 %vm1043_vm2, %v5917_v14  ;;  %v927_v27 = vsel %vm905_vm0, %v222_v16, %v500_v10  ;;  %v254_v16 = vld [vmem:[%s5355_s26 + $0x210] sm:$0xff] }
 0x121   : > { %3212 = vrot.lane.b32.xlu0 %v3082_v3, %s5303_s24  ;;  %v3087_v3 = vld [vmem:[%s5355_s26 + $0x44] sm:$0xff] }
 0x122   : > { %v756_v29 = vpop.permute.xlu1 %755 }
 0x123   : > { %v816_v30 = vpop.permute.xlu0 %815  ;;  %v5929_v31 = vsel %vm970_vm1, %v927_v27, %v756_v29  ;;  %v1873_v27 = vld [vmem:[%s5355_s26 + $0x53] sm:$0xff] }
 0x124   : > { %v5932_v35 = vsel %vm970_vm1, %v957_v26, %v816_v30  ;;  %2003 = vrot.lane.b32.xlu1 %v1870_v17, %s5302_s23  ;;  %4950 = vmatmul.mubr.msk.f32.gmra.mrb[20].mxu0 %vm1043_vm2, %v5929_v31  ;;  %v1874_v26 = vld [vmem:[%s5355_s26 + $0x5b] sm:$0xff] }
 0x125   : > { %7679 = vst [vmem:[#allocation9_spill] sm:$0xff] %v5932_v35  ;;  %2001 = vrot.lane.b32.xlu0 %v1869_v21, %s5302_s23  ;;  %4995 = vmatmul.mubr.msk.f32.gmra.mrb[16].mxu1 %vm1043_vm2, %v5932_v35  ;;  %v224_v21 = vld [vmem:[%s5355_s26 + $0xe0] sm:$0xff]  ;;  %v1892_v35 = vld [vmem:[%s5355_s26 + $0x10b] sm:$0xff] }
 0x126   : > { %v502_v46 = vpop.permute.xlu1 %501 }
 0x127   : > { %v562_v47 = vpop.permute.xlu0 %561  ;;  %v928_v8 = vsel %vm905_vm0, %v223_v62, %v502_v46  ;;  %v1875_v62 = vld [vmem:[%s5355_s26 + $0x63] sm:$0xff] }
 0x128   : > { %3218 = vrot.lane.b32.xlu1 %v3085_v43, %s5303_s24  ;;  %v958_v56 = vsel %vm905_vm0, %v253_v49, %v562_v47  ;;  %v3089_v49 = vld [vmem:[%s5355_s26 + $0x5c] sm:$0xff] }
 0x129   : > { %3216 = vrot.lane.b32.xlu0 %v3084_v45, %s5303_s24 }
 0x12a   : > { %v818_v57 = vpop.permute.xlu1 %817 }
 0x12b   : > { %v564_v58 = vpop.permute.xlu0 %563  ;;  %v5950_v0 = vsel %vm970_vm1, %v958_v56, %v818_v57  ;;  %v255_v57 = vld [vmem:[%s5355_s26 + $0x218] sm:$0xff] }
 0x12c   : > { %7680 = vst [vmem:[#allocation10_spill] sm:$0xff] %v5950_v0  ;;  %2007 = vrot.lane.b32.xlu1 %v1872_v54, %s5302_s23  ;;  %4997 = vmatprep.mubr.msk.f32.mxu1 %vm1043_vm2, %v5950_v0  ;;  %v959_v29 = vsel %vm905_vm0, %v254_v16, %v564_v58  ;;  %v3088_v54 = vld [vmem:[%s5355_s26 + $0x54] sm:$0xff]  ;;  %v1876_v58 = vld [vmem:[%s5355_s26 + $0x6b] sm:$0xff] }
 0x12d   : > { %2005 = vrot.lane.b32.xlu0 %v1871_v55, %s5302_s23  ;;  %v3091_v16 = vld [vmem:[%s5355_s26 + $0x6c] sm:$0xff] }
 0x12e   : > { %v758_v10 = vpop.permute.xlu1 %757 }
 0x12f   : > { %v504_v13 = vpop.permute.xlu0 %503  ;;  %v5961_v17 = vsel %vm970_vm1, %v928_v8, %v758_v10  ;;  %v225_v10 = vld [vmem:[%s5355_s26 + $0xf0] sm:$0xff] }
 0x130   : > { %3222 = vrot.lane.b32.xlu1 %v3087_v3, %s5303_s24  ;;  %4952 = vmatprep.mubr.msk.f32.mxu0 %vm1043_vm2, %v5961_v17  ;;  %v929_v30 = vsel %vm905_vm0, %v224_v21, %v504_v13  ;;  %v3090_v21 = vld [vmem:[%s5355_s26 + $0x64] sm:$0xff] }
 0x131   : > { %3220 = vrot.lane.b32.xlu0 %v3086_v6, %s5303_s24 }
 0x132   : > { %v760_v43 = vpop.permute.xlu1 %759 }
 0x133   : > { %v820_v45 = vpop.permute.xlu0 %819  ;;  %v5973_v46 = vsel %vm970_vm1, %v929_v30, %v760_v43  ;;  %v256_v30 = vld [vmem:[%s5355_s26 + $0x220] sm:$0xff] }
 0x134   : > { %v5976_v47 = vsel %vm970_vm1, %v959_v29, %v820_v45  ;;  %2011 = vrot.lane.b32.xlu1 %v1874_v26, %s5302_s23  ;;  %4953 = vmatmul.mubr.msk.f32.gmra.mrb[22].mxu0 %vm1043_vm2, %v5973_v46  ;;  %v226_v45 = vld [vmem:[%s5355_s26 + $0xf8] sm:$0xff] }
 0x135   : > { %7681 = vst [vmem:[#allocation11_spill] sm:$0xff] %v5976_v47  ;;  %2009 = vrot.lane.b32.xlu0 %v1873_v27, %s5302_s23  ;;  %4998 = vmatmul.mubr.msk.f32.gmra.mrb[18].mxu1 %vm1043_vm2, %v5976_v47 }
 0x136   : > { %v506_v55 = vpop.permute.xlu1 %505 }
 0x137   : > { %v566_v56 = vpop.permute.xlu0 %565  ;;  %v930_v26 = vsel %vm905_vm0, %v225_v10, %v506_v55 }
 0x138   : > { %3226 = vrot.lane.b32.xlu1 %v3089_v49, %s5303_s24  ;;  %v960_v3 = vsel %vm905_vm0, %v255_v57, %v566_v56  ;;  %v1878_v49 = vld [vmem:[%s5355_s26 + $0x83] sm:$0xff] }
 0x139   : > { %3224 = vrot.lane.b32.xlu0 %v3088_v54, %s5303_s24  ;;  %v1877_v54 = vld [vmem:[%s5355_s26 + $0x7b] sm:$0xff] }
 0x13a   : > { %v822_v6 = vpop.permute.xlu1 %821 }
 0x13b   : > { %v568_v8 = vpop.permute.xlu0 %567  ;;  %v5994_v13 = vsel %vm970_vm1, %v960_v3, %v822_v6  ;;  %v3093_v6 = vld [vmem:[%s5355_s26 + $0x84] sm:$0xff] }
 0x13c   : > { %7682 = vst [vmem:[#allocation12_spill] sm:$0xff] %v5994_v13  ;;  %2015 = vrot.lane.b32.xlu1 %v1876_v58, %s5302_s23  ;;  %5000 = vmatprep.mubr.msk.f32.mxu1 %vm1043_vm2, %v5994_v13  ;;  %v961_v55 = vsel %vm905_vm0, %v256_v30, %v568_v8  ;;  %v3092_v8 = vld [vmem:[%s5355_s26 + $0x7c] sm:$0xff] }
 0x13d   : > { %2013 = vrot.lane.b32.xlu0 %v1875_v62, %s5302_s23 }
 0x13e   : > { %v762_v27 = vpop.permute.xlu1 %761 }
 0x13f   : > { %v508_v29 = vpop.permute.xlu0 %507  ;;  %v6005_v43 = vsel %vm970_vm1, %v930_v26, %v762_v27  ;;  %v1880_v26 = vld [vmem:[%s5355_s26 + $0x93] sm:$0xff]  ;;  %v1879_v27 = vld [vmem:[%s5355_s26 + $0x8b] sm:$0xff] }
 0x140   : > { %3230 = vrot.lane.b32.xlu1 %v3091_v16, %s5303_s24  ;;  %4955 = vmatprep.mubr.msk.f32.mxu0 %vm1043_vm2, %v6005_v43  ;;  %v931_v56 = vsel %vm905_vm0, %v226_v45, %v508_v29 }
 0x141   : > { %3228 = vrot.lane.b32.xlu0 %v3090_v21, %s5303_s24  ;;  %v257_v21 = vld [vmem:[%s5355_s26 + $0x230] sm:$0xff] }
 0x142   : > { %v764_v57 = vpop.permute.xlu1 %763 }
 0x143   : > { %v824_v58 = vpop.permute.xlu0 %823  ;;  %v6017_v62 = vsel %vm970_vm1, %v931_v56, %v764_v57  ;;  %v3094_v56 = vld [vmem:[%s5355_s26 + $0x8c] sm:$0xff] }
 0x144   : > { %v6020_v3 = vsel %vm970_vm1, %v961_v55, %v824_v58  ;;  %2019 = vrot.lane.b32.xlu1 %v1878_v49, %s5302_s23  ;;  %4956 = vmatmul.mubr.msk.f32.gmra.mrb[24].mxu0 %vm1043_vm2, %v6017_v62  ;;  %v227_v49 = vld [vmem:[%s5355_s26 + $0x100] sm:$0xff]  ;;  %v3095_v55 = vld [vmem:[%s5355_s26 + $0x94] sm:$0xff] }
 0x145   : > { %7683 = vst [vmem:[#allocation13_spill] sm:$0xff] %v6020_v3  ;;  %2017 = vrot.lane.b32.xlu0 %v1877_v54, %s5302_s23  ;;  %5001 = vmatmul.mubr.msk.f32.gmra.mrb[20].mxu1 %vm1043_vm2, %v6020_v3  ;;  %v231_v3 = vld [vmem:[%s5355_s26 + $0x128] sm:$0xff] }
 0x146   : > { %v510_v10 = vpop.permute.xlu1 %509 }
 0x147   : > { %v570_v16 = vpop.permute.xlu0 %569  ;;  %v932_v57 = vsel %vm905_vm0, %v227_v49, %v510_v10 }
 0x148   : > { %3234 = vrot.lane.b32.xlu1 %v3093_v6, %s5303_s24  ;;  %v962_v29 = vsel %vm905_vm0, %v257_v21, %v570_v16  ;;  %v228_v21 = vld [vmem:[%s5355_s26 + $0x108] sm:$0xff] }
 0x149   : > { %3232 = vrot.lane.b32.xlu0 %v3092_v8, %s5303_s24  ;;  %v258_v8 = vld [vmem:[%s5355_s26 + $0x238] sm:$0xff] }
 0x14a   : > { %v826_v30 = vpop.permute.xlu1 %825 }
 0x14b   : > { %v572_v45 = vpop.permute.xlu0 %571  ;;  %v6038_v54 = vsel %vm970_vm1, %v962_v29, %v826_v30 }
 0x14c   : > { %7684 = vst [vmem:[#allocation14_spill] sm:$0xff] %v6038_v54  ;;  %2023 = vrot.lane.b32.xlu1 %v1880_v26, %s5302_s23  ;;  %5003 = vmatprep.mubr.msk.f32.mxu1 %vm1043_vm2, %v6038_v54  ;;  %v1882_v26 = vld [vmem:[%s5355_s26 + $0xab] sm:$0xff]  ;;  %v963_v10 = vsel %vm905_vm0, %v258_v8, %v572_v45  ;;  %v259_v8 = vld [vmem:[%s5355_s26 + $0x240] sm:$0xff] }
 0x14d   : > { %2021 = vrot.lane.b32.xlu0 %v1879_v27, %s5302_s23  ;;  %v1881_v27 = vld [vmem:[%s5355_s26 + $0xa3] sm:$0xff]  ;;  %v3097_v45 = vld [vmem:[%s5355_s26 + $0xac] sm:$0xff] }
 0x14e   : > { %v766_v58 = vpop.permute.xlu1 %765 }
 0x14f   : > { %v512_v6 = vpop.permute.xlu0 %511  ;;  %v6049_v16 = vsel %vm970_vm1, %v932_v57, %v766_v58 }
 0x150   : > { %3238 = vrot.lane.b32.xlu1 %v3095_v55, %s5303_s24  ;;  %4958 = vmatprep.mubr.msk.f32.mxu0 %vm1043_vm2, %v6049_v16  ;;  %v933_v29 = vsel %vm905_vm0, %v228_v21, %v512_v6  ;;  %v1884_v21 = vld [vmem:[%s5355_s26 + $0xbb] sm:$0xff] }
 0x151   : > { %3236 = vrot.lane.b32.xlu0 %v3094_v56, %s5303_s24  ;;  %v3096_v56 = vld [vmem:[%s5355_s26 + $0xa4] sm:$0xff] }
 0x152   : > { %v768_v30 = vpop.permute.xlu1 %767 }
 0x153   : > { %v828_v49 = vpop.permute.xlu0 %827  ;;  %v6061_v57 = vsel %vm970_vm1, %v933_v29, %v768_v30  ;;  %v229_v30 = vld [vmem:[%s5355_s26 + $0x118] sm:$0xff] }
 0x154   : > { %v6064_v55 = vsel %vm970_vm1, %v963_v10, %v828_v49  ;;  %2027 = vrot.lane.b32.xlu1 %v1882_v26, %s5302_s23  ;;  %4959 = vmatmul.mubr.msk.f32.gmra.mrb[26].mxu0 %vm1043_vm2, %v6061_v57  ;;  %v1883_v26 = vld [vmem:[%s5355_s26 + $0xb3] sm:$0xff] }
 0x155   : > { %7685 = vst [vmem:[#allocation15_spill] sm:$0xff] %v6064_v55  ;;  %2025 = vrot.lane.b32.xlu0 %v1881_v27, %s5302_s23  ;;  %5004 = vmatmul.mubr.msk.f32.gmra.mrb[22].mxu1 %vm1043_vm2, %v6064_v55  ;;  %v260_v55 = vld [vmem:[%s5355_s26 + $0x248] sm:$0xff] }
 0x156   : > { %v514_v58 = vpop.permute.xlu1 %513 }
 0x157   : > { %v574_v6 = vpop.permute.xlu0 %573  ;;  %v934_v54 = vsel %vm905_vm0, %v229_v30, %v514_v58  ;;  %v1886_v58 = vld [vmem:[%s5355_s26 + $0xd3] sm:$0xff] }
 0x158   : > { %3242 = vrot.lane.b32.xlu1 %v3097_v45, %s5303_s24  ;;  %v964_v27 = vsel %vm905_vm0, %v259_v8, %v574_v6  ;;  %v3099_v45 = vld [vmem:[%s5355_s26 + $0xbc] sm:$0xff] }
 0x159   : > { %3240 = vrot.lane.b32.xlu0 %v3096_v56, %s5303_s24  ;;  %v3098_v56 = vld [vmem:[%s5355_s26 + $0xb4] sm:$0xff] }
 0x15a   : > { %v830_v10 = vpop.permute.xlu1 %829 }
 0x15b   : > { %v576_v29 = vpop.permute.xlu0 %575  ;;  %v6082_v49 = vsel %vm970_vm1, %v964_v27, %v830_v10  ;;  %v230_v27 = vld [vmem:[%s5355_s26 + $0x120] sm:$0xff]  ;;  %v1885_v10 = vld [vmem:[%s5355_s26 + $0xcb] sm:$0xff] }
 0x15c   : > { %7686 = vst [vmem:[#allocation16_spill] sm:$0xff] %v6082_v49  ;;  %2031 = vrot.lane.b32.xlu1 %v1884_v21, %s5302_s23  ;;  %5006 = vmatprep.mubr.msk.f32.mxu1 %vm1043_vm2, %v6082_v49 }
 0x15d   : > { %2029 = vrot.lane.b32.xlu0 %v1883_v26, %s5302_s23 }
 0x15e   : > { %v770_v6 = vpop.permute.xlu1 %769 }
 0x15f   : > { %v516_v8 = vpop.permute.xlu0 %515  ;;  %v6093_v13 = vsel %vm970_vm1, %v934_v54, %v770_v6  ;;  %v965_v54 = vsel %vm905_vm0, %v260_v55, %v576_v29  ;;  %v3101_v55 = vld [vmem:[%s5355_s26 + $0xd4] sm:$0xff]  ;;  %v3100_v29 = vld [vmem:[%s5355_s26 + $0xcc] sm:$0xff] }
 0x160   : > { %3246 = vrot.lane.b32.xlu1 %v3099_v45, %s5303_s24  ;;  %4961 = vmatprep.mubr.msk.f32.mxu0 %vm1043_vm2, %v6093_v13  ;;  %v935_v30 = vsel %vm905_vm0, %v230_v27, %v516_v8 }
 0x161   : > { %3244 = vrot.lane.b32.xlu0 %v3098_v56, %s5303_s24  ;;  %v6098_v21 = vpop.f32.mrb[0].mxu0 }
 0x162   : > { %7687 = vst [vmem:[#allocation17_spill] sm:$0xff] %v6098_v21  ;;  %v6102_v26 = vpop.f32.mrb[1].mxu0  ;;  %v772_v6 = vpop.permute.xlu1 %771  ;;  %v262_v21 = vld [vmem:[%s5355_s26 + $0x260] sm:$0xff] }
 0x163   : > { %7688 = vst [vmem:[#allocation18_spill] sm:$0xff] %v6102_v26  ;;  %v832_v45 = vpop.permute.xlu0 %831  ;;  %v6109_v56 = vsel %vm970_vm1, %v935_v30, %v772_v6  ;;  %v261_v30 = vld [vmem:[%s5355_s26 + $0x258] sm:$0xff] }
 0x164   : > { %v6112_v49 = vsel %vm970_vm1, %v965_v54, %v832_v45  ;;  %2035 = vrot.lane.b32.xlu1 %v1886_v58, %s5302_s23  ;;  %4962 = vmatmul.mubr.msk.f32.gmra.mrb[28].mxu0 %vm1043_vm2, %v6109_v56  ;;  %v1887_v54 = vld [vmem:[%s5355_s26 + $0xdb] sm:$0xff] }
 0x165   : > { %7689 = vst [vmem:[#allocation19_spill] sm:$0xff] %v6112_v49  ;;  %2033 = vrot.lane.b32.xlu0 %v1885_v10, %s5302_s23  ;;  %5007 = vmatmul.mubr.msk.f32.gmra.mrb[24].mxu1 %vm1043_vm2, %v6112_v49  ;;  %v1888_v10 = vld [vmem:[%s5355_s26 + $0xe3] sm:$0xff] }
 0x166   : > { %v518_v8 = vpop.permute.xlu1 %517 }
 0x167   : > { %v578_v27 = vpop.permute.xlu0 %577 }
 0x168   : > { %3250 = vrot.lane.b32.xlu1 %v3101_v55, %s5303_s24  ;;  %v966_v6 = vsel %vm905_vm0, %v261_v30, %v578_v27  ;;  %v3103_v55 = vld [vmem:[%s5355_s26 + $0xe4] sm:$0xff]  ;;  %v936_v27 = vsel %vm905_vm0, %v231_v3, %v518_v8 }
 0x169   : > { %3248 = vrot.lane.b32.xlu0 %v3100_v29, %s5303_s24  ;;  %v4924_v58 = vpop.f32.mrb[2].mxu0  ;;  %v3102_v29 = vld [vmem:[%s5355_s26 + $0xdc] sm:$0xff] }
 0x16a   : > { %v1312_v45 = vpop.f32.mrb[3].mxu0  ;;  %v834_v49 = vpop.permute.xlu1 %833 }
 0x16b   : > { %v6130_v0 = vsel %vm970_vm1, %v966_v6, %v834_v49  ;;  %v580_v47 = vpop.permute.xlu0 %579  ;;  %v232_v6 = vld [vmem:[%s5355_s26 + $0x130] sm:$0xff] }
 0x16c   : > { %7690 = vst [vmem:[#allocation20_spill] sm:$0xff] %v6130_v0  ;;  %2039 = vrot.lane.b32.xlu1 %v1888_v10, %s5302_s23  ;;  %5009 = vmatprep.mubr.msk.f32.mxu1 %vm1043_vm2, %v6130_v0  ;;  %v1890_v10 = vld [vmem:[%s5355_s26 + $0xfb] sm:$0xff] }
 0x16d   : > { %2037 = vrot.lane.b32.xlu0 %v1887_v54, %s5302_s23  ;;  %v1889_v54 = vld [vmem:[%s5355_s26 + $0xf3] sm:$0xff] }
 0x16e   : > { %v774_v30 = vpop.permute.xlu1 %773 }
 0x16f   : > { %v6140_v26 = vsel %vm970_vm1, %v936_v27, %v774_v30  ;;  %v520_v49 = vpop.permute.xlu0 %519  ;;  %v967_v27 = vsel %vm905_vm0, %v262_v21, %v580_v47  ;;  %v3104_v47 = vld [vmem:[%s5355_s26 + $0xf4] sm:$0xff]  ;;  %v6169_v21 = vld [vmem:[%s7649_s2] ss:$0 sm:$0xff] }
 0x170   : > { %3254 = vrot.lane.b32.xlu1 %v3103_v55, %s5303_s24  ;;  %4964 = vmatprep.mubr.msk.f32.mxu0 %vm1043_vm2, %v6140_v26  ;;  %v937_v3 = vsel %vm905_vm0, %v232_v6, %v520_v49  ;;  %v1318_v49 = vadd.f32 %v4924_v58, %v6169_v21 }
 0x171   : > { %3252 = vrot.lane.b32.xlu0 %v3102_v29, %s5303_s24  ;;  %v3105_v29 = vld [vmem:[%s5355_s26 + $0xfc] sm:$0xff] }
 0x172   : > { %v776_v8 = vpop.permute.xlu1 %775 }
 0x173   : > { %v6153_v30 = vsel %vm970_vm1, %v937_v3, %v776_v8  ;;  %v836_v0 = vpop.permute.xlu0 %835 }
 0x174   : > { %v6156_v55 = vsel %vm970_vm1, %v967_v27, %v836_v0  ;;  %2043 = vrot.lane.b32.xlu1 %v1890_v10, %s5302_s23  ;;  %4965 = vmatmul.mubr.msk.f32.gmra.mrb[30].mxu0 %vm1043_vm2, %v6153_v30  ;;  %v263_v10 = vld [vmem:[%s5355_s26 + $0x268] sm:$0xff] }
 0x175   : > { %7691 = vst [vmem:[#allocation21_spill] sm:$0xff] %v6156_v55  ;;  %2041 = vrot.lane.b32.xlu0 %v1889_v54, %s5302_s23  ;;  %5010 = vmatmul.mubr.msk.f32.gmra.mrb[26].mxu1 %vm1043_vm2, %v6156_v55  ;;  %v1313_v54 = vadd.f32 %v6169_v21, %v1312_v45  ;;  %v1624_v45 = vmax.f32 %v1318_v49, 0.0  ;;  %v3106_v49 = vld [vmem:[%s5355_s26 + $0x104] sm:$0xff] }
 0x176   : > { %v522_v0 = vpop.permute.xlu1 %521 }
 0x177   : > { %v582_v6 = vpop.permute.xlu0 %581  ;;  %v4927_v3 = vpop.f32.mrb[4].mxu0 }
 0x178   : > { %v4972_v8 = vpop.f32.mrb[0].mxu1  ;;  %3258 = vrot.lane.b32.xlu1 %v3105_v29, %s5303_s24  ;;  %v1322_v55 = vpop.f32.mrb[5].mxu0  ;;  %v968_v58 = vsel %vm905_vm0, %v263_v10, %v582_v6 }
 0x179   : > { %3256 = vrot.lane.b32.xlu0 %v3104_v47, %s5303_s24  ;;  %v1478_v27 = vadd.f32 %v4972_v8, %v6169_v21  ;;  %v1472_v63 = vpop.f32.mrb[1].mxu1  ;;  %v1623_v8 = vmax.f32 %v1313_v54, 0.0  ;;  %v234_v54 = vld [vmem:[%s5355_s26 + $0x148] sm:$0xff] }
 0x17a   : > { %v1473_v42 = vadd.f32 %v6169_v21, %v1472_v63  ;;  %v838_v59 = vpop.permute.xlu1 %837  ;;  %v3107_v63 = vld [vmem:[%s5355_s26 + $0x10c] sm:$0xff] }
 0x17b   : > { %v1656_v15 = vmax.f32 %v1478_v27, 0.0  ;;  %v6183_v29 = vsel %vm970_vm1, %v968_v58, %v838_v59  ;;  %v584_v47 = vpop.permute.xlu0 %583  ;;  %v938_v59 = vsel %vm905_vm0, %v233_v34, %v522_v0  ;;  %v264_v58 = vld [vmem:[%s5355_s26 + $0x270] sm:$0xff]  ;;  %v1893_v34 = vld [vmem:[%s5355_s26 + $0x11b] sm:$0xff] }
 0x17c   : > { %7692 = vst [vmem:[#allocation22_spill] sm:$0xff] %v6183_v29  ;;  %v1655_v40 = vmax.f32 %v1473_v42, 0.0  ;;  %2047 = vrot.lane.b32.xlu1 %v1892_v35, %s5302_s23  ;;  %5012 = vmatprep.mubr.msk.f32.mxu1 %vm1043_vm2, %v6183_v29  ;;  %v969_v0 = vsel %vm905_vm0, %v264_v58, %v584_v47  ;;  %v1323_v58 = vadd.f32 %v6169_v21, %v1322_v55 }
 0x17d   : > { %2045 = vrot.lane.b32.xlu0 %v1891_v5, %s5302_s23  ;;  %v6187_v6 = vadd.f32 %v1656_v15, %v1624_v45  ;;  %v1894_v15 = vld [vmem:[%s5355_s26 + $0x123] sm:$0xff] }
 0x17e   : > { %v6194_v10 = vadd.f32 %v1655_v40, %v1623_v8  ;;  %v778_v27 = vpop.permute.xlu1 %777 }
 0x17f   : > { %7693 = vst [vmem:[#allocation23_spill] sm:$0xff] %v6187_v6  ;;  %v6197_v42 = vsel %vm970_vm1, %v938_v59, %v778_v27  ;;  %v524_v35 = vpop.permute.xlu0 %523  ;;  %v1328_v27 = vadd.f32 %v4927_v3, %v6169_v21  ;;  %v1896_v3 = vld [vmem:[%s5355_s26 + $0x133] sm:$0xff] }
 0x180   : > { %7694 = vst [vmem:[#allocation24_spill] sm:$0xff] %v6194_v10  ;;  %3262 = vrot.lane.b32.xlu1 %v3107_v63, %s5303_s24  ;;  %4967 = vmatprep.mubr.msk.f32.mxu0 %vm1043_vm2, %v6197_v42  ;;  %v939_v40 = vsel %vm905_vm0, %v234_v54, %v524_v35  ;;  %v3109_v63 = vld [vmem:[%s5355_s26 + $0x124] sm:$0xff]  ;;  %v3110_v6 = vld [vmem:[%s5355_s26 + $0x12c] sm:$0xff]  ;;  %vm4368_vm0 = vcmask 392192  }
 0x181   : > { %3260 = vrot.lane.b32.xlu0 %v3106_v49, %s5303_s24  ;;  %v3108_v49 = vld [vmem:[%s5355_s26 + $0x11c] sm:$0xff] }
 0x182   : > { %v780_v5 = vpop.permute.xlu1 %779 }
 0x183   : > { %v6210_v45 = vsel %vm970_vm1, %v939_v40, %v780_v5  ;;  %v840_v8 = vpop.permute.xlu0 %839 }
 0x184   : > { %v6213_v59 = vsel %vm970_vm1, %v969_v0, %v840_v8  ;;  %2051 = vrot.lane.b32.xlu1 %v1894_v15, %s5302_s23  ;;  %4968 = vmatmul.mubr.msk.f32.gmra.mrb[32].mxu0 %vm1043_vm2, %v6210_v45 }
 0x185   : > { %7695 = vst [vmem:[#allocation25_spill] sm:$0xff] %v6213_v59  ;;  %2049 = vrot.lane.b32.xlu0 %v1893_v34, %s5302_s23  ;;  %5013 = vmatmul.mubr.msk.f32.gmra.mrb[28].mxu1 %vm1043_vm2, %v6213_v59 }
 0x186   : > { %v1996_v47 = vpop.permute.xlu1 %1995 }
 0x187   : > { %v2186_v35 = vsel %vm1043_vm2, %v5491_v11, %v1996_v47  ;;  %v1994_v54 = vpop.permute.xlu0 %1993  ;;  %v4930_v34 = vpop.f32.mrb[6].mxu0  ;;  %v1895_v11 = vld [vmem:[%s5355_s26 + $0x12b] sm:$0xff]  ;;  %v1626_v47 = vmax.f32 %v1328_v27, 0.0 }
 0x188   : > { %v2185_v15 = vsel %vm1043_vm2, %v5480_v4, %v1994_v54  ;;  %v4975_v40 = vpop.f32.mrb[2].mxu1  ;;  %3266 = vrot.lane.b32.xlu1 %v3109_v63, %s5303_s24  ;;  %v1332_v0 = vpop.f32.mrb[7].mxu0 }
 0x189   : > { %3264 = vrot.lane.b32.xlu0 %v3108_v49, %s5303_s24  ;;  %v1488_v5 = vadd.f32 %v4975_v40, %v6169_v21  ;;  %v1482_v8 = vpop.f32.mrb[3].mxu1  ;;  %5023 = vmatprep.mubr.msk.f32.mxu1 %vm2258_vm3, %v2185_v15  ;;  %v1625_v40 = vmax.f32 %v1323_v58, 0.0 }
 0x18a   : > { %v1483_v55 = vadd.f32 %v6169_v21, %v1482_v8  ;;  %5024 = vmatmul.mubr.msk.f32.vlgmr.msra.gmra.mrb[30].mxu1 %vm2258_vm3, %v2186_v35  ;;  %v3211_v4 = vpop.permute.xlu1 %3210  ;;  %v3111_v8 = vld [vmem:[%s5355_s26 + $0x134] sm:$0xff] }
 0x18b   : > { %v1658_v63 = vmax.f32 %v1488_v5, 0.0  ;;  %v3401_v49 = vsel %vm2258_vm3, %v2186_v35, %v3211_v4  ;;  %v3209_v54 = vpop.permute.xlu0 %3208 }
 0x18c   : > { %v1657_v29 = vmax.f32 %v1483_v55, 0.0  ;;  %v3400_v59 = vsel %vm2258_vm3, %v2185_v15, %v3209_v54  ;;  %2055 = vrot.lane.b32.xlu1 %v1896_v3, %s5302_s23 }
 0x18d   : > { %2053 = vrot.lane.b32.xlu0 %v1895_v11, %s5302_s23  ;;  %v1690_v10 = vadd.f32 %v1658_v63, %v1626_v47  ;;  %5129 = vmatprep.mubr.msk.f32.mxu0 %vm3474_vm4, %v3400_v59  ;;  %v196_v11 = vlaneseq  ;;  %v3112_v63 = vld [vmem:[%s5355_s26 + $0x144] sm:$0xff] }
 0x18e   : > { %v1689_v27 = vadd.f32 %v1657_v29, %v1625_v40  ;;  %5130 = vmatmul.mubr.msk.f32.vlgmr.msra.gmra.mrb[34].mxu0 %vm3474_vm4, %v3401_v49  ;;  %v2000_v35 = vpop.permute.xlu1 %1999  ;;  %v1338_v40 = vadd.f32 %v4930_v34, %v6169_v21  ;;  %v1900_v34 = vld [vmem:[%s5355_s26 + $0x15b] sm:$0xff] }
 0x18f   : > { %v6246_v58 = vsel %vm970_vm1, %v1690_v10, -inf  ;;  %v2188_v15 = vsel %vm1043_vm2, %v5506_v24, %v2000_v35  ;;  %v1998_v5 = vpop.permute.xlu0 %1997  ;;  %v1898_v10 = vld [vmem:[%s5355_s26 + $0x14b] sm:$0xff]  ;;  %v1897_v24 = vld [vmem:[%s5355_s26 + $0x143] sm:$0xff]  ;;  %v197_v49 = vshrl.u32 %v196_v11, 7  ;;  %v1333_v35 = vadd.f32 %v6169_v21, %v1332_v0 }
 0x190   : > { %v6251_v3 = vsel %vm970_vm1, %v1689_v27, -inf  ;;  %v2187_v59 = vsel %vm1043_vm2, %v5509_v25, %v1998_v5  ;;  %3270 = vrot.lane.b32.xlu1 %v3111_v8, %s5303_s24  ;;  %v1628_v11 = vmax.f32 %v1338_v40, 0.0 }
 0x191   : > { %3268 = vrot.lane.b32.xlu0 %v3110_v6, %s5303_s24  ;;  %v1776_v29 = vmax.f32 %v6251_v3, %v6246_v58  ;;  %5026 = vmatprep.mubr.msk.f32.mxu1 %vm2258_vm3, %v2187_v59  ;;  %v3113_v6 = vld [vmem:[%s5355_s26 + $0x14c] sm:$0xff] }
 0x192   : > { %5027 = vmatmul.mubr.msk.f32.gmra.mrb[32].mxu1 %vm2258_vm3, %v2188_v15  ;;  %v3215_v55 = vpop.permute.xlu1 %3214 }
 0x193   : > { %v3403_v4 = vsel %vm2258_vm3, %v2188_v15, %v3215_v55  ;;  %v3213_v25 = vpop.permute.xlu0 %3212 }
 0x194   : > { %v3402_v47 = vsel %vm2258_vm3, %v2187_v59, %v3213_v25  ;;  %2059 = vrot.lane.b32.xlu1 %v1898_v10, %s5302_s23 }
 0x195   : > { %2057 = vrot.lane.b32.xlu0 %v1897_v24, %s5302_s23  ;;  %5132 = vmatprep.mubr.msk.f32.mxu0 %vm3474_vm4, %v3402_v47  ;;  %v6283_v24 = vadd.s32 24, %v197_v49  ;;  %v1627_v47 = vmax.f32 %v1333_v35, 0.0 }
 0x196   : > { %5133 = vmatmul.mubr.msk.f32.gmra.mrb[36].mxu0 %vm3474_vm4, %v3403_v4  ;;  %v2004_v54 = vpop.permute.xlu1 %2003 }
 0x197   : > { %v2190_v8 = vsel %vm1043_vm2, %v5550_v52, %v2004_v54  ;;  %v2002_v27 = vpop.permute.xlu0 %2001  ;;  %v4933_v15 = vpop.f32.mrb[8].mxu0  ;;  %v1899_v52 = vld [vmem:[%s5355_s26 + $0x153] sm:$0xff]  ;;  %v3115_v54 = vld [vmem:[%s5355_s26 + $0x15c] sm:$0xff]  ;;  %vm1720_vm5 = vcmp.le.s32.totalorder %v6283_v24, 29  ;;  %vm2935_vm13 = vcmp.le.s32.totalorder %v6283_v24, 28  ;;  %vm4151_vm14 = vcmp.le.s32.totalorder %v6283_v24, 27 }
 0x198   : > { %v2189_v58 = vsel %vm1043_vm2, %v5538_v44, %v2002_v27  ;;  %v4978_v5 = vpop.f32.mrb[4].mxu1  ;;  %3274 = vrot.lane.b32.xlu1 %v3113_v6, %s5303_s24  ;;  %v1342_v59 = vpop.f32.mrb[9].mxu0  ;;  %v3114_v27 = vld [vmem:[%s5355_s26 + $0x154] sm:$0xff] }
 0x199   : > { %3272 = vrot.lane.b32.xlu0 %v3112_v63, %s5303_s24  ;;  %v1498_v3 = vadd.f32 %v4978_v5, %v6169_v21  ;;  %v1492_v10 = vpop.f32.mrb[5].mxu1  ;;  %5029 = vmatprep.mubr.msk.f32.mxu1 %vm2258_vm3, %v2189_v58 }
 0x19a   : > { %v1493_v44 = vadd.f32 %v6169_v21, %v1492_v10  ;;  %5030 = vmatmul.mubr.msk.f32.gmra.mrb[34].mxu1 %vm2258_vm3, %v2190_v8  ;;  %v3219_v0 = vpop.permute.xlu1 %3218 }
 0x19b   : > { %v1660_v55 = vmax.f32 %v1498_v3, 0.0  ;;  %v3405_v4 = vsel %vm2258_vm3, %v2190_v8, %v3219_v0  ;;  %v3217_v25 = vpop.permute.xlu0 %3216 }
 0x19c   : > { %v1659_v6 = vmax.f32 %v1493_v44, 0.0  ;;  %v3404_v63 = vsel %vm2258_vm3, %v2189_v58, %v3217_v25  ;;  %2063 = vrot.lane.b32.xlu1 %v1900_v34, %s5302_s23  ;;  %v1901_v44 = vld [vmem:[%s5355_s26 + $0x16b] sm:$0xff] }
 0x19d   : > { %2061 = vrot.lane.b32.xlu0 %v1899_v52, %s5302_s23  ;;  %v1692_v49 = vadd.f32 %v1660_v55, %v1628_v11  ;;  %5135 = vmatprep.mubr.msk.f32.mxu0 %vm3474_vm4, %v3404_v63  ;;  %v1902_v52 = vld [vmem:[%s5355_s26 + $0x173] sm:$0xff] }
 0x19e   : > { %v1691_v40 = vadd.f32 %v1659_v6, %v1627_v47  ;;  %5136 = vmatmul.mubr.msk.f32.gmra.mrb[38].mxu0 %vm3474_vm4, %v3405_v4  ;;  %v2008_v8 = vpop.permute.xlu1 %2007  ;;  %v3116_v25 = vld [vmem:[%s5355_s26 + $0x16c] sm:$0xff]  ;;  %v1348_v6 = vadd.f32 %v4933_v15, %v6169_v21  ;;  %v1904_v15 = vld [vmem:[%s5355_s26 + $0x183] sm:$0xff] }
 0x19f   : > { %v1736_v35 = vsel %vm1720_vm5, %v1692_v49, 0.0  ;;  %v2192_v58 = vsel %vm1043_vm2, %v5594_v18, %v2008_v8  ;;  %v2006_v5 = vpop.permute.xlu0 %2005 }
 0x1a0   : > { %v1777_v3 = vsel %vm970_vm1, %v1691_v40, -inf  ;;  %v2191_v10 = vsel %vm1043_vm2, %v5582_v9, %v2006_v5  ;;  %3278 = vrot.lane.b32.xlu1 %v3115_v54, %s5303_s24  ;;  %v1779_v0 = vsel %vm970_vm1, %v1736_v35, -inf  ;;  %v1343_v54 = vadd.f32 %v6169_v21, %v1342_v59 }
 0x1a1   : > { %3276 = vrot.lane.b32.xlu0 %v3114_v27, %s5303_s24  ;;  %v1778_v34 = vmax.f32 %v1776_v29, %v1777_v3  ;;  %5032 = vmatprep.mubr.msk.f32.mxu1 %vm2258_vm3, %v2191_v10  ;;  %v3117_v29 = vld [vmem:[%s5355_s26 + $0x174] sm:$0xff]  ;;  %v1630_v3 = vmax.f32 %v1348_v6, 0.0 }
 0x1a2   : > { %5033 = vmatmul.mubr.msk.f32.gmra.mrb[36].mxu1 %vm2258_vm3, %v2192_v58  ;;  %v3223_v18 = vpop.permute.xlu1 %3222 }
 0x1a3   : > { %v6310_v11 = vmax.f32 %v1778_v34, %v1779_v0  ;;  %v3407_v9 = vsel %vm2258_vm3, %v2192_v58, %v3223_v18  ;;  %v3221_v55 = vpop.permute.xlu0 %3220 }
 0x1a4   : > { %v3406_v4 = vsel %vm2258_vm3, %v2191_v10, %v3221_v55  ;;  %2067 = vrot.lane.b32.xlu1 %v1902_v52, %s5302_s23  ;;  %v3119_v55 = vld [vmem:[%s5355_s26 + $0x184] sm:$0xff] }
 0x1a5   : > { %2065 = vrot.lane.b32.xlu0 %v1901_v44, %s5302_s23  ;;  %5138 = vmatprep.mubr.msk.f32.mxu0 %vm3474_vm4, %v3406_v4  ;;  %v1629_v44 = vmax.f32 %v1343_v54, 0.0  ;;  %v3118_v4 = vld [vmem:[%s5355_s26 + $0x17c] sm:$0xff] }
 0x1a6   : > { %5139 = vmatmul.mubr.msk.f32.gmra.mrb[40].mxu0 %vm3474_vm4, %v3407_v9  ;;  %v2012_v47 = vpop.permute.xlu1 %2011 }
 0x1a7   : > { %v2194_v63 = vsel %vm1043_vm2, %v5638_v50, %v2012_v47  ;;  %v2010_v49 = vpop.permute.xlu0 %2009  ;;  %v4936_v40 = vpop.f32.mrb[10].mxu0  ;;  %v1903_v50 = vld [vmem:[%s5355_s26 + $0x17b] sm:$0xff] }
 0x1a8   : > { %v2193_v27 = vsel %vm1043_vm2, %v5626_v41, %v2010_v49  ;;  %v4981_v8 = vpop.f32.mrb[6].mxu1  ;;  %3282 = vrot.lane.b32.xlu1 %v3117_v29, %s5303_s24  ;;  %v1352_v58 = vpop.f32.mrb[11].mxu0 }
 0x1a9   : > { %3280 = vrot.lane.b32.xlu0 %v3116_v25, %s5303_s24  ;;  %v1508_v35 = vadd.f32 %v4981_v8, %v6169_v21  ;;  %v1502_v5 = vpop.f32.mrb[7].mxu1  ;;  %5035 = vmatprep.mubr.msk.f32.mxu1 %vm2258_vm3, %v2193_v27  ;;  %v1906_v8 = vld [vmem:[%s5355_s26 + $0x19b] sm:$0xff] }
 0x1aa   : > { %v1503_v59 = vadd.f32 %v6169_v21, %v1502_v5  ;;  %5036 = vmatmul.mubr.msk.f32.gmra.mrb[38].mxu1 %vm2258_vm3, %v2194_v63  ;;  %v3227_v41 = vpop.permute.xlu1 %3226 }
 0x1ab   : > { %v1662_v10 = vmax.f32 %v1508_v35, 0.0  ;;  %v3409_v34 = vsel %vm2258_vm3, %v2194_v63, %v3227_v41  ;;  %v3225_v52 = vpop.permute.xlu0 %3224  ;;  %v1905_v35 = vld [vmem:[%s5355_s26 + $0x193] sm:$0xff] }
 0x1ac   : > { %v1661_v0 = vmax.f32 %v1503_v59, 0.0  ;;  %v3408_v18 = vsel %vm2258_vm3, %v2193_v27, %v3225_v52  ;;  %2071 = vrot.lane.b32.xlu1 %v1904_v15, %s5302_s23  ;;  %v3120_v59 = vld [vmem:[%s5355_s26 + $0x194] sm:$0xff]  ;;  %v1353_v52 = vadd.f32 %v6169_v21, %v1352_v58 }
 0x1ad   : > { %2069 = vrot.lane.b32.xlu0 %v1903_v50, %s5302_s23  ;;  %v1694_v9 = vadd.f32 %v1662_v10, %v1630_v3  ;;  %5141 = vmatprep.mubr.msk.f32.mxu0 %vm3474_vm4, %v3408_v18  ;;  %v1358_v3 = vadd.f32 %v4936_v40, %v6169_v21  ;;  %v1908_v40 = vld [vmem:[%s5355_s26 + $0x1ab] sm:$0xff] }
 0x1ae   : > { %v1693_v29 = vadd.f32 %v1661_v0, %v1629_v44  ;;  %5142 = vmatmul.mubr.msk.f32.gmra.mrb[42].mxu0 %vm3474_vm4, %v3409_v34  ;;  %v2016_v25 = vpop.permute.xlu1 %2015 }
 0x1af   : > { %v6343_v47 = vsel %vm970_vm1, %v1694_v9, -inf  ;;  %v2196_v6 = vsel %vm1043_vm2, %v5682_v22, %v2016_v25  ;;  %v2014_v63 = vpop.permute.xlu0 %2013 }
 0x1b0   : > { %v1787_v49 = vsel %vm970_vm1, %v1693_v29, -inf  ;;  %v2195_v54 = vsel %vm1043_vm2, %v5670_v12, %v2014_v63  ;;  %3286 = vrot.lane.b32.xlu1 %v3119_v55, %s5303_s24  ;;  %v3121_v12 = vld [vmem:[%s5355_s26 + $0x19c] sm:$0xff]  ;;  %v1632_v29 = vmax.f32 %v1358_v3, 0.0  ;;  %v1631_v63 = vmax.f32 %v1353_v52, 0.0 }
 0x1b1   : > { %3284 = vrot.lane.b32.xlu0 %v3118_v4, %s5303_s24  ;;  %v1789_v27 = vmax.f32 %v1787_v49, %v6343_v47  ;;  %5038 = vmatprep.mubr.msk.f32.mxu1 %vm2258_vm3, %v2195_v54  ;;  %v1909_v52 = vld [vmem:[%s5355_s26 + $0x1bb] sm:$0xff] }
 0x1b2   : > { %5039 = vmatmul.mubr.msk.f32.gmra.mrb[40].mxu1 %vm2258_vm3, %v2196_v6  ;;  %v3231_v22 = vpop.permute.xlu1 %3230 }
 0x1b3   : > { %v3411_v5 = vsel %vm2258_vm3, %v2196_v6, %v3231_v22  ;;  %v3229_v15 = vpop.permute.xlu0 %3228  ;;  %v3122_v22 = vld [vmem:[%s5355_s26 + $0x1a4] sm:$0xff] }
 0x1b4   : > { %v3410_v50 = vsel %vm2258_vm3, %v2195_v54, %v3229_v15  ;;  %2075 = vrot.lane.b32.xlu1 %v1906_v8, %s5302_s23 }
 0x1b5   : > { %2073 = vrot.lane.b32.xlu0 %v1905_v35, %s5302_s23  ;;  %5144 = vmatprep.mubr.msk.f32.mxu0 %vm3474_vm4, %v3410_v50  ;;  %v3123_v35 = vld [vmem:[%s5355_s26 + $0x1ac] sm:$0xff] }
 0x1b6   : > { %5145 = vmatmul.mubr.msk.f32.gmra.mrb[44].mxu0 %vm3474_vm4, %v3411_v5  ;;  %v2020_v41 = vpop.permute.xlu1 %2019 }
 0x1b7   : > { %v2198_v10 = vsel %vm1043_vm2, %v5726_v60, %v2020_v41  ;;  %v2018_v34 = vpop.permute.xlu0 %2017  ;;  %v4939_v0 = vpop.f32.mrb[12].mxu0  ;;  %v1907_v60 = vld [vmem:[%s5355_s26 + $0x1a3] sm:$0xff] }
 0x1b8   : > { %v2197_v44 = vsel %vm1043_vm2, %v5714_v48, %v2018_v34  ;;  %v4984_v18 = vpop.f32.mrb[8].mxu1  ;;  %3290 = vrot.lane.b32.xlu1 %v3121_v12, %s5303_s24  ;;  %v1362_v55 = vpop.f32.mrb[13].mxu0  ;;  %v1910_v34 = vld [vmem:[%s5355_s26 + $0x1c3] sm:$0xff] }
 0x1b9   : > { %3288 = vrot.lane.b32.xlu0 %v3120_v59, %s5303_s24  ;;  %v1518_v9 = vadd.f32 %v4984_v18, %v6169_v21  ;;  %v1512_v4 = vpop.f32.mrb[9].mxu1  ;;  %5041 = vmatprep.mubr.msk.f32.mxu1 %vm2258_vm3, %v2197_v44 }
 0x1ba   : > { %v1513_v58 = vadd.f32 %v6169_v21, %v1512_v4  ;;  %5042 = vmatmul.mubr.msk.f32.gmra.mrb[42].mxu1 %vm2258_vm3, %v2198_v10  ;;  %v3235_v48 = vpop.permute.xlu1 %3234 }
 0x1bb   : > { %v1664_v25 = vmax.f32 %v1518_v9, 0.0  ;;  %v3413_v47 = vsel %vm2258_vm3, %v2198_v10, %v3235_v48  ;;  %v3233_v6 = vpop.permute.xlu0 %3232 }
 0x1bc   : > { %v1663_v49 = vmax.f32 %v1513_v58, 0.0  ;;  %v3412_v54 = vsel %vm2258_vm3, %v2197_v44, %v3233_v6  ;;  %2079 = vrot.lane.b32.xlu1 %v1908_v40, %s5302_s23  ;;  %v3124_v40 = vld [vmem:[%s5355_s26 + $0x1bc] sm:$0xff]  ;;  %v1368_v58 = vadd.f32 %v4939_v0, %v6169_v21  ;;  %v1912_v0 = vld [vmem:[%s5355_s26 + $0x1d3] sm:$0xff] }
 0x1bd   : > { %2077 = vrot.lane.b32.xlu0 %v1907_v60, %s5302_s23  ;;  %v1696_v8 = vadd.f32 %v1664_v25, %v1632_v29  ;;  %5147 = vmatprep.mubr.msk.f32.mxu0 %vm3474_vm4, %v3412_v54  ;;  %v1363_v25 = vadd.f32 %v6169_v21, %v1362_v55 }
 0x1be   : > { %v1695_v5 = vadd.f32 %v1663_v49, %v1631_v63  ;;  %5148 = vmatmul.mubr.msk.f32.gmra.mrb[46].mxu0 %vm3474_vm4, %v3413_v47  ;;  %v2024_v15 = vpop.permute.xlu1 %2023 }
 0x1bf   : > { %v1740_v50 = vsel %vm1720_vm5, %v1696_v8, 0.0  ;;  %v2200_v12 = vsel %vm1043_vm2, %v5770_v38, %v2024_v15  ;;  %v2022_v59 = vpop.permute.xlu0 %2021 }
 0x1c0   : > { %v1790_v41 = vsel %vm970_vm1, %v1695_v5, -inf  ;;  %v2199_v3 = vsel %vm1043_vm2, %v5758_v28, %v2022_v59  ;;  %3294 = vrot.lane.b32.xlu1 %v3123_v35, %s5303_s24  ;;  %v1792_v44 = vsel %vm970_vm1, %v1740_v50, -inf  ;;  %v1634_v35 = vmax.f32 %v1368_v58, 0.0 }
 0x1c1   : > { %3292 = vrot.lane.b32.xlu0 %v3122_v22, %s5303_s24  ;;  %v1791_v10 = vmax.f32 %v1789_v27, %v1790_v41  ;;  %5044 = vmatprep.mubr.msk.f32.mxu1 %vm2258_vm3, %v2199_v3  ;;  %v3125_v27 = vld [vmem:[%s5355_s26 + $0x1c4] sm:$0xff]  ;;  %v1633_v50 = vmax.f32 %v1363_v25, 0.0 }
 0x1c2   : > { %5045 = vmatmul.mubr.msk.f32.gmra.mrb[44].mxu1 %vm2258_vm3, %v2200_v12  ;;  %v3239_v38 = vpop.permute.xlu1 %3238  ;;  %v3128_v25 = vld [vmem:[%s5355_s26 + $0x1e4] sm:$0xff] }
 0x1c3   : > { %v6401_v18 = vmax.f32 %v1791_v10, %v1792_v44  ;;  %v3415_v28 = vsel %vm2258_vm3, %v2200_v12, %v3239_v38  ;;  %v3237_v9 = vpop.permute.xlu0 %3236  ;;  %v3126_v10 = vld [vmem:[%s5355_s26 + $0x1cc] sm:$0xff] }
 0x1c4   : > { %v3414_v4 = vsel %vm2258_vm3, %v2199_v3, %v3237_v9  ;;  %2083 = vrot.lane.b32.xlu1 %v1910_v34, %s5302_s23  ;;  %v3127_v3 = vld [vmem:[%s5355_s26 + $0x1d4] sm:$0xff] }
 0x1c5   : > { %2081 = vrot.lane.b32.xlu0 %v1909_v52, %s5302_s23  ;;  %5150 = vmatprep.mubr.msk.f32.mxu0 %vm3474_vm4, %v3414_v4 }
 0x1c6   : > { %5151 = vmatmul.mubr.msk.f32.gmra.mrb[48].mxu0 %vm3474_vm4, %v3415_v28  ;;  %v2028_v60 = vpop.permute.xlu1 %2027 }
 0x1c7   : > { %v2202_v48 = vsel %vm1043_vm2, %v5826_v32, %v2028_v60  ;;  %v2026_v29 = vpop.permute.xlu0 %2025  ;;  %v4942_v6 = vpop.f32.mrb[14].mxu0  ;;  %v1911_v32 = vld [vmem:[%s5355_s26 + $0x1cb] sm:$0xff]  ;;  %v1913_v60 = vld [vmem:[%s5355_s26 + $0x1e3] sm:$0xff] }
 0x1c8   : > { %v2201_v47 = vsel %vm1043_vm2, %v5802_v7, %v2026_v29  ;;  %v4987_v63 = vpop.f32.mrb[10].mxu1  ;;  %3298 = vrot.lane.b32.xlu1 %v3125_v27, %s5303_s24  ;;  %v1372_v54 = vpop.f32.mrb[15].mxu0 }
 0x1c9   : > { %3296 = vrot.lane.b32.xlu0 %v3124_v40, %s5303_s24  ;;  %v1528_v49 = vadd.f32 %v4987_v63, %v6169_v21  ;;  %v1522_v8 = vpop.f32.mrb[11].mxu1  ;;  %5047 = vmatprep.mubr.msk.f32.mxu1 %vm2258_vm3, %v2201_v47  ;;  %v1914_v40 = vld [vmem:[%s5355_s26 + $0x1eb] sm:$0xff]  ;;  %v1378_v63 = vadd.f32 %v4942_v6, %v6169_v21  ;;  %v1916_v6 = vld [vmem:[%s5355_s26 + $0x1fb] sm:$0xff] }
 0x1ca   : > { %v1523_v55 = vadd.f32 %v6169_v21, %v1522_v8  ;;  %5048 = vmatmul.mubr.msk.f32.gmra.mrb[46].mxu1 %vm2258_vm3, %v2202_v48  ;;  %v3243_v7 = vpop.permute.xlu1 %3242 }
 0x1cb   : > { %v1666_v22 = vmax.f32 %v1528_v49, 0.0  ;;  %v3417_v5 = vsel %vm2258_vm3, %v2202_v48, %v3243_v7  ;;  %v3241_v15 = vpop.permute.xlu0 %3240 }
 0x1cc   : > { %v1665_v12 = vmax.f32 %v1523_v55, 0.0  ;;  %v3416_v59 = vsel %vm2258_vm3, %v2201_v47, %v3241_v15  ;;  %2087 = vrot.lane.b32.xlu1 %v1912_v0, %s5302_s23  ;;  %v1373_v0 = vadd.f32 %v6169_v21, %v1372_v54  ;;  %v1636_v15 = vmax.f32 %v1378_v63, 0.0 }
 0x1cd   : > { %2085 = vrot.lane.b32.xlu0 %v1911_v32, %s5302_s23  ;;  %v1698_v41 = vadd.f32 %v1666_v22, %v1634_v35  ;;  %5153 = vmatprep.mubr.msk.f32.mxu0 %vm3474_vm4, %v3416_v59 }
 0x1ce   : > { %v1697_v34 = vadd.f32 %v1665_v12, %v1633_v50  ;;  %5154 = vmatmul.mubr.msk.f32.gmra.mrb[50].mxu0 %vm3474_vm4, %v3417_v5  ;;  %v2032_v52 = vpop.permute.xlu1 %2031 }
 0x1cf   : > { %v6434_v44 = vsel %vm970_vm1, %v1698_v41, -inf  ;;  %v2204_v38 = vsel %vm1043_vm2, %v5885_v36, %v2032_v52  ;;  %v2030_v28 = vpop.permute.xlu0 %2029  ;;  %v1635_v41 = vmax.f32 %v1373_v0, 0.0  ;;  %v3131_v52 = vld [vmem:[%s5355_s26 + $0x1fc] sm:$0xff] }
 0x1d0   : > { %v1800_v9 = vsel %vm970_vm1, %v1697_v34, -inf  ;;  %v2203_v4 = vsel %vm1043_vm2, %v5873_v20, %v2030_v28  ;;  %3302 = vrot.lane.b32.xlu1 %v3127_v3, %s5303_s24  ;;  %v3129_v20 = vld [vmem:[%s5355_s26 + $0x1ec] sm:$0xff] }
 0x1d1   : > { %3300 = vrot.lane.b32.xlu0 %v3126_v10, %s5303_s24  ;;  %v1802_v27 = vmax.f32 %v1800_v9, %v6434_v44  ;;  %5050 = vmatprep.mubr.msk.f32.mxu1 %vm2258_vm3, %v2203_v4  ;;  %v3130_v44 = vld [vmem:[%s5355_s26 + $0x1f4] sm:$0xff] }
 0x1d2   : > { %5051 = vmatmul.mubr.msk.f32.gmra.mrb[48].mxu1 %vm2258_vm3, %v2204_v38  ;;  %v3247_v36 = vpop.permute.xlu1 %3246 }
 0x1d3   : > { %v3419_v58 = vsel %vm2258_vm3, %v2204_v38, %v3247_v36  ;;  %v3245_v48 = vpop.permute.xlu0 %3244 }
 0x1d4   : > { %v3418_v29 = vsel %vm2258_vm3, %v2203_v4, %v3245_v48  ;;  %2091 = vrot.lane.b32.xlu1 %v1914_v40, %s5302_s23  ;;  %v1918_v48 = vld [vmem:[%s5355_s26 + $0x213] sm:$0xff] }
 0x1d5   : > { %2089 = vrot.lane.b32.xlu0 %v1913_v60, %s5302_s23  ;;  %5156 = vmatprep.mubr.msk.f32.mxu0 %vm3474_vm4, %v3418_v29  ;;  %v1917_v29 = vld [vmem:[%s5355_s26 + $0x20b] sm:$0xff] }
 0x1d6   : > { %5157 = vmatmul.mubr.msk.f32.gmra.mrb[52].mxu0 %vm3474_vm4, %v3419_v58  ;;  %v2036_v47 = vpop.permute.xlu1 %2035 }
 0x1d7   : > { %v2206_v49 = vsel %vm1043_vm2, %v5929_v31, %v2036_v47  ;;  %v2034_v8 = vpop.permute.xlu0 %2033  ;;  %v4945_v55 = vpop.f32.mrb[16].mxu0  ;;  %v1915_v31 = vld [vmem:[%s5355_s26 + $0x1f3] sm:$0xff] }
 0x1d8   : > { %v2205_v32 = vsel %vm1043_vm2, %v5917_v14, %v2034_v8  ;;  %v4990_v7 = vpop.f32.mrb[12].mxu1  ;;  %3306 = vrot.lane.b32.xlu1 %v3129_v20, %s5303_s24  ;;  %v1382_v22 = vpop.f32.mrb[17].mxu0  ;;  %v1388_v0 = vadd.f32 %v4945_v55, %v6169_v21  ;;  %v1920_v55 = vld [vmem:[%s5355_s26 + $0x223] sm:$0xff] }
 0x1d9   : > { %3304 = vrot.lane.b32.xlu0 %v3128_v25, %s5303_s24  ;;  %v1538_v35 = vadd.f32 %v4990_v7, %v6169_v21  ;;  %v1532_v5 = vpop.f32.mrb[13].mxu1  ;;  %5053 = vmatprep.mubr.msk.f32.mxu1 %vm2258_vm3, %v2205_v32 }
 0x1da   : > { %v1533_v54 = vadd.f32 %v6169_v21, %v1532_v5  ;;  %5054 = vmatmul.mubr.msk.f32.gmra.mrb[50].mxu1 %vm2258_vm3, %v2206_v49  ;;  %v3251_v14 = vpop.permute.xlu1 %3250 }
 0x1db   : > { %v1668_v50 = vmax.f32 %v1538_v35, 0.0  ;;  %v3421_v12 = vsel %vm2258_vm3, %v2206_v49, %v3251_v14  ;;  %v3249_v59 = vpop.permute.xlu0 %3248  ;;  %v3132_v49 = vld [vmem:[%s5355_s26 + $0x20c] sm:$0xff]  ;;  %v1383_v35 = vadd.f32 %v6169_v21, %v1382_v22 }
 0x1dc   : > { %v1667_v3 = vmax.f32 %v1533_v54, 0.0  ;;  %v3420_v10 = vsel %vm2258_vm3, %v2205_v32, %v3249_v59  ;;  %2095 = vrot.lane.b32.xlu1 %v1916_v6, %s5302_s23 }
 0x1dd   : > { %2093 = vrot.lane.b32.xlu0 %v1915_v31, %s5302_s23  ;;  %v1700_v34 = vadd.f32 %v1668_v50, %v1636_v15  ;;  %5159 = vmatprep.mubr.msk.f32.mxu0 %vm3474_vm4, %v3420_v10  ;;  %v1638_v50 = vmax.f32 %v1388_v0, 0.0 }
 0x1de   : > { %v1699_v38 = vadd.f32 %v1667_v3, %v1635_v41  ;;  %5160 = vmatmul.mubr.msk.f32.gmra.mrb[54].mxu0 %vm3474_vm4, %v3421_v12  ;;  %v2040_v28 = vpop.permute.xlu1 %2039  ;;  %v1637_v3 = vmax.f32 %v1383_v35, 0.0 }
 0x1df   : > { %v1744_v9 = vsel %vm1720_vm5, %v1700_v34, 0.0  ;;  %v2208_v4 = vsel %vm1043_vm2, %v5973_v46, %v2040_v28  ;;  %v2038_v40 = vpop.permute.xlu0 %2037 }
 0x1e0   : > { %v1803_v60 = vsel %vm970_vm1, %v1699_v38, -inf  ;;  %v2207_v36 = vsel %vm1043_vm2, %v5961_v17, %v2038_v40  ;;  %3310 = vrot.lane.b32.xlu1 %v3131_v52, %s5303_s24  ;;  %v1805_v20 = vsel %vm970_vm1, %v1744_v9, -inf  ;;  %v3134_v38 = vld [vmem:[%s5355_s26 + $0x21c] sm:$0xff] }
 0x1e1   : > { %3308 = vrot.lane.b32.xlu0 %v3130_v44, %s5303_s24  ;;  %v1804_v58 = vmax.f32 %v1802_v27, %v1803_v60  ;;  %5056 = vmatprep.mubr.msk.f32.mxu1 %vm2258_vm3, %v2207_v36  ;;  %v3133_v27 = vld [vmem:[%s5355_s26 + $0x214] sm:$0xff]  ;;  %v3135_v44 = vld [vmem:[%s5355_s26 + $0x224] sm:$0xff] }
 0x1e2   : > { %5057 = vmatmul.mubr.msk.f32.gmra.mrb[52].mxu1 %vm2258_vm3, %v2208_v4  ;;  %v3255_v46 = vpop.permute.xlu1 %3254 }
 0x1e3   : > { %v6492_v25 = vmax.f32 %v1804_v58, %v1805_v20  ;;  %v3423_v17 = vsel %vm2258_vm3, %v2208_v4, %v3255_v46  ;;  %v3253_v47 = vpop.permute.xlu0 %3252  ;;  %v1921_v20 = vld [vmem:[%s5355_s26 + $0x233] sm:$0xff] }
 0x1e4   : > { %v3422_v63 = vsel %vm2258_vm3, %v2207_v36, %v3253_v47  ;;  %2099 = vrot.lane.b32.xlu1 %v1918_v48, %s5302_s23 }
 0x1e5   : > { %2097 = vrot.lane.b32.xlu0 %v1917_v29, %s5302_s23  ;;  %5162 = vmatprep.mubr.msk.f32.mxu0 %vm3474_vm4, %v3422_v63  ;;  %v1922_v29 = vld [vmem:[%s5355_s26 + $0x23b] sm:$0xff] }
 0x1e6   : > { %5163 = vmatmul.mubr.msk.f32.gmra.mrb[56].mxu0 %vm3474_vm4, %v3423_v17  ;;  %v2044_v8 = vpop.permute.xlu1 %2043  ;;  %v3136_v63 = vld [vmem:[%s5355_s26 + $0x234] sm:$0xff] }
 0x1e7   : > { %v2210_v32 = vsel %vm1043_vm2, %v6017_v62, %v2044_v8  ;;  %v2042_v7 = vpop.permute.xlu0 %2041  ;;  %v4948_v6 = vpop.f32.mrb[18].mxu0  ;;  %v1919_v62 = vld [vmem:[%s5355_s26 + $0x21b] sm:$0xff] }
 0x1e8   : > { %v2209_v5 = vsel %vm1043_vm2, %v6005_v43, %v2042_v7  ;;  %v4993_v31 = vpop.f32.mrb[14].mxu1  ;;  %3314 = vrot.lane.b32.xlu1 %v3133_v27, %s5303_s24  ;;  %v1392_v14 = vpop.f32.mrb[19].mxu0 }
 0x1e9   : > { %3312 = vrot.lane.b32.xlu0 %v3132_v49, %s5303_s24  ;;  %v1548_v54 = vadd.f32 %v4993_v31, %v6169_v21  ;;  %v1542_v15 = vpop.f32.mrb[15].mxu1  ;;  %5059 = vmatprep.mubr.msk.f32.mxu1 %vm2258_vm3, %v2209_v5  ;;  %v1398_v49 = vadd.f32 %v4948_v6, %v6169_v21  ;;  %v1924_v6 = vld [vmem:[%s5355_s26 + $0x24b] sm:$0xff] }
 0x1ea   : > { %v1543_v22 = vadd.f32 %v6169_v21, %v1542_v15  ;;  %5060 = vmatmul.mubr.msk.f32.gmra.mrb[54].mxu1 %vm2258_vm3, %v2210_v32  ;;  %v3259_v43 = vpop.permute.xlu1 %3258 }
 0x1eb   : > { %v1670_v12 = vmax.f32 %v1548_v54, 0.0  ;;  %v3425_v59 = vsel %vm2258_vm3, %v2210_v32, %v3259_v43  ;;  %v3257_v41 = vpop.permute.xlu0 %3256  ;;  %v1393_v32 = vadd.f32 %v6169_v21, %v1392_v14 }
 0x1ec   : > { %v1669_v10 = vmax.f32 %v1543_v22, 0.0  ;;  %v3424_v34 = vsel %vm2258_vm3, %v2209_v5, %v3257_v41  ;;  %2103 = vrot.lane.b32.xlu1 %v1920_v55, %s5302_s23  ;;  %v1640_v55 = vmax.f32 %v1398_v49, 0.0 }
 0x1ed   : > { %2101 = vrot.lane.b32.xlu0 %v1919_v62, %s5302_s23  ;;  %v1702_v52 = vadd.f32 %v1670_v12, %v1638_v50  ;;  %5165 = vmatprep.mubr.msk.f32.mxu0 %vm3474_vm4, %v3424_v34  ;;  %v1639_v50 = vmax.f32 %v1393_v32, 0.0 }
 0x1ee   : > { %v1701_v28 = vadd.f32 %v1669_v10, %v1637_v3  ;;  %5166 = vmatmul.mubr.msk.f32.gmra.mrb[58].mxu0 %vm3474_vm4, %v3425_v59  ;;  %v2048_v9 = vpop.permute.xlu1 %2047  ;;  %v3138_v3 = vld [vmem:[%s5355_s26 + $0x244] sm:$0xff] }
 0x1ef   : > { %v6525_v4 = vsel %vm970_vm1, %v1702_v52, -inf  ;;  %v2212_v40 = vsel %vm1043_vm2, %v6061_v57, %v2048_v9  ;;  %v2046_v60 = vpop.permute.xlu0 %2045 }
 0x1f0   : > { %v1813_v36 = vsel %vm970_vm1, %v1701_v28, -inf  ;;  %v2211_v58 = vsel %vm1043_vm2, %v6049_v16, %v2046_v60  ;;  %3318 = vrot.lane.b32.xlu1 %v3135_v44, %s5303_s24  ;;  %v3137_v16 = vld [vmem:[%s5355_s26 + $0x23c] sm:$0xff] }
 0x1f1   : > { %3316 = vrot.lane.b32.xlu0 %v3134_v38, %s5303_s24  ;;  %v1815_v48 = vmax.f32 %v1813_v36, %v6525_v4  ;;  %5062 = vmatprep.mubr.msk.f32.mxu1 %vm2258_vm3, %v2211_v58  ;;  %v1925_v60 = vld [vmem:[%s5355_s26 + $0x25b] sm:$0xff] }
 0x1f2   : > { %5063 = vmatmul.mubr.msk.f32.gmra.mrb[56].mxu1 %vm2258_vm3, %v2212_v40  ;;  %v3263_v57 = vpop.permute.xlu1 %3262 }
 0x1f3   : > { %v3427_v46 = vsel %vm2258_vm3, %v2212_v40, %v3263_v57  ;;  %v3261_v17 = vpop.permute.xlu0 %3260  ;;  %v1926_v40 = vld [vmem:[%s5355_s26 + $0x263] sm:$0xff] }
 0x1f4   : > { %v3426_v47 = vsel %vm2258_vm3, %v2211_v58, %v3261_v17  ;;  %2107 = vrot.lane.b32.xlu1 %v1922_v29, %s5302_s23  ;;  %v3140_v57 = vld [vmem:[%s5355_s26 + $0x25c] sm:$0xff] }
 0x1f5   : > { %2105 = vrot.lane.b32.xlu0 %v1921_v20, %s5302_s23  ;;  %5168 = vmatprep.mubr.msk.f32.mxu0 %vm3474_vm4, %v3426_v47  ;;  %v6596_v17 = vld [vmem:[%s7649_s2] ss:$0 sm:$0xff] }
 0x1f6   : > { %5169 = vmatmul.mubr.msk.f32.gmra.mrb[60].mxu0 %vm3474_vm4, %v3427_v46  ;;  %v2052_v27 = vpop.permute.xlu1 %2051 }
 0x1f7   : > { %v2214_v8 = vsel %vm1043_vm2, %v6109_v56, %v2052_v27  ;;  %v2050_v0 = vpop.permute.xlu0 %2049  ;;  %v4951_v35 = vpop.f32.mrb[20].mxu0  ;;  %v1923_v56 = vld [vmem:[%s5355_s26 + $0x243] sm:$0xff] }
 0x1f8   : > { %v2213_v7 = vsel %vm1043_vm2, %v6093_v13, %v2050_v0  ;;  %v4996_v5 = vpop.f32.mrb[16].mxu1  ;;  %3322 = vrot.lane.b32.xlu1 %v3137_v16, %s5303_s24  ;;  %v1402_v54 = vpop.f32.mrb[21].mxu0  ;;  %v1408_v47 = vadd.f32 %v6596_v17, %v4951_v35  ;;  %v1928_v35 = vld [vmem:[%s5355_s26 + $0x273] sm:$0xff] }
 0x1f9   : > { %3320 = vrot.lane.b32.xlu0 %v3136_v63, %s5303_s24  ;;  %v1558_v31 = vadd.f32 %v4996_v5, %v6169_v21  ;;  %v1552_v15 = vpop.f32.mrb[17].mxu1  ;;  %5065 = vmatprep.mubr.msk.f32.mxu1 %vm2258_vm3, %v2213_v7  ;;  %v1403_v27 = vadd.f32 %v6596_v17, %v1402_v54 }
 0x1fa   : > { %v1553_v14 = vadd.f32 %v6169_v21, %v1552_v15  ;;  %5066 = vmatmul.mubr.msk.f32.gmra.mrb[58].mxu1 %vm2258_vm3, %v2214_v8  ;;  %v3267_v13 = vpop.permute.xlu1 %3266  ;;  %v3139_v21 = vld [vmem:[%s5355_s26 + $0x24c] sm:$0xff]  ;;  %v1642_v54 = vmax.f32 %v1408_v47, 0.0 }
 0x1fb   : > { %v1672_v62 = vmax.f32 %v1558_v31, 0.0  ;;  %v3429_v22 = vsel %vm2258_vm3, %v2214_v8, %v3267_v13  ;;  %v3265_v43 = vpop.permute.xlu0 %3264 }
 0x1fc   : > { %v1671_v12 = vmax.f32 %v1553_v14, 0.0  ;;  %v3428_v59 = vsel %vm2258_vm3, %v2213_v7, %v3265_v43  ;;  %2111 = vrot.lane.b32.xlu1 %v1924_v6, %s5302_s23  ;;  %v1641_v14 = vmax.f32 %v1403_v27, 0.0  ;;  %v3142_v43 = vld [vmem:[%s5355_s26 + $0x26c] sm:$0xff] }
 0x1fd   : > { %2109 = vrot.lane.b32.xlu0 %v1923_v56, %s5302_s23  ;;  %v1704_v41 = vadd.f32 %v1672_v62, %v1640_v55  ;;  %5171 = vmatprep.mubr.msk.f32.mxu0 %vm3474_vm4, %v3428_v59 }
 0x1fe   : > { %v1703_v10 = vadd.f32 %v1671_v12, %v1639_v50  ;;  %5172 = vmatmul.mubr.msk.f32.gmra.mrb[62].mxu0 %vm3474_vm4, %v3429_v22  ;;  %v2056_v34 = vpop.permute.xlu1 %2055  ;;  %v3143_v22 = vld [vmem:[%s5355_s26 + $0x274] sm:$0xff] }
 0x1ff   : > { %v1748_v52 = vsel %vm1720_vm5, %v1704_v41, 0.0  ;;  %v2216_v44 = vsel %vm1043_vm2, %v6153_v30, %v2056_v34  ;;  %v2054_v38 = vpop.permute.xlu0 %2053 }
 0x200   : > { %v1816_v28 = vsel %vm970_vm1, %v1703_v10, -inf  ;;  %v2215_v9 = vsel %vm1043_vm2, %v6140_v26, %v2054_v38  ;;  %3326 = vrot.lane.b32.xlu1 %v3139_v21, %s5303_s24  ;;  %v1818_v36 = vsel %vm970_vm1, %v1748_v52, -inf }
 0x201   : > { %3324 = vrot.lane.b32.xlu0 %v3138_v3, %s5303_s24  ;;  %v1817_v4 = vmax.f32 %v1815_v48, %v1816_v28  ;;  %5068 = vmatprep.mubr.msk.f32.mxu1 %vm2258_vm3, %v2215_v9  ;;  %v3141_v48 = vld [vmem:[%s5355_s26 + $0x264] sm:$0xff] }
 0x202   : > { %5069 = vmatmul.mubr.msk.f32.gmra.mrb[60].mxu1 %vm2258_vm3, %v2216_v44  ;;  %v3271_v30 = vpop.permute.xlu1 %3270 }
 0x203   : > { %v6583_v58 = vmax.f32 %v1817_v4, %v1818_v36  ;;  %v3431_v26 = vsel %vm2258_vm3, %v2216_v44, %v3271_v30  ;;  %v3269_v29 = vpop.permute.xlu0 %3268 }
 0x204   : > { %v3430_v20 = vsel %vm2258_vm3, %v2215_v9, %v3269_v29  ;;  %2115 = vrot.lane.b32.xlu1 %v1926_v40, %s5302_s23 }
 0x205   : > { %2113 = vrot.lane.b32.xlu0 %v1925_v60, %s5302_s23  ;;  %5174 = vmatprep.mubr.msk.f32.mxu0 %vm3474_vm4, %v3430_v20 }
 0x206   : > { %5175 = vmatmul.mubr.msk.f32.gmra.mrb[64].mxu0 %vm3474_vm4, %v3431_v26  ;;  %v2060_v46 = vpop.permute.xlu1 %2059 }
 0x207   : > { %v2218_v16 = vsel %vm1043_vm2, %v6210_v45, %v2060_v46  ;;  %v2058_v63 = vpop.permute.xlu0 %2057  ;;  %v4954_v8 = vpop.f32.mrb[22].mxu0  ;;  %v1927_v45 = vld [vmem:[%s5355_s26 + $0x26b] sm:$0xff] }
 0x208   : > { %v2217_v49 = vsel %vm1043_vm2, %v6197_v42, %v2058_v63  ;;  %v4999_v0 = vpop.f32.mrb[18].mxu1  ;;  %3330 = vrot.lane.b32.xlu1 %v3141_v48, %s5303_s24  ;;  %v1412_v7 = vpop.f32.mrb[23].mxu0  ;;  %v1418_v28 = vadd.f32 %v6596_v17, %v4954_v8 }
 0x209   : > { %3328 = vrot.lane.b32.xlu0 %v3140_v57, %s5303_s24  ;;  %v1568_v32 = vadd.f32 %v6596_v17, %v4999_v0  ;;  %v1562_v5 = vpop.f32.mrb[19].mxu1  ;;  %5071 = vmatprep.mubr.msk.f32.mxu1 %vm2258_vm3, %v2217_v49  ;;  %v1413_v40 = vadd.f32 %v6596_v17, %v1412_v7 }
 0x20a   : > { %v1563_v31 = vadd.f32 %v6596_v17, %v1562_v5  ;;  %5072 = vmatmul.mubr.msk.f32.gmra.mrb[62].mxu1 %vm2258_vm3, %v2218_v16  ;;  %v3275_v42 = vpop.permute.xlu1 %3274 }
 0x20b   : > { %v1674_v15 = vmax.f32 %v1568_v32, 0.0  ;;  %v3433_v6 = vsel %vm2258_vm3, %v2218_v16, %v3275_v42  ;;  %v3273_v56 = vpop.permute.xlu0 %3272  ;;  %v1643_v63 = vmax.f32 %v1413_v40, 0.0 }
 0x20c   : > { %v1673_v13 = vmax.f32 %v1563_v31, 0.0  ;;  %v3432_v55 = vsel %vm2258_vm3, %v2217_v49, %v3273_v56  ;;  %2119 = vrot.lane.b32.xlu1 %v1928_v35, %s5302_s23 }
 0x20d   : > { %2117 = vrot.lane.b32.xlu0 %v1927_v45, %s5302_s23  ;;  %v1706_v62 = vadd.f32 %v1674_v15, %v1642_v54  ;;  %5177 = vmatprep.mubr.msk.f32.mxu0 %vm3474_vm4, %v3432_v55 }
 0x20e   : > { %v1705_v50 = vadd.f32 %v1673_v13, %v1641_v14  ;;  %5178 = vmatmul.mubr.msk.f32.gmra.mrb[66].mxu0 %vm3474_vm4, %v3433_v6  ;;  %v2064_v12 = vpop.permute.xlu1 %2063 }
 0x20f   : > { %v1827_v59 = vsel %vm970_vm1, %v1706_v62, -inf  ;;  %v2220_v41 = vsel %vm1043_vm2, %v5553_v53, %v2064_v12  ;;  %v2062_v21 = vpop.permute.xlu0 %2061 }
 0x210   : > { %v1826_v3 = vsel %vm970_vm1, %v1705_v50, -inf  ;;  %v2219_v10 = vsel %vm1043_vm2, %v5527_v37, %v2062_v21  ;;  %3334 = vrot.lane.b32.xlu1 %v3143_v22, %s5303_s24 }
 0x211   : > { %3332 = vrot.lane.b32.xlu0 %v3142_v43, %s5303_s24  ;;  %v1828_v34 = vmax.f32 %v1826_v3, %v1827_v59  ;;  %5074 = vmatprep.mubr.msk.f32.mxu1 %vm2258_vm3, %v2219_v10 }
 0x212   : > { %5075 = vmatmul.mubr.msk.f32.gmra.mrb[64].mxu1 %vm2258_vm3, %v2220_v41  ;;  %v3279_v52 = vpop.permute.xlu1 %3278 }
 0x213   : > { %v3435_v44 = vsel %vm2258_vm3, %v2220_v41, %v3279_v52  ;;  %v3277_v38 = vpop.permute.xlu0 %3276 }
 0x214   : > { %v3434_v53 = vsel %vm2258_vm3, %v2219_v10, %v3277_v38 }
 0x215   : > { %5180 = vmatprep.mubr.msk.f32.mxu0 %vm3474_vm4, %v3434_v53 }
 0x216   : > { %5181 = vmatmul.mubr.msk.f32.gmra.mrb[68].mxu0 %vm3474_vm4, %v3435_v44  ;;  %v2068_v37 = vpop.permute.xlu1 %2067 }
 0x217   : > { %v2222_v9 = vsel %vm1043_vm2, %v5597_v19, %v2068_v37  ;;  %v2066_v4 = vpop.permute.xlu0 %2065  ;;  %v4957_v36 = vpop.f32.mrb[24].mxu0  ;;  %v1644_v19 = vmax.f32 %v1418_v28, 0.0 }
 0x218   : > { %v2221_v60 = vsel %vm1043_vm2, %v5571_v1, %v2066_v4  ;;  %v5002_v30 = vpop.f32.mrb[20].mxu1  ;;  %v1422_v29 = vpop.f32.mrb[25].mxu0  ;;  %v1428_v14 = vadd.f32 %v6596_v17, %v4957_v36 }
 0x219   : > { %v1578_v26 = vadd.f32 %v6596_v17, %v5002_v30  ;;  %v1572_v20 = vpop.f32.mrb[21].mxu1  ;;  %5077 = vmatprep.mubr.msk.f32.mxu1 %vm2258_vm3, %v2221_v60  ;;  %v1423_v62 = vadd.f32 %v6596_v17, %v1422_v29 }
 0x21a   : > { %v1573_v48 = vadd.f32 %v6596_v17, %v1572_v20  ;;  %5078 = vmatmul.mubr.msk.f32.gmra.mrb[66].mxu1 %vm2258_vm3, %v2222_v9  ;;  %v3283_v57 = vpop.permute.xlu1 %3282 }
 0x21b   : > { %v1676_v46 = vmax.f32 %v1578_v26, 0.0  ;;  %v3437_v47 = vsel %vm2258_vm3, %v2222_v9, %v3283_v57  ;;  %v3281_v16 = vpop.permute.xlu0 %3280  ;;  %v1645_v44 = vmax.f32 %v1423_v62, 0.0 }
 0x21c   : > { %v1675_v1 = vmax.f32 %v1573_v48, 0.0  ;;  %v3436_v27 = vsel %vm2258_vm3, %v2221_v60, %v3281_v16  ;;  %v7697_v16 = vld [vmem:[#allocation2_spill] sm:$0xff] }
 0x21d   : > { %v1708_v49 = vadd.f32 %v1676_v46, %v1644_v19  ;;  %5183 = vmatprep.mubr.msk.f32.mxu0 %vm3474_vm4, %v3436_v27  ;;  %v7696_v19 = vld [vmem:[#allocation3_spill] sm:$0xff] }
 0x21e   : > { %v1707_v8 = vadd.f32 %v1675_v1, %v1643_v63  ;;  %5184 = vmatmul.mubr.msk.f32.gmra.mrb[70].mxu0 %vm3474_vm4, %v3437_v47  ;;  %v2072_v0 = vpop.permute.xlu1 %2071 }
 0x21f   : > { %v1752_v32 = vsel %vm1720_vm5, %v1708_v49, 0.0  ;;  %v2224_v7 = vsel %vm1043_vm2, %v5641_v51, %v2072_v0  ;;  %v2070_v5 = vpop.permute.xlu0 %2069 }
 0x220   : > { %v1829_v35 = vsel %vm970_vm1, %v1707_v8, -inf  ;;  %v2223_v45 = vsel %vm1043_vm2, %v5615_v33, %v2070_v5  ;;  %v1831_v42 = vsel %vm970_vm1, %v1752_v32, -inf }
 0x221   : > { %v1830_v31 = vmax.f32 %v1828_v34, %v1829_v35  ;;  %5080 = vmatprep.mubr.msk.f32.mxu1 %vm2258_vm3, %v2223_v45 }
 0x222   : > { %5081 = vmatmul.mubr.msk.f32.gmra.mrb[68].mxu1 %vm2258_vm3, %v2224_v7  ;;  %v3287_v54 = vpop.permute.xlu1 %3286 }
 0x223   : > { %v6658_v15 = vmax.f32 %v1830_v31, %v1831_v42  ;;  %v3439_v6 = vsel %vm2258_vm3, %v2224_v7, %v3287_v54  ;;  %v3285_v56 = vpop.permute.xlu0 %3284 }
 0x224   : > { %v3438_v51 = vsel %vm2258_vm3, %v2223_v45, %v3285_v56 }
 0x225   : > { %5186 = vmatprep.mubr.msk.f32.mxu0 %vm3474_vm4, %v3438_v51 }
 0x226   : > { %5187 = vmatmul.mubr.msk.f32.gmra.mrb[72].mxu0 %vm3474_vm4, %v3439_v6  ;;  %v2076_v33 = vpop.permute.xlu1 %2075 }
 0x227   : > { %v2226_v13 = vsel %vm1043_vm2, %v5685_v23, %v2076_v33  ;;  %v2074_v55 = vpop.permute.xlu0 %2073  ;;  %v4960_v43 = vpop.f32.mrb[26].mxu0  ;;  %v1646_v23 = vmax.f32 %v1428_v14, 0.0 }
 0x228   : > { %v2225_v22 = vsel %vm1043_vm2, %v5659_v2, %v2074_v55  ;;  %v5005_v50 = vpop.f32.mrb[22].mxu1  ;;  %v1432_v59 = vpop.f32.mrb[27].mxu0  ;;  %v1438_v57 = vadd.f32 %v6596_v17, %v4960_v43  ;;  %v7699_v43 = vld [vmem:[#allocation4_spill] sm:$0xff] }
 0x229   : > { %v1588_v12 = vadd.f32 %v6596_v17, %v5005_v50  ;;  %v1582_v41 = vpop.f32.mrb[23].mxu1  ;;  %5083 = vmatprep.mubr.msk.f32.mxu1 %vm2258_vm3, %v2225_v22  ;;  %v1433_v47 = vadd.f32 %v6596_v17, %v1432_v59 }
 0x22a   : > { %v1583_v21 = vadd.f32 %v6596_v17, %v1582_v41  ;;  %5084 = vmatmul.mubr.msk.f32.gmra.mrb[70].mxu1 %vm2258_vm3, %v2226_v13  ;;  %v3291_v3 = vpop.permute.xlu1 %3290  ;;  %v1648_v5 = vmax.f32 %v1438_v57, 0.0 }
 0x22b   : > { %v1678_v10 = vmax.f32 %v1588_v12, 0.0  ;;  %v3441_v34 = vsel %vm2258_vm3, %v2226_v13, %v3291_v3  ;;  %v3289_v52 = vpop.permute.xlu0 %3288  ;;  %v1647_v42 = vmax.f32 %v1433_v47, 0.0  ;;  %v7698_v13 = vld [vmem:[#allocation5_spill] sm:$0xff] }
 0x22c   : > { %v1677_v2 = vmax.f32 %v1583_v21, 0.0  ;;  %v3440_v38 = vsel %vm2258_vm3, %v2225_v22, %v3289_v52 }
 0x22d   : > { %v1710_v53 = vadd.f32 %v1678_v10, %v1646_v23  ;;  %5189 = vmatprep.mubr.msk.f32.mxu0 %vm3474_vm4, %v3440_v38 }
 0x22e   : > { %v1709_v37 = vadd.f32 %v1677_v2, %v1645_v44  ;;  %5190 = vmatmul.mubr.msk.f32.gmra.mrb[74].mxu0 %vm3474_vm4, %v3441_v34  ;;  %v2080_v28 = vpop.permute.xlu1 %2079  ;;  %v7700_v44 = vld [vmem:[#allocation7_spill] sm:$0xff] }
 0x22f   : > { %v1840_v9 = vsel %vm970_vm1, %v1710_v53, -inf  ;;  %v2228_v4 = vsel %vm1043_vm2, %v5729_v61, %v2080_v28  ;;  %v2078_v40 = vpop.permute.xlu0 %2077 }
 0x230   : > { %v1839_v60 = vsel %vm970_vm1, %v1709_v37, -inf  ;;  %v2227_v36 = vsel %vm1043_vm2, %v5703_v39, %v2078_v40  ;;  %v7701_v37 = vld [vmem:[#allocation6_spill] sm:$0xff] }
 0x231   : > { %v1841_v30 = vmax.f32 %v1839_v60, %v1840_v9  ;;  %5086 = vmatprep.mubr.msk.f32.mxu1 %vm2258_vm3, %v2227_v36 }
 0x232   : > { %5087 = vmatmul.mubr.msk.f32.gmra.mrb[72].mxu1 %vm2258_vm3, %v2228_v4  ;;  %v3295_v26 = vpop.permute.xlu1 %3294 }
 0x233   : > { %v3443_v29 = vsel %vm2258_vm3, %v2228_v4, %v3295_v26  ;;  %v3293_v20 = vpop.permute.xlu0 %3292 }
 0x234   : > { %v3442_v48 = vsel %vm2258_vm3, %v2227_v36, %v3293_v20 }
 0x235   : > { %5192 = vmatprep.mubr.msk.f32.mxu0 %vm3474_vm4, %v3442_v48 }
 0x236   : > { %5193 = vmatmul.mubr.msk.f32.gmra.mrb[76].mxu0 %vm3474_vm4, %v3443_v29  ;;  %v2084_v61 = vpop.permute.xlu1 %2083 }
 0x237   : > { %v2230_v39 = vsel %vm1043_vm2, %v7696_v19, %v2084_v61  ;;  %v2082_v46 = vpop.permute.xlu0 %2081  ;;  %v4963_v1 = vpop.f32.mrb[28].mxu0 }
 0x238   : > { %v2229_v63 = vsel %vm1043_vm2, %v7697_v16, %v2082_v46  ;;  %v5008_v27 = vpop.f32.mrb[24].mxu1  ;;  %v1442_v8 = vpop.f32.mrb[29].mxu0  ;;  %v1448_v52 = vadd.f32 %v6596_v17, %v4963_v1  ;;  %v7702_v1 = vld [vmem:[#allocation9_spill] sm:$0xff] }
 0x239   : > { %v1598_v49 = vadd.f32 %v6596_v17, %v5008_v27  ;;  %v1592_v0 = vpop.f32.mrb[25].mxu1  ;;  %5089 = vmatprep.mubr.msk.f32.mxu1 %vm2258_vm3, %v2229_v63  ;;  %v1443_v53 = vadd.f32 %v6596_v17, %v1442_v8 }
 0x23a   : > { %v1593_v32 = vadd.f32 %v6596_v17, %v1592_v0  ;;  %5090 = vmatmul.mubr.msk.f32.gmra.mrb[74].mxu1 %vm2258_vm3, %v2230_v39  ;;  %v3299_v7 = vpop.permute.xlu1 %3298  ;;  %v1650_v29 = vmax.f32 %v1448_v52, 0.0  ;;  %v7703_v0 = vld [vmem:[#allocation8_spill] sm:$0xff]  ;;  %v1781_v52 = vrot.slane %v6310_v11, 4 }
 0x23b   : > { %v1680_v35 = vmax.f32 %v1598_v49, 0.0  ;;  %v3445_v45 = vsel %vm2258_vm3, %v2230_v39, %v3299_v7  ;;  %v3297_v31 = vpop.permute.xlu0 %3296  ;;  %v1649_v57 = vmax.f32 %v1443_v53, 0.0 }
 0x23c   : > { %v1679_v54 = vmax.f32 %v1593_v32, 0.0  ;;  %v3444_v6 = vsel %vm2258_vm3, %v2229_v63, %v3297_v31 }
 0x23d   : > { %v1712_v56 = vadd.f32 %v1680_v35, %v1648_v5  ;;  %5195 = vmatprep.mubr.msk.f32.mxu0 %vm3474_vm4, %v3444_v6  ;;  %v7705_v6 = vld [vmem:[#allocation18_spill] sm:$0xff] }
 0x23e   : > { %v1711_v51 = vadd.f32 %v1679_v54, %v1647_v42  ;;  %5196 = vmatmul.mubr.msk.f32.gmra.mrb[78].mxu0 %vm3474_vm4, %v3445_v45  ;;  %v2088_v33 = vpop.permute.xlu1 %2087  ;;  %v7704_v42 = vld [vmem:[#allocation17_spill] sm:$0xff] }
 0x23f   : > { %v1756_v14 = vsel %vm1720_vm5, %v1712_v56, 0.0  ;;  %v2232_v55 = vsel %vm1043_vm2, %v7698_v13, %v2088_v33  ;;  %v2086_v62 = vpop.permute.xlu0 %2085  ;;  %v1308_v54 = vadd.f32 %v6596_v17, %v7704_v42  ;;  %v1303_v56 = vadd.f32 %v6596_v17, %v7705_v6 }
 0x240   : > { %v1842_v22 = vsel %vm970_vm1, %v1711_v51, -inf  ;;  %v2231_v50 = vsel %vm1043_vm2, %v7699_v43, %v2086_v62  ;;  %v1844_v59 = vsel %vm970_vm1, %v1756_v14, -inf  ;;  %v7706_v14 = vld [vmem:[#allocation11_spill] sm:$0xff] }
 0x241   : > { %v1843_v12 = vmax.f32 %v1841_v30, %v1842_v22  ;;  %5092 = vmatprep.mubr.msk.f32.mxu1 %vm2258_vm3, %v2231_v50  ;;  %v7707_v22 = vld [vmem:[#allocation10_spill] sm:$0xff] }
 0x242   : > { %5093 = vmatmul.mubr.msk.f32.gmra.mrb[76].mxu1 %vm2258_vm3, %v2232_v55  ;;  %v3303_v41 = vpop.permute.xlu1 %3302 }
 0x243   : > { %v6714_v21 = vmax.f32 %v1843_v12, %v1844_v59  ;;  %v3447_v3 = vsel %vm2258_vm3, %v2232_v55, %v3303_v41  ;;  %v3301_v23 = vpop.permute.xlu0 %3300  ;;  %v1622_v59 = vmax.f32 %v1308_v54, 0.0  ;;  %v1833_v54 = vrot.slane %v6658_v15, 4 }
 0x244   : > { %v3446_v10 = vsel %vm2258_vm3, %v2231_v50, %v3301_v23 }
 0x245   : > { %5198 = vmatprep.mubr.msk.f32.mxu0 %vm3474_vm4, %v3446_v10 }
 0x246   : > { %5199 = vmatmul.mubr.msk.f32.gmra.mrb[80].mxu0 %vm3474_vm4, %v3447_v3  ;;  %v2092_v34 = vpop.permute.xlu1 %2091 }
 0x247   : > { %v2234_v2 = vsel %vm1043_vm2, %v7700_v44, %v2092_v34  ;;  %v2090_v38 = vpop.permute.xlu0 %2089  ;;  %v4966_v9 = vpop.f32.mrb[30].mxu0  ;;  %v1621_v34 = vmax.f32 %v1303_v56, 0.0  ;;  %v7711_v56 = vld [vmem:[#allocation12_spill] sm:$0xff] }
 0x248   : > { %v2233_v28 = vsel %vm1043_vm2, %v7701_v37, %v2090_v38  ;;  %v5011_v4 = vpop.f32.mrb[26].mxu1  ;;  %v1452_v60 = vpop.f32.mrb[31].mxu0  ;;  %v1458_v33 = vadd.f32 %v6596_v17, %v4966_v9 }
 0x249   : > { %v1608_v40 = vadd.f32 %v6596_v17, %v5011_v4  ;;  %v1602_v36 = vpop.f32.mrb[27].mxu1  ;;  %5095 = vmatprep.mubr.msk.f32.mxu1 %vm2258_vm3, %v2233_v28  ;;  %v1453_v62 = vadd.f32 %v6596_v17, %v1452_v60 }
 0x24a   : > { %v1603_v30 = vadd.f32 %v6596_v17, %v1602_v36  ;;  %5096 = vmatmul.mubr.msk.f32.gmra.mrb[78].mxu1 %vm2258_vm3, %v2234_v2  ;;  %v3307_v26 = vpop.permute.xlu1 %3306  ;;  %v1652_v53 = vmax.f32 %v1458_v33, 0.0 }
 0x24b   : > { %v1682_v20 = vmax.f32 %v1608_v40, 0.0  ;;  %v3449_v48 = vsel %vm2258_vm3, %v2234_v2, %v3307_v26  ;;  %v3305_v61 = vpop.permute.xlu0 %3304  ;;  %v1651_v40 = vmax.f32 %v1453_v62, 0.0  ;;  %v7708_v26 = vld [vmem:[#allocation23_spill] sm:$0xff] }
 0x24c   : > { %v1681_v19 = vmax.f32 %v1603_v30, 0.0  ;;  %v3448_v39 = vsel %vm2258_vm3, %v2233_v28, %v3305_v61  ;;  %v1794_v61 = vrot.slane %v6401_v18, 4 }
 0x24d   : > { %v1714_v46 = vadd.f32 %v1682_v20, %v1650_v29  ;;  %5201 = vmatprep.mubr.msk.f32.mxu0 %vm3474_vm4, %v3448_v39  ;;  %v1732_v29 = vsel %vm1720_vm5, %v7708_v26, 0.0 }
 0x24e   : > { %v1713_v47 = vadd.f32 %v1681_v19, %v1649_v57  ;;  %5202 = vmatmul.mubr.msk.f32.gmra.mrb[82].mxu0 %vm3474_vm4, %v3449_v48  ;;  %v2096_v16 = vpop.permute.xlu1 %2095  ;;  %v1807_v57 = vrot.slane %v6492_v25, 4 }
 0x24f   : > { %v6735_v63 = vsel %vm970_vm1, %v1714_v46, -inf  ;;  %v2236_v27 = vsel %vm1043_vm2, %v7702_v1, %v2096_v16  ;;  %v2094_v49 = vpop.permute.xlu0 %2093  ;;  %v7709_v16 = vld [vmem:[#allocation24_spill] sm:$0xff] }
 0x250   : > { %v6740_v8 = vsel %vm970_vm1, %v1713_v47, -inf  ;;  %v2235_v32 = vsel %vm1043_vm2, %v7703_v0, %v2094_v49  ;;  %v1764_v1 = vsel %vm970_vm1, %v7709_v16, -inf }
 0x251   : > { %v1854_v7 = vmax.f32 %v6740_v8, %v6735_v63  ;;  %5098 = vmatprep.mubr.msk.f32.mxu1 %vm2258_vm3, %v2235_v32 }
 0x252   : > { %5099 = vmatmul.mubr.msk.f32.gmra.mrb[80].mxu1 %vm2258_vm3, %v2236_v27  ;;  %v3311_v5 = vpop.permute.xlu1 %3310 }
 0x253   : > { %v3451_v35 = vsel %vm2258_vm3, %v2236_v27, %v3311_v5  ;;  %v3309_v45 = vpop.permute.xlu0 %3308  ;;  %v1782_v27 = vmax.f32 %v6310_v11, %v1781_v52  ;;  %v1820_v5 = vrot.slane %v6583_v58, 4 }
 0x254   : > { %v3450_v31 = vsel %vm2258_vm3, %v2235_v32, %v3309_v45 }
 0x255   : > { %5204 = vmatprep.mubr.msk.f32.mxu0 %vm3474_vm4, %v3450_v31  ;;  %v7710_v31 = vld [vmem:[#allocation13_spill] sm:$0xff] }
 0x256   : > { %5205 = vmatmul.mubr.msk.f32.gmra.mrb[84].mxu0 %vm3474_vm4, %v3451_v35  ;;  %v2100_v51 = vpop.permute.xlu1 %2099 }
 0x257   : > { %v2238_v13 = vsel %vm1043_vm2, %v7706_v14, %v2100_v51  ;;  %v2098_v55 = vpop.permute.xlu0 %2097  ;;  %v4969_v50 = vpop.f32.mrb[32].mxu0  ;;  %v1795_v14 = vmax.f32 %v6401_v18, %v1794_v61  ;;  %v1766_v18 = vsel %vm970_vm1, %v1732_v29, -inf }
 0x258   : > { %v2237_v43 = vsel %vm1043_vm2, %v7707_v22, %v2098_v55  ;;  %v5014_v12 = vpop.f32.mrb[28].mxu1  ;;  %v1468_v41 = vadd.f32 %v6596_v17, %v4969_v50  ;;  %v1462_v23 = vpop.f32.mrb[33].mxu0  ;;  %v1846_v55 = vrot.slane %v6714_v21, 4 }
 0x259   : > { %v1618_v3 = vadd.f32 %v6596_v17, %v5014_v12  ;;  %v1612_v10 = vpop.f32.mrb[29].mxu1  ;;  %5101 = vmatprep.mubr.msk.f32.mxu1 %vm2258_vm3, %v2237_v43  ;;  %v1463_v44 = vadd.f32 %v6596_v17, %v1462_v23 }
 0x25a   : > { %v1613_v2 = vadd.f32 %v6596_v17, %v1612_v10  ;;  %5102 = vmatmul.mubr.msk.f32.gmra.mrb[82].mxu1 %vm2258_vm3, %v2238_v13  ;;  %v3315_v38 = vpop.permute.xlu1 %3314  ;;  %v1654_v37 = vmax.f32 %v1468_v41, 0.0  ;;  %v1834_v41 = vmax.f32 %v6658_v15, %v1833_v54 }
 0x25b   : > { %v1684_v28 = vmax.f32 %v1618_v3, 0.0  ;;  %v3453_v9 = vsel %vm2258_vm3, %v2238_v13, %v3315_v38  ;;  %v3313_v4 = vpop.permute.xlu0 %3312  ;;  %v1653_v60 = vmax.f32 %v1463_v44, 0.0  ;;  %v1808_v13 = vmax.f32 %v6492_v25, %v1807_v57 }
 0x25c   : > { %v1683_v36 = vmax.f32 %v1613_v2, 0.0  ;;  %v3452_v30 = vsel %vm2258_vm3, %v2237_v43, %v3313_v4  ;;  %v1686_v20 = vadd.f32 %v1654_v37, %v1622_v59  ;;  %v1821_v25 = vmax.f32 %v6583_v58, %v1820_v5  ;;  %v7712_v37 = vld [vmem:[#allocation15_spill] sm:$0xff]  ;;  %v7713_v4 = vld [vmem:[#allocation14_spill] sm:$0xff] }
 0x25d   : > { %v1716_v17 = vadd.f32 %v1684_v28, %v1652_v53  ;;  %v6774_v48 = vpop.f32.mrb[30].mxu1  ;;  %5207 = vmatprep.mubr.msk.f32.mxu0 %vm3474_vm4, %v3452_v30  ;;  %v1685_v19 = vadd.f32 %v1653_v60, %v1621_v34  ;;  %v1783_v59 = vrot.slane %v1782_v27, 2  ;;  %v1796_v34 = vrot.slane %v1795_v14, 2 }
 0x25e   : > { %v1715_v39 = vadd.f32 %v1683_v36, %v1651_v40  ;;  %v6779_v46 = vpop.f32.mrb[31].mxu1  ;;  %5208 = vmatmul.mubr.msk.f32.gmra.mrb[86].mxu0 %vm3474_vm4, %v3453_v9  ;;  %v2104_v47 = vpop.permute.xlu1 %2103  ;;  %v1762_v49 = vsel %vm970_vm1, %v1686_v20, -inf  ;;  %v1809_v52 = vrot.slane %v1808_v13, 2  ;;  %v1847_v44 = vmax.f32 %v6714_v21, %v1846_v55 }
 0x25f   : > { %v1760_v0 = vsel %vm1720_vm5, %v1716_v17, 0.0  ;;  %v2102_v32 = vpop.permute.xlu0 %2101  ;;  %v1761_v35 = vsel %vm970_vm1, %v1685_v19, -inf  ;;  %v2240_v42 = vsel %vm1043_vm2, %v7710_v31, %v2104_v47  ;;  %v1822_v9 = vrot.slane %v1821_v25, 2 }
 0x260   : > { %v1855_v45 = vsel %vm970_vm1, %v1715_v39, -inf  ;;  %v1763_v6 = vmax.f32 %v1761_v35, %v1762_v49  ;;  %v2239_v51 = vsel %vm1043_vm2, %v7711_v56, %v2102_v32  ;;  %v1857_v62 = vsel %vm970_vm1, %v1760_v0, -inf }
 0x261   : > { %v1856_v11 = vmax.f32 %v1854_v7, %v1855_v45  ;;  %v6799_v33 = vpop.f32.mrb[34].mxu0  ;;  %5104 = vmatprep.mubr.msk.f32.mxu1 %vm2258_vm3, %v2239_v51  ;;  %v1784_v60 = vmax.f32 %v1782_v27, %v1783_v59  ;;  %v1835_v36 = vrot.slane %v1834_v41, 2  ;;  %v1797_v26 = vmax.f32 %v1795_v14, %v1796_v34 }
 0x262   : > { %v6806_v22 = vpop.f32.mrb[35].mxu0  ;;  %v3319_v43 = vpop.permute.xlu1 %3318  ;;  %v1765_v63 = vmax.f32 %v1763_v6, %v1764_v1  ;;  %5105 = vmatmul.mubr.msk.f32.gmra.mrb[84].mxu1 %vm2258_vm3, %v2240_v42  ;;  %v1810_v29 = vmax.f32 %v1808_v13, %v1809_v52  ;;  %v1848_v20 = vrot.slane %v1847_v44, 2  ;;  %v1823_v16 = vmax.f32 %v1821_v25, %v1822_v9  ;;  %v7714_v6 = vld [vmem:[#allocation19_spill] sm:$0xff]  ;;  %v7715_v13 = vld [vmem:[#allocation16_spill] sm:$0xff] }
 0x263   : > { %v1858_v8 = vmax.f32 %v1856_v11, %v1857_v62  ;;  %v3455_v7 = vsel %vm2258_vm3, %v2240_v42, %v3319_v43  ;;  %v3317_v50 = vpop.permute.xlu0 %3316  ;;  %v1785_v27 = vrot.slane %v1784_v60, 1  ;;  %v1836_v49 = vmax.f32 %v1834_v41, %v1835_v36 }
 0x264   : > { %v3454_v12 = vsel %vm2258_vm3, %v2239_v51, %v3317_v50  ;;  %v1767_v3 = vmax.f32 %v1765_v63, %v1766_v18  ;;  %v1798_v5 = vrot.slane %v1797_v26, 1  ;;  %v1811_v35 = vrot.slane %v1810_v29, 1 }
 0x265   : > { %v1859_v23 = vrot.slane %v1858_v8, 4  ;;  %v6814_v10 = vpop.f32.mrb[32].mxu1  ;;  %5210 = vmatprep.mubr.msk.f32.mxu0 %vm3474_vm4, %v3454_v12  ;;  %v1849_v45 = vmax.f32 %v1847_v44, %v1848_v20  ;;  %v1824_v14 = vrot.slane %v1823_v16, 1  ;;  %v1786_v62 = vmax.f32 %v1784_v60, %v1785_v27 }
 0x266   : > { %v6818_v2 = vpop.f32.mrb[33].mxu1  ;;  %5211 = vmatmul.mubr.msk.f32.gmra.mrb[88].mxu0 %vm3474_vm4, %v3455_v7  ;;  %v2108_v58 = vpop.permute.xlu1 %2107  ;;  %v1768_v38 = vrot.slane %v1767_v3, 4  ;;  %v1837_v43 = vrot.slane %v1836_v49, 1  ;;  %v1799_v7 = vmax.f32 %v1797_v26, %v1798_v5  ;;  %v1812_v50 = vmax.f32 %v1810_v29, %v1811_v35  ;;  %v7717_v26 = vld [vmem:[#allocation20_spill] sm:$0xff]  ;;  %v7719_v5 = vld [vmem:[#allocation25_spill] sm:$0xff] }
 0x267   : > { %v1860_v53 = vmax.f32 %v1858_v8, %v1859_v23  ;;  %v2242_v15 = vsel %vm1043_vm2, %v7712_v37, %v2108_v58  ;;  %v2106_v28 = vpop.permute.xlu0 %2105  ;;  %v1850_v12 = vrot.slane %v1849_v45, 1  ;;  %v1825_v34 = vmax.f32 %v1823_v16, %v1824_v14 }
 0x268   : > { %v2241_v40 = vsel %vm1043_vm2, %v7713_v4, %v2106_v28  ;;  %v1769_v30 = vmax.f32 %v1767_v3, %v1768_v38  ;;  %v1838_v38 = vmax.f32 %v1836_v49, %v1837_v43  ;;  %v7716_v4 = vld [vmem:[#allocation21_spill] sm:$0xff] }
 0x269   : > { %5107 = vmatprep.mubr.msk.f32.mxu1 %vm2258_vm3, %v2241_v40  ;;  %v6826_v21 = vpop.f32.mrb[36].mxu0  ;;  %v1861_v19 = vrot.slane %v1860_v53, 2  ;;  %v1851_v28 = vmax.f32 %v1849_v45, %v1850_v12 }
 0x26a   : > { %5108 = vmatmul.mubr.msk.f32.gmra.mrb[86].mxu1 %vm2258_vm3, %v2242_v15  ;;  %v6829_v17 = vpop.f32.mrb[37].mxu0  ;;  %v3323_v61 = vpop.permute.xlu1 %3322  ;;  %v1770_v57 = vrot.slane %v1769_v30, 2 }
 0x26b   : > { %v3457_v39 = vsel %vm2258_vm3, %v2242_v15, %v3323_v61  ;;  %v3321_v47 = vpop.permute.xlu0 %3320  ;;  %v1862_v51 = vmax.f32 %v1860_v53, %v1861_v19 }
 0x26c   : > { %v3456_v1 = vsel %vm2258_vm3, %v2241_v40, %v3321_v47  ;;  %v1771_v0 = vmax.f32 %v1769_v30, %v1770_v57 }
 0x26d   : > { %v6833_v32 = vpop.f32.mrb[34].mxu1  ;;  %5213 = vmatprep.mubr.msk.f32.mxu0 %vm3474_vm4, %v3456_v1  ;;  %v1863_v3 = vrot.slane %v1862_v51, 1 }
 0x26e   : > { %v6836_v31 = vpop.f32.mrb[35].mxu1  ;;  %5214 = vmatmul.mubr.msk.f32.gmra.mrb[90].mxu0 %vm3474_vm4, %v3457_v39  ;;  %v2112_v42 = vpop.permute.xlu1 %2111  ;;  %v1772_v54 = vrot.slane %v1771_v0, 1 }
 0x26f   : > { %v2244_v11 = vsel %vm1043_vm2, %v7714_v6, %v2112_v42  ;;  %v2110_v56 = vpop.permute.xlu0 %2109  ;;  %v1864_v36 = vmax.f32 %v1862_v51, %v1863_v3  ;;  %v7720_v42 = vld [vmem:[#allocation22_spill] sm:$0xff] }
 0x270   : > { %v2243_v55 = vsel %vm1043_vm2, %v7715_v13, %v2110_v56  ;;  %v1773_v63 = vmax.f32 %v1771_v0, %v1772_v54 }
 0x271   : > { %5110 = vmatprep.mubr.msk.f32.mxu1 %vm2258_vm3, %v2243_v55  ;;  %v6844_v8 = vpop.f32.mrb[38].mxu0 }
 0x272   : > { %5111 = vmatmul.mubr.msk.f32.gmra.mrb[88].mxu1 %vm2258_vm3, %v2244_v11  ;;  %v6847_v18 = vpop.f32.mrb[39].mxu0  ;;  %v3327_v25 = vpop.permute.xlu1 %3326  ;;  %v4305_v23 = vsel %vm4304_vm6, %v1786_v62, %v1773_v63 }
 0x273   : > { %v3459_v59 = vsel %vm2258_vm3, %v2244_v11, %v3327_v25  ;;  %v3325_v41 = vpop.permute.xlu0 %3324  ;;  %v4307_v44 = vsel %vm4306_vm7, %v1799_v7, %v4305_v23 }
 0x274   : > { %v3458_v52 = vsel %vm2258_vm3, %v2243_v55, %v3325_v41  ;;  %v4309_v53 = vsel %vm4308_vm8, %v1812_v50, %v4307_v44 }
 0x275   : > { %v6853_v58 = vpop.f32.mrb[36].mxu1  ;;  %5216 = vmatprep.mubr.msk.f32.mxu0 %vm3474_vm4, %v3458_v52  ;;  %v4311_v9 = vsel %vm4310_vm9, %v1825_v34, %v4309_v53 }
 0x276   : > { %v6857_v37 = vpop.f32.mrb[37].mxu1  ;;  %5217 = vmatmul.mubr.msk.f32.gmra.mrb[92].mxu0 %vm3474_vm4, %v3459_v59  ;;  %v2116_v15 = vpop.permute.xlu1 %2115  ;;  %v4313_v30 = vsel %vm4312_vm10, %v1838_v38, %v4311_v9 }
 0x277   : > { %v2246_v40 = vsel %vm1043_vm2, %v7716_v4, %v2116_v15  ;;  %v2114_v60 = vpop.permute.xlu0 %2113  ;;  %v4315_v20 = vsel %vm4314_vm11, %v1851_v28, %v4313_v30 }
 0x278   : > { %v2245_v29 = vsel %vm1043_vm2, %v7717_v26, %v2114_v60  ;;  %v6871_v57 = vsel %vm4316_vm12, %v1864_v36, %v4315_v20 }
 0x279   : > { %5113 = vmatprep.mubr.msk.f32.mxu1 %vm2258_vm3, %v2245_v29  ;;  %v6868_v61 = vpop.f32.mrb[40].mxu0  ;;  %7718 = vst [vmem:[#allocation3_spill] sm:$0xff] %v6871_v57 }
 0x27a   : > { %5114 = vmatmul.mubr.msk.f32.gmra.mrb[90].mxu1 %vm2258_vm3, %v2246_v40  ;;  %v6874_v19 = vpop.f32.mrb[41].mxu0  ;;  %v3331_v39 = vpop.permute.xlu1 %3330 }
 0x27b   : > { %v3461_v47 = vsel %vm2258_vm3, %v2246_v40, %v3331_v39  ;;  %v3329_v16 = vpop.permute.xlu0 %3328 }
 0x27c   : > { %v3460_v1 = vsel %vm2258_vm3, %v2245_v29, %v3329_v16 }
 0x27d   : > { %v6878_v27 = vpop.f32.mrb[38].mxu1  ;;  %5219 = vmatprep.mubr.msk.f32.mxu0 %vm3474_vm4, %v3460_v1 }
 0x27e   : > { %v6881_v49 = vpop.f32.mrb[39].mxu1  ;;  %5220 = vmatmul.mubr.msk.f32.gmra.mrb[94].mxu0 %vm3474_vm4, %v3461_v47  ;;  %v2120_v0 = vpop.permute.xlu1 %2119 }
 0x27f   : > { %v2248_v35 = vsel %vm1043_vm2, %v7719_v5, %v2120_v0  ;;  %v2118_v45 = vpop.permute.xlu0 %2117 }
 0x280   : > { %v2247_v54 = vsel %vm1043_vm2, %v7720_v42, %v2118_v45 }
 0x281   : > { %5116 = vmatprep.mubr.msk.f32.mxu1 %vm2258_vm3, %v2247_v54  ;;  %v6889_v6 = vpop.f32.mrb[42].mxu0 }
 0x282   : > { %5117 = vmatmul.mubr.msk.f32.gmra.mrb[92].mxu1 %vm2258_vm3, %v2248_v35  ;;  %v6892_v11 = vpop.f32.mrb[43].mxu0  ;;  %v3335_v56 = vpop.permute.xlu1 %3334 }
 0x283   : > { %v3463_v51 = vsel %vm2258_vm3, %v2248_v35, %v3335_v56  ;;  %v3333_v14 = vpop.permute.xlu0 %3332 }
 0x284   : > { %v3462_v13 = vsel %vm2258_vm3, %v2247_v54, %v3333_v14  ;;  %v6981_v14 = vld [vmem:[%s7649_s2 + $0x1] ss:$0 sm:$0xff] }
 0x285   : > { %v6896_v55 = vpop.f32.mrb[40].mxu1  ;;  %5222 = vmatprep.mubr.msk.f32.mxu0 %vm3474_vm4, %v3462_v13  ;;  %v6986_v13 = vld [vmem:[%s7649_s2 + $0x2] ss:$0 sm:$0xff] }
 0x286   : > { %v6899_v62 = vpop.f32.mrb[41].mxu1  ;;  %5223 = vmatmul.mubr.msk.f32.gmra.mrb[96].mxu0 %vm3474_vm4, %v3463_v51 }
 0x289   : > { %v6902_v43 = vpop.f32.mrb[44].mxu0 }
 0x28a   : > { %v6904_v63 = vpop.f32.mrb[45].mxu0 }
 0x28d   : > { %v6906_v7 = vpop.f32.mrb[42].mxu1 }
 0x28e   : > { %v6908_v50 = vpop.f32.mrb[43].mxu1 }
 0x291   : > { %v6910_v25 = vpop.f32.mrb[46].mxu0 }
 0x292   : > { %v6912_v12 = vpop.f32.mrb[47].mxu0 }
 0x295   : > { %v6914_v59 = vpop.f32.mrb[44].mxu1 }
 0x296   : > { %v6916_v41 = vpop.f32.mrb[45].mxu1 }
 0x299   : > { %v6918_v3 = vpop.f32.mrb[48].mxu0 }
 0x29a   : > { %v6920_v23 = vpop.f32.mrb[49].mxu0 }
 0x29d   : > { %v6922_v34 = vpop.f32.mrb[46].mxu1 }
 0x29e   : > { %v6924_v52 = vpop.f32.mrb[47].mxu1 }
 0x2a1   : > { %v6926_v44 = vpop.f32.mrb[50].mxu0 }
 0x2a2   : > { %v6928_v38 = vpop.f32.mrb[51].mxu0 }
 0x2a5   : > { %v6930_v53 = vpop.f32.mrb[48].mxu1 }
 0x2a6   : > { %v6932_v15 = vpop.f32.mrb[49].mxu1 }
 0x2a9   : > { %v6934_v28 = vpop.f32.mrb[52].mxu0 }
 0x2aa   : > { %v6936_v9 = vpop.f32.mrb[53].mxu0 }
 0x2ad   : > { %v6938_v4 = vpop.f32.mrb[50].mxu1 }
 0x2ae   : > { %v6940_v40 = vpop.f32.mrb[51].mxu1 }
 0x2b1   : > { %v6942_v60 = vpop.f32.mrb[54].mxu0 }
 0x2b2   : > { %v6944_v36 = vpop.f32.mrb[55].mxu0 }
 0x2b5   : > { %v6946_v30 = vpop.f32.mrb[52].mxu1 }
 0x2b6   : > { %v6948_v26 = vpop.f32.mrb[53].mxu1 }
 0x2b7   : > { %7721 = vst [vmem:[#allocation2_spill] sm:$0xff] %v6948_v26 }
 0x2b9   : > { %v6950_v29 = vpop.f32.mrb[56].mxu0 }
 0x2ba   : > { %7722 = vst [vmem:[#allocation5_spill] sm:$0xff] %v6950_v29  ;;  %v6952_v20 = vpop.f32.mrb[57].mxu0 }
 0x2bb   : > { %7723 = vst [vmem:[#allocation4_spill] sm:$0xff] %v6952_v20 }
 0x2bd   : > { %v6954_v39 = vpop.f32.mrb[54].mxu1 }
 0x2be   : > { %7724 = vst [vmem:[#allocation7_spill] sm:$0xff] %v6954_v39  ;;  %v6956_v47 = vpop.f32.mrb[55].mxu1 }
 0x2bf   : > { %7725 = vst [vmem:[#allocation6_spill] sm:$0xff] %v6956_v47 }
 0x2c1   : > { %v6958_v16 = vpop.f32.mrb[58].mxu0 }
 0x2c2   : > { %7726 = vst [vmem:[#allocation9_spill] sm:$0xff] %v6958_v16  ;;  %v6960_v1 = vpop.f32.mrb[59].mxu0 }
 0x2c3   : > { %7727 = vst [vmem:[#allocation8_spill] sm:$0xff] %v6960_v1  ;;  %v7084_v1 = vadd.f32 %v6986_v13, %v6892_v11 }
 0x2c5   : > { %v6962_v0 = vpop.f32.mrb[56].mxu1 }
 0x2c6   : > { %7728 = vst [vmem:[#allocation17_spill] sm:$0xff] %v6962_v0  ;;  %v6964_v5 = vpop.f32.mrb[57].mxu1 }
 0x2c7   : > { %7729 = vst [vmem:[#allocation18_spill] sm:$0xff] %v6964_v5 }
 0x2c9   : > { %v6966_v35 = vpop.f32.mrb[60].mxu0 }
 0x2ca   : > { %7730 = vst [vmem:[#allocation11_spill] sm:$0xff] %v6966_v35  ;;  %v6968_v45 = vpop.f32.mrb[61].mxu0  ;;  %v7006_v35 = vadd.f32 %v6814_v10, %v6981_v14  ;;  %v7028_v10 = vadd.f32 %v6981_v14, %v6836_v31  ;;  %v7059_v31 = vadd.f32 %v6868_v61, %v6986_v13  ;;  %v7075_v61 = vadd.f32 %v6981_v14, %v6881_v49 }
 0x2cb   : > { %7731 = vst [vmem:[#allocation10_spill] sm:$0xff] %v6968_v45 }
 0x2cd   : > { %v6970_v42 = vpop.f32.mrb[58].mxu1 }
 0x2ce   : > { %7732 = vst [vmem:[#allocation23_spill] sm:$0xff] %v6970_v42  ;;  %v6972_v54 = vpop.f32.mrb[59].mxu1  ;;  %v7002_v42 = vadd.f32 %v6986_v13, %v6806_v22 }
 0x2cf   : > { %7733 = vst [vmem:[#allocation24_spill] sm:$0xff] %v6972_v54  ;;  %v2523_v54 = vadd.f32 %v6774_v48, %v6981_v14  ;;  %v7014_v48 = vadd.f32 %v6826_v21, %v6986_v13 }
 0x2d1   : > { %v6974_v56 = vpop.f32.mrb[62].mxu0 }
 0x2d2   : > { %7734 = vst [vmem:[#allocation13_spill] sm:$0xff] %v6974_v56  ;;  %v6976_v51 = vpop.f32.mrb[63].mxu0  ;;  %v6998_v56 = vadd.f32 %v6799_v33, %v6986_v13  ;;  %v7022_v33 = vadd.f32 %v6833_v32, %v6981_v14  ;;  %v7039_v32 = vadd.f32 %v6986_v13, %v6847_v18  ;;  %v7053_v18 = vadd.f32 %v6981_v14, %v6857_v37 }
 0x2d3   : > { %7735 = vst [vmem:[#allocation12_spill] sm:$0xff] %v6976_v51  ;;  %v2518_v51 = vadd.f32 %v6981_v14, %v6779_v46  ;;  %v7018_v46 = vadd.f32 %v6986_v13, %v6829_v17  ;;  %v7069_v37 = vadd.f32 %v6878_v27, %v6981_v14  ;;  %v7088_v27 = vadd.f32 %v6896_v55, %v6981_v14 }
 0x2d4   : > { %v4053_v17 = vmax.f32 %v6998_v56, 0.0  ;;  %v7065_v56 = vadd.f32 %v6986_v13, %v6874_v19 }
 0x2d5   : > { %v6988_v57 = vpop.f32.mrb[60].mxu1  ;;  %v2836_v5 = vmax.f32 %v2518_v51, 0.0 }
 0x2d6   : > { %7736 = vst [vmem:[#allocation15_spill] sm:$0xff] %v6988_v57  ;;  %v6990_v45 = vpop.f32.mrb[61].mxu1  ;;  %v2837_v57 = vmax.f32 %v2523_v54, 0.0 }
 0x2d7   : > { %7737 = vst [vmem:[#allocation14_spill] sm:$0xff] %v6990_v45  ;;  %v7010_v45 = vadd.f32 %v6981_v14, %v6818_v2  ;;  %v7032_v2 = vadd.f32 %v6844_v8, %v6986_v13  ;;  %v7046_v8 = vadd.f32 %v6853_v58, %v6981_v14 }
 0x2d9   : > { %v7024_v22 = vpop.f32.mrb[64].mxu0 }
 0x2da   : > { %7738 = vst [vmem:[#allocation19_spill] sm:$0xff] %v7024_v22  ;;  %v7034_v21 = vpop.f32.mrb[65].mxu0  ;;  %v4052_v22 = vmax.f32 %v7002_v42, 0.0 }
 0x2db   : > { %7739 = vst [vmem:[#allocation16_spill] sm:$0xff] %v7034_v21 }
 0x2dd   : > { %v5073_v51 = vpop.f32.mrb[62].mxu1 }
 0x2de   : > { %v2683_v58 = vadd.f32 %v5073_v51, %v6981_v14  ;;  %v2677_v21 = vpop.f32.mrb[63].mxu1  ;;  %v7079_v51 = vadd.f32 %v6889_v6, %v6986_v13  ;;  %v7094_v6 = vadd.f32 %v6981_v14, %v6899_v62 }
 0x2df   : > { %v2678_v42 = vadd.f32 %v6981_v14, %v2677_v21 }
 0x2e0   : > { %v2869_v54 = vmax.f32 %v2683_v58, 0.0 }
 0x2e1   : > { %v2868_v21 = vmax.f32 %v2678_v42, 0.0  ;;  %v5179_v0 = vpop.f32.mrb[66].mxu0 }
 0x2e2   : > { %v2901_v58 = vadd.f32 %v2869_v54, %v2837_v57  ;;  %v3899_v19 = vadd.f32 %v5179_v0, %v6986_v13  ;;  %v3893_v16 = vpop.f32.mrb[67].mxu0  ;;  %v7120_v57 = vadd.f32 %v6906_v7, %v6981_v14 }
 0x2e3   : > { %v2900_v55 = vadd.f32 %v2868_v21, %v2836_v5  ;;  %v3894_v42 = vadd.f32 %v6986_v13, %v3893_v16 }
 0x2e4   : > { %v2977_v49 = vsel %vm970_vm1, %v2901_v58, -inf  ;;  %v4085_v29 = vmax.f32 %v3899_v19, 0.0  ;;  %v7111_v19 = vadd.f32 %v6902_v43, %v6986_v13  ;;  %v7115_v58 = vadd.f32 %v6986_v13, %v6904_v63  ;;  %v4358_v43 = vld [vmem:[%s7650_s3 + $0x8] sm:$0xff] }
 0x2e5   : > { %v2976_v0 = vsel %vm970_vm1, %v2900_v55, -inf  ;;  %v4084_v54 = vmax.f32 %v3894_v42, 0.0  ;;  %v5076_v11 = vpop.f32.mrb[64].mxu1  ;;  %v7131_v63 = vadd.f32 %v6981_v14, %v6908_v50 }
 0x2e6   : > { %v2978_v16 = vmax.f32 %v2976_v0, %v2977_v49  ;;  %v4117_v21 = vadd.f32 %v4085_v29, %v4053_v17  ;;  %v2693_v39 = vadd.f32 %v5076_v11, %v6981_v14  ;;  %v2687_v20 = vpop.f32.mrb[65].mxu1  ;;  %v4357_v49 = vld [vmem:[%s7650_s3] sm:$0xff]  ;;  %v5304_v11 = vmov 0.0|0.0  }
 0x2e7   : > { %v4116_v55 = vadd.f32 %v4084_v54, %v4052_v22  ;;  %v2688_v42 = vadd.f32 %v6981_v14, %v2687_v20  ;;  %5260 = vmatprep.subr.bf16.mxu1 %v5304_v11  ;;  %v7137_v0 = vadd.f32 %v6910_v25, %v6986_v13  ;;  %v4063_v47 = vmax.f32 %v7111_v19, 0.0 }
 0x2e8   : > { %v4193_v29 = vsel %vm970_vm1, %v4117_v21, -inf  ;;  %v2871_v17 = vmax.f32 %v2693_v39, 0.0  ;;  %v5261_v39 = vpack.c.bf16 %v4358_v43, %v4357_v49  ;;  %v7740_v21 = vmax.f32 %v7006_v35, 0.0 }
 0x2e9   : > { %v4192_v20 = vsel %vm970_vm1, %v4116_v55, -inf  ;;  %v2870_v22 = vmax.f32 %v2688_v42, 0.0  ;;  %v5182_v7 = vpop.f32.mrb[68].mxu0  ;;  %v4062_v55 = vmax.f32 %v7115_v58, 0.0  ;;  %v7741_v42 = vmax.f32 %v7010_v45, 0.0 }
 0x2ea   : > { %v4194_v54 = vmax.f32 %v4192_v20, %v4193_v29  ;;  %v2903_v5 = vadd.f32 %v2871_v17, %v7740_v21  ;;  %v3909_v62 = vadd.f32 %v5182_v7, %v6986_v13  ;;  %v3903_v50 = vpop.f32.mrb[69].mxu0  ;;  %5262 = vmatpush3.bf16.msra.mxu1 %v5261_v39  ;;  %v7150_v29 = vadd.f32 %v6986_v13, %v6912_v12 }
 0x2eb   : > { %v2902_v26 = vadd.f32 %v2870_v22, %v7741_v42  ;;  %v3904_v49 = vadd.f32 %v6986_v13, %v3903_v50  ;;  %5263 = vmatprep.subr.bf16.mxu1 %v5304_v11  ;;  %v7158_v45 = vadd.f32 %v6914_v59, %v6981_v14  ;;  %v7742_v21 = vmax.f32 %v7014_v48, 0.0 }
 0x2ec   : > { %v2947_v35 = vsel %vm2935_vm13, %v2903_v5, 0.0  ;;  %v4087_v17 = vmax.f32 %v3909_v62, 0.0  ;;  %v7167_v42 = vadd.f32 %v6981_v14, %v6916_v41  ;;  %v7743_v43 = vmax.f32 %v7018_v46, 0.0 }
 0x2ed   : > { %v2979_v20 = vsel %vm970_vm1, %v2902_v26, -inf  ;;  %v4086_v22 = vmax.f32 %v3904_v49, 0.0  ;;  %v5079_v7 = vpop.f32.mrb[66].mxu1  ;;  %v2981_v59 = vsel %vm970_vm1, %v2947_v35, -inf  ;;  %v7181_v41 = vadd.f32 %v6918_v3, %v6986_v13 }
 0x2ee   : > { %v2980_v12 = vmax.f32 %v2978_v16, %v2979_v20  ;;  %v4119_v50 = vadd.f32 %v4087_v17, %v7742_v21  ;;  %v2703_v62 = vadd.f32 %v5079_v7, %v6981_v14  ;;  %v2697_v5 = vpop.f32.mrb[67].mxu1  ;;  %v7747_v39 = vmax.f32 %v7039_v32, 0.0 }
 0x2ef   : > { %v4118_v26 = vadd.f32 %v4086_v22, %v7743_v43  ;;  %v2698_v49 = vadd.f32 %v6981_v14, %v2697_v5  ;;  %v7186_v22 = vadd.f32 %v6986_v13, %v6920_v23  ;;  %v4359_v23 = vld [vmem:[%s7650_s3 + $0x10] sm:$0xff] }
 0x2f0   : > { %v7174_v16 = vmax.f32 %v2980_v12, %v2981_v59  ;;  %v4163_v48 = vsel %vm4151_vm14, %v4119_v50, 0.0  ;;  %v2873_v17 = vmax.f32 %v2703_v62, 0.0  ;;  %v7744_v12 = vmax.f32 %v7022_v33, 0.0  ;;  %v4360_v33 = vld [vmem:[%s7650_s3 + $0x18] sm:$0xff] }
 0x2f1   : > { %v4195_v35 = vsel %vm970_vm1, %v4118_v26, -inf  ;;  %v2872_v46 = vmax.f32 %v2698_v49, 0.0  ;;  %v5185_v43 = vpop.f32.mrb[70].mxu0  ;;  %v4197_v3 = vsel %vm970_vm1, %v4163_v48, -inf  ;;  %v7745_v59 = vmax.f32 %v7028_v10, 0.0  ;;  %v4361_v10 = vld [vmem:[%s7650_s3 + $0x20] sm:$0xff] }
 0x2f2   : > { %v4196_v7 = vmax.f32 %v4194_v54, %v4195_v35  ;;  %v2905_v21 = vadd.f32 %v2873_v17, %v7744_v12  ;;  %v3919_v50 = vadd.f32 %v5185_v43, %v6986_v13  ;;  %v3913_v62 = vpop.f32.mrb[71].mxu0  ;;  %v7204_v54 = vadd.f32 %v6922_v34, %v6981_v14 }
 0x2f3   : > { %v2904_v26 = vadd.f32 %v2872_v46, %v7745_v59  ;;  %v3914_v49 = vadd.f32 %v6986_v13, %v3913_v62  ;;  %v4362_v46 = vld [vmem:[%s7650_s3 + $0x28] sm:$0xff]  ;;  %v5264_v34 = vpack.c.bf16 %v4360_v33, %v4359_v23  ;;  %v2983_v32 = vrot.slane %v7174_v16, 4 }
 0x2f4   : > { %v4198_v17 = vmax.f32 %v4196_v7, %v4197_v3  ;;  %v2990_v48 = vsel %vm970_vm1, %v2905_v21, -inf  ;;  %v4089_v35 = vmax.f32 %v3919_v50, 0.0  ;;  %v4066_v7 = vmax.f32 %v7186_v22, 0.0 }
 0x2f5   : > { %v2989_v12 = vsel %vm970_vm1, %v2904_v26, -inf  ;;  %v4088_v62 = vmax.f32 %v3914_v49, 0.0  ;;  %v5082_v59 = vpop.f32.mrb[68].mxu1  ;;  %v7218_v21 = vadd.f32 %v6981_v14, %v6924_v52  ;;  %v7746_v3 = vmax.f32 %v7032_v2, 0.0  ;;  %5265 = vmatpush3.bf16.msra.mxu1 %v5264_v34 }
 0x2f6   : > { %v2991_v50 = vmax.f32 %v2989_v12, %v2990_v48  ;;  %v2707_v20 = vpop.f32.mrb[69].mxu1  ;;  %v2713_v43 = vadd.f32 %v5082_v59, %v6981_v14  ;;  %v5267_v49 = vpack.c.bf16 %v4362_v46, %v4361_v10  ;;  %v2853_v23 = vmax.f32 %v7204_v54, 0.0  ;;  %5266 = vmatprep.subr.bf16.mxu1 %v5304_v11 }
 0x2f7   : > { %v4121_v5 = vadd.f32 %v4089_v35, %v7746_v3  ;;  %v4120_v25 = vadd.f32 %v4088_v62, %v7747_v39  ;;  %v2708_v26 = vadd.f32 %v6981_v14, %v2707_v20  ;;  %v7229_v52 = vadd.f32 %v6926_v44, %v6986_v13 }
 0x2f8   : > { %v7233_v2 = vadd.f32 %v6986_v13, %v6928_v38  ;;  %v2875_v20 = vmax.f32 %v2713_v43, 0.0  ;;  %v7241_v10 = vadd.f32 %v6930_v53, %v6981_v14  ;;  %v7245_v44 = vadd.f32 %v6981_v14, %v6932_v15 }
 0x2f9   : > { %v4206_v33 = vsel %vm970_vm1, %v4121_v5, -inf  ;;  %v4205_v39 = vsel %vm970_vm1, %v4120_v25, -inf  ;;  %v2874_v48 = vmax.f32 %v2708_v26, 0.0  ;;  %v5188_v35 = vpop.f32.mrb[72].mxu0  ;;  %v2852_v11 = vmax.f32 %v7218_v21, 0.0  ;;  %5268 = vmatpush3.bf16.msra.mxu1 %v5267_v49 }
 0x2fa   : > { %v4207_v38 = vmax.f32 %v4205_v39, %v4206_v33  ;;  %v3929_v5 = vadd.f32 %v5188_v35, %v6986_v13  ;;  %v3923_v46 = vpop.f32.mrb[73].mxu0  ;;  %v7748_v12 = vmax.f32 %v7046_v8, 0.0  ;;  %v7749_v43 = vmax.f32 %v7053_v18, 0.0 }
 0x2fb   : > { %v3924_v59 = vadd.f32 %v6986_v13, %v3923_v46  ;;  %v4199_v34 = vrot.slane %v4198_v17, 4  ;;  %v2984_v26 = vmax.f32 %v7174_v16, %v2983_v32  ;;  %v7750_v35 = vmax.f32 %v7059_v31, 0.0 }
 0x2fc   : > { %v2907_v25 = vadd.f32 %v2875_v20, %v7748_v12  ;;  %v2906_v62 = vadd.f32 %v2874_v48, %v7749_v43  ;;  %v4091_v3 = vmax.f32 %v3929_v5, 0.0  ;;  %v7751_v16 = vmax.f32 %v7065_v56, 0.0 }
 0x2fd   : > { %v4090_v39 = vmax.f32 %v3924_v59, 0.0  ;;  %v5085_v20 = vpop.f32.mrb[70].mxu1  ;;  %v4200_v59 = vmax.f32 %v4198_v17, %v4199_v34  ;;  %v7752_v34 = vmax.f32 %v7069_v37, 0.0 }
 0x2fe   : > { %v2951_v33 = vsel %vm2935_vm13, %v2907_v25, 0.0  ;;  %v2992_v8 = vsel %vm970_vm1, %v2906_v62, -inf  ;;  %v4123_v46 = vadd.f32 %v4091_v3, %v7750_v35  ;;  %v2717_v12 = vpop.f32.mrb[71].mxu1  ;;  %v2723_v25 = vadd.f32 %v5085_v20, %v6981_v14 }
 0x2ff   : > { %v2993_v49 = vmax.f32 %v2991_v50, %v2992_v8  ;;  %v2994_v5 = vsel %vm970_vm1, %v2951_v33, -inf  ;;  %v4122_v32 = vadd.f32 %v4090_v39, %v7751_v16  ;;  %v2718_v43 = vadd.f32 %v6981_v14, %v2717_v12 }
 0x300   : > { %v7271_v62 = vadd.f32 %v6934_v28, %v6986_v13  ;;  %v4167_v31 = vsel %vm4151_vm14, %v4123_v46, 0.0  ;;  %v2985_v50 = vrot.slane %v2984_v26, 2  ;;  %v2877_v33 = vmax.f32 %v2723_v25, 0.0 }
 0x301   : > { %v2995_v48 = vmax.f32 %v2993_v49, %v2994_v5  ;;  %v4208_v3 = vsel %vm970_vm1, %v4122_v32, -inf  ;;  %v2876_v8 = vmax.f32 %v2718_v43, 0.0  ;;  %v5191_v56 = vpop.f32.mrb[74].mxu0  ;;  %v7278_v39 = vadd.f32 %v6986_v13, %v6936_v9 }
 0x302   : > { %v4209_v35 = vmax.f32 %v4207_v38, %v4208_v3  ;;  %v3939_v28 = vadd.f32 %v5191_v56, %v6986_v13  ;;  %v3933_v12 = vpop.f32.mrb[75].mxu0  ;;  %v4210_v17 = vsel %vm970_vm1, %v4167_v31, -inf  ;;  %v2909_v49 = vadd.f32 %v2877_v33, %v7752_v34 }
 0x303   : > { %v2996_v20 = vrot.slane %v2995_v48, 4  ;;  %v7753_v46 = vmax.f32 %v7075_v61, 0.0  ;;  %v3934_v16 = vadd.f32 %v6986_v13, %v3933_v12  ;;  %v4201_v32 = vrot.slane %v4200_v59, 2 }
 0x304   : > { %v4211_v43 = vmax.f32 %v4209_v35, %v4210_v17  ;;  %v4093_v9 = vmax.f32 %v3939_v28, 0.0  ;;  %v2986_v18 = vmax.f32 %v2984_v26, %v2985_v50  ;;  %v3003_v38 = vsel %vm970_vm1, %v2909_v49, -inf }
 0x305   : > { %v2908_v5 = vadd.f32 %v2876_v8, %v7753_v46  ;;  %v2997_v25 = vmax.f32 %v2995_v48, %v2996_v20  ;;  %v4092_v56 = vmax.f32 %v3934_v16, 0.0  ;;  %v5088_v15 = vpop.f32.mrb[72].mxu1  ;;  %v7754_v33 = vmax.f32 %v7079_v51, 0.0 }
 0x306   : > { %v4212_v53 = vrot.slane %v4211_v43, 4  ;;  %v2727_v8 = vpop.f32.mrb[73].mxu1  ;;  %v4071_v12 = vmax.f32 %v7271_v62, 0.0  ;;  %v7755_v48 = vmax.f32 %v7084_v1, 0.0  ;;  %v2733_v26 = vadd.f32 %v5088_v15, %v6981_v14 }
 0x307   : > { %v3002_v3 = vsel %vm970_vm1, %v2908_v5, -inf  ;;  %v2998_v31 = vrot.slane %v2997_v25, 2  ;;  %v4125_v61 = vadd.f32 %v4093_v9, %v7754_v33  ;;  %v2728_v50 = vadd.f32 %v6981_v14, %v2727_v8 }
 0x308   : > { %v3004_v37 = vmax.f32 %v3002_v3, %v3003_v38  ;;  %v4124_v20 = vadd.f32 %v4092_v56, %v7755_v48  ;;  %v4202_v35 = vmax.f32 %v4200_v59, %v4201_v32  ;;  %v4213_v17 = vmax.f32 %v4211_v43, %v4212_v53 }
 0x309   : > { %v2999_v28 = vmax.f32 %v2997_v25, %v2998_v31  ;;  %v4219_v34 = vsel %vm970_vm1, %v4125_v61, -inf  ;;  %v2987_v49 = vrot.slane %v2986_v18, 1  ;;  %v2879_v51 = vmax.f32 %v2733_v26, 0.0  ;;  %v5194_v16 = vpop.f32.mrb[76].mxu0 }
 0x30a   : > { %v4218_v46 = vsel %vm970_vm1, %v4124_v20, -inf  ;;  %v2878_v5 = vmax.f32 %v2728_v50, 0.0  ;;  %v4214_v38 = vrot.slane %v4213_v17, 2  ;;  %v3949_v1 = vadd.f32 %v5194_v16, %v6986_v13  ;;  %v3943_v56 = vpop.f32.mrb[77].mxu0 }
 0x30b   : > { %v3000_v9 = vrot.slane %v2999_v28, 1  ;;  %v4220_v3 = vmax.f32 %v4218_v46, %v4219_v34  ;;  %v4070_v15 = vmax.f32 %v7278_v39, 0.0  ;;  %v7756_v59 = vmax.f32 %v7088_v27, 0.0 }
 0x30c   : > { %v7757_v53 = vmax.f32 %v7094_v6, 0.0  ;;  %v3944_v43 = vadd.f32 %v6986_v13, %v3943_v56  ;;  %v4203_v31 = vrot.slane %v4202_v35, 1  ;;  %v4215_v61 = vmax.f32 %v4213_v17, %v4214_v38 }
 0x30d   : > { %v2911_v32 = vadd.f32 %v2879_v51, %v7756_v59  ;;  %v3001_v33 = vmax.f32 %v2999_v28, %v3000_v9  ;;  %v4095_v8 = vmax.f32 %v3949_v1, 0.0  ;;  %v2988_v48 = vmax.f32 %v2986_v18, %v2987_v49  ;;  %v5091_v34 = vpop.f32.mrb[74].mxu1 }
 0x30e   : > { %v2910_v25 = vadd.f32 %v2878_v5, %v7757_v53  ;;  %v4094_v50 = vmax.f32 %v3944_v43, 0.0  ;;  %v4216_v46 = vrot.slane %v4215_v61, 1  ;;  %v2737_v5 = vpop.f32.mrb[75].mxu1  ;;  %v2743_v18 = vadd.f32 %v5091_v34, %v6981_v14 }
 0x30f   : > { %v2955_v20 = vsel %vm2935_vm13, %v2911_v32, 0.0  ;;  %v4127_v6 = vadd.f32 %v4095_v8, %v4063_v47  ;;  %v2738_v17 = vadd.f32 %v6981_v14, %v2737_v5  ;;  %v7316_v49 = vsel %vm4304_vm6, %v3001_v33, %v2988_v48 }
 0x310   : > { %v3005_v26 = vsel %vm970_vm1, %v2910_v25, -inf  ;;  %v3007_v27 = vsel %vm970_vm1, %v2955_v20, -inf  ;;  %v4126_v28 = vadd.f32 %v4094_v50, %v4062_v55  ;;  %v4204_v16 = vmax.f32 %v4202_v35, %v4203_v31 }
 0x311   : > { %v3006_v51 = vmax.f32 %v3004_v37, %v3005_v26  ;;  %v4217_v9 = vmax.f32 %v4215_v61, %v4216_v46  ;;  %v4171_v37 = vsel %vm4151_vm14, %v4127_v6, 0.0  ;;  %v7322_v47 = vadd.f32 %v6938_v4, %v6981_v14  ;;  %v5197_v1 = vpop.f32.mrb[78].mxu0 }
 0x312   : > { %v4221_v19 = vsel %vm970_vm1, %v4126_v28, -inf  ;;  %v2881_v58 = vmax.f32 %v2743_v18, 0.0  ;;  %v2880_v55 = vmax.f32 %v2738_v17, 0.0  ;;  %v3959_v32 = vadd.f32 %v5197_v1, %v6986_v13  ;;  %v3953_v53 = vpop.f32.mrb[79].mxu0 }
 0x313   : > { %v3008_v38 = vmax.f32 %v3006_v51, %v3007_v27  ;;  %v4222_v59 = vmax.f32 %v4220_v3, %v4221_v19  ;;  %v7327_v35 = vsel %vm4304_vm6, %v4217_v9, %v4204_v16  ;;  %v4223_v25 = vsel %vm970_vm1, %v4171_v37, -inf }
 0x314   : > { %v7758_v43 = vmax.f32 %v7120_v57, 0.0  ;;  %v7759_v4 = vmax.f32 %v7131_v63, 0.0  ;;  %v3954_v61 = vadd.f32 %v6986_v13, %v3953_v53  ;;  %v7337_v8 = vadd.f32 %v6981_v14, %v6940_v40 }
 0x315   : > { %v3009_v56 = vrot.slane %v3008_v38, 4  ;;  %v4224_v48 = vmax.f32 %v4222_v59, %v4223_v25  ;;  %v4097_v20 = vmax.f32 %v3959_v32, 0.0  ;;  %v2857_v26 = vmax.f32 %v7322_v47, 0.0  ;;  %v5094_v46 = vpop.f32.mrb[76].mxu1 }
 0x316   : > { %v2913_v31 = vadd.f32 %v2881_v58, %v7758_v43  ;;  %v2912_v33 = vadd.f32 %v2880_v55, %v7759_v4  ;;  %v4096_v57 = vmax.f32 %v3954_v61, 0.0  ;;  %v7760_v6 = vmax.f32 %v7137_v0, 0.0  ;;  %v2747_v28 = vpop.f32.mrb[77].mxu1 }
 0x317   : > { %v3010_v3 = vmax.f32 %v3008_v38, %v3009_v56  ;;  %v4225_v63 = vrot.slane %v4224_v48, 4  ;;  %v7346_v40 = vadd.f32 %v6942_v60, %v6986_v13  ;;  %v7761_v18 = vmax.f32 %v7150_v29, 0.0 }
 0x318   : > { %v3016_v50 = vsel %vm970_vm1, %v2913_v31, -inf  ;;  %v3015_v34 = vsel %vm970_vm1, %v2912_v33, -inf  ;;  %v4129_v5 = vadd.f32 %v4097_v20, %v7760_v6  ;;  %v2753_v16 = vadd.f32 %v5094_v46, %v6981_v14 }
 0x319   : > { %v3011_v27 = vrot.slane %v3010_v3, 2  ;;  %v3017_v51 = vmax.f32 %v3015_v34, %v3016_v50  ;;  %v4128_v17 = vadd.f32 %v4096_v57, %v7761_v18  ;;  %v2748_v9 = vadd.f32 %v6981_v14, %v2747_v28  ;;  %v5200_v29 = vpop.f32.mrb[80].mxu0 }
 0x31a   : > { %v7354_v38 = vadd.f32 %v6986_v13, %v6944_v36  ;;  %v4226_v19 = vmax.f32 %v4224_v48, %v4225_v63  ;;  %v4232_v0 = vsel %vm970_vm1, %v4129_v5, -inf  ;;  %v2856_v58 = vmax.f32 %v7337_v8, 0.0  ;;  %v3963_v25 = vpop.f32.mrb[81].mxu0 }
 0x31b   : > { %v3012_v37 = vmax.f32 %v3010_v3, %v3011_v27  ;;  %v4231_v60 = vsel %vm970_vm1, %v4128_v17, -inf  ;;  %v2883_v55 = vmax.f32 %v2753_v16, 0.0  ;;  %v2882_v1 = vmax.f32 %v2748_v9, 0.0 }
 0x31c   : > { %v4227_v59 = vrot.slane %v4226_v19, 2  ;;  %v4233_v32 = vmax.f32 %v4231_v60, %v4232_v0  ;;  %v3969_v53 = vadd.f32 %v5200_v29, %v6986_v13  ;;  %v4073_v36 = vmax.f32 %v7346_v40, 0.0 }
 0x31d   : > { %v3013_v56 = vrot.slane %v3012_v37, 1  ;;  %v7762_v43 = vmax.f32 %v7158_v45, 0.0  ;;  %v7763_v4 = vmax.f32 %v7167_v42, 0.0  ;;  %v3964_v61 = vadd.f32 %v6986_v13, %v3963_v25  ;;  %v5097_v27 = vpop.f32.mrb[78].mxu1 }
 0x31e   : > { %v4072_v3 = vmax.f32 %v7354_v38, 0.0  ;;  %v4228_v20 = vmax.f32 %v4226_v19, %v4227_v59  ;;  %v4099_v50 = vmax.f32 %v3969_v53, 0.0  ;;  %v7369_v34 = vadd.f32 %v6946_v30, %v6981_v14  ;;  %v2757_v18 = vpop.f32.mrb[79].mxu1 }
 0x31f   : > { %v2915_v31 = vadd.f32 %v2883_v55, %v7762_v43  ;;  %v2914_v33 = vadd.f32 %v2882_v1, %v7763_v4  ;;  %v3014_v48 = vmax.f32 %v3012_v37, %v3013_v56  ;;  %v4098_v46 = vmax.f32 %v3964_v61, 0.0  ;;  %v7765_v37 = vld [vmem:[#allocation2_spill] sm:$0xff] }
 0x320   : > { %v4229_v42 = vrot.slane %v4228_v20, 1  ;;  %v7764_v5 = vmax.f32 %v7181_v41, 0.0  ;;  %v2763_v30 = vadd.f32 %v5097_v27, %v6981_v14  ;;  %v2758_v16 = vadd.f32 %v6981_v14, %v2757_v18 }
 0x321   : > { %v2959_v57 = vsel %vm2935_vm13, %v2915_v31, 0.0  ;;  %v3018_v45 = vsel %vm970_vm1, %v2914_v33, -inf  ;;  %v4130_v17 = vadd.f32 %v4098_v46, %v4066_v7  ;;  %v7383_v9 = vsel %vm4306_vm7, %v3014_v48, %v7316_v49  ;;  %v5203_v1 = vpop.f32.mrb[82].mxu0  ;;  %v7766_v33 = vld [vmem:[#allocation5_spill] sm:$0xff] }
 0x322   : > { %v3020_v63 = vsel %vm970_vm1, %v2959_v57, -inf  ;;  %v3019_v6 = vmax.f32 %v3017_v51, %v3018_v45  ;;  %v4131_v28 = vadd.f32 %v4099_v50, %v7764_v5  ;;  %v7387_v19 = vadd.f32 %v6981_v14, %v7765_v37  ;;  %v3973_v59 = vpop.f32.mrb[83].mxu0 }
 0x323   : > { %v4230_v51 = vmax.f32 %v4228_v20, %v4229_v42  ;;  %v2859_v22 = vmax.f32 %v7369_v34, 0.0  ;;  %v4234_v7 = vsel %vm970_vm1, %v4130_v17, -inf  ;;  %v2885_v60 = vmax.f32 %v2763_v30, 0.0 }
 0x324   : > { %v3021_v0 = vmax.f32 %v3019_v6, %v3020_v63  ;;  %v4175_v41 = vsel %vm4151_vm14, %v4131_v28, 0.0  ;;  %v2884_v55 = vmax.f32 %v2758_v16, 0.0  ;;  %v4235_v56 = vmax.f32 %v4233_v32, %v4234_v7  ;;  %v7768_v63 = vld [vmem:[#allocation4_spill] sm:$0xff] }
 0x325   : > { %v3979_v49 = vadd.f32 %v5203_v1, %v6986_v13  ;;  %v7396_v53 = vsel %vm4306_vm7, %v4230_v51, %v7327_v35  ;;  %v4236_v25 = vsel %vm970_vm1, %v4175_v41, -inf  ;;  %v2917_v43 = vadd.f32 %v2885_v60, %v2853_v23  ;;  %v5100_v23 = vpop.f32.mrb[80].mxu1 }
 0x326   : > { %v3022_v29 = vrot.slane %v3021_v0, 4  ;;  %v2916_v31 = vadd.f32 %v2884_v55, %v2852_v11  ;;  %v3974_v4 = vadd.f32 %v6986_v13, %v3973_v59  ;;  %v7406_v32 = vadd.f32 %v7766_v33, %v6986_v13  ;;  %v2767_v42 = vpop.f32.mrb[81].mxu1 }
 0x327   : > { %v4237_v48 = vmax.f32 %v4235_v56, %v4236_v25  ;;  %v4101_v20 = vmax.f32 %v3979_v49, 0.0  ;;  %v2858_v35 = vmax.f32 %v7387_v19, 0.0  ;;  %v3029_v50 = vsel %vm970_vm1, %v2917_v43, -inf }
 0x328   : > { %v3023_v61 = vmax.f32 %v3021_v0, %v3022_v29  ;;  %v3028_v57 = vsel %vm970_vm1, %v2916_v31, -inf  ;;  %v4100_v54 = vmax.f32 %v3974_v4, 0.0  ;;  %v7767_v46 = vmax.f32 %v7229_v52, 0.0  ;;  %v7770_v52 = vld [vmem:[#allocation7_spill] sm:$0xff] }
 0x329   : > { %v4238_v21 = vrot.slane %v4237_v48, 4  ;;  %v3030_v11 = vmax.f32 %v3028_v57, %v3029_v50  ;;  %v7415_v6 = vadd.f32 %v6986_v13, %v7768_v63  ;;  %v7769_v5 = vmax.f32 %v7233_v2, 0.0  ;;  %v5206_v2 = vpop.f32.mrb[84].mxu0 }
 0x32a   : > { %v3024_v45 = vrot.slane %v3023_v61, 2  ;;  %v4133_v27 = vadd.f32 %v4101_v20, %v7767_v46  ;;  %v2773_v18 = vadd.f32 %v5100_v23, %v6981_v14  ;;  %v2768_v17 = vadd.f32 %v6981_v14, %v2767_v42  ;;  %v3983_v49 = vpop.f32.mrb[85].mxu0 }
 0x32b   : > { %v4132_v28 = vadd.f32 %v4100_v54, %v7769_v5  ;;  %v4075_v30 = vmax.f32 %v7406_v32, 0.0  ;;  %v4239_v37 = vmax.f32 %v4237_v48, %v4238_v21  ;;  %v7425_v0 = vadd.f32 %v7770_v52, %v6981_v14 }
 0x32c   : > { %v3025_v16 = vmax.f32 %v3023_v61, %v3024_v45  ;;  %v4245_v51 = vsel %vm970_vm1, %v4133_v27, -inf  ;;  %v2887_v7 = vmax.f32 %v2773_v18, 0.0  ;;  %v2886_v60 = vmax.f32 %v2768_v17, 0.0  ;;  %v7773_v61 = vld [vmem:[#allocation6_spill] sm:$0xff] }
 0x32d   : > { %v4244_v41 = vsel %vm970_vm1, %v4132_v28, -inf  ;;  %v4240_v1 = vrot.slane %v4239_v37, 2  ;;  %v3989_v56 = vadd.f32 %v5206_v2, %v6986_v13  ;;  %v4074_v59 = vmax.f32 %v7415_v6, 0.0  ;;  %v5103_v21 = vpop.f32.mrb[82].mxu1 }
 0x32e   : > { %v3026_v55 = vrot.slane %v3025_v16, 1  ;;  %v4246_v29 = vmax.f32 %v4244_v41, %v4245_v51  ;;  %v7771_v25 = vmax.f32 %v7241_v10, 0.0  ;;  %v7772_v31 = vmax.f32 %v7245_v44, 0.0  ;;  %v2777_v63 = vpop.f32.mrb[83].mxu1 }
 0x32f   : > { %v3984_v33 = vadd.f32 %v6986_v13, %v3983_v49  ;;  %v7437_v48 = vadd.f32 %v6981_v14, %v7773_v61  ;;  %v4241_v50 = vmax.f32 %v4239_v37, %v4240_v1  ;;  %v4103_v57 = vmax.f32 %v3989_v56, 0.0 }
 0x330   : > { %v2919_v43 = vadd.f32 %v2887_v7, %v7771_v25  ;;  %v2918_v4 = vadd.f32 %v2886_v60, %v7772_v31  ;;  %v3027_v20 = vmax.f32 %v3025_v16, %v3026_v55  ;;  %v2861_v54 = vmax.f32 %v7425_v0, 0.0 }
 0x331   : > { %v4102_v45 = vmax.f32 %v3984_v33, 0.0  ;;  %v4242_v44 = vrot.slane %v4241_v50, 1  ;;  %v4135_v42 = vadd.f32 %v4103_v57, %v4071_v12  ;;  %v2783_v28 = vadd.f32 %v5103_v21, %v6981_v14  ;;  %v7774_v12 = vld [vmem:[#allocation9_spill] sm:$0xff]  ;;  %v5209_v41 = vpop.f32.mrb[86].mxu0 }
 0x332   : > { %v2963_v23 = vsel %vm2935_vm13, %v2919_v43, 0.0  ;;  %v3031_v10 = vsel %vm970_vm1, %v2918_v4, -inf  ;;  %v2778_v18 = vadd.f32 %v6981_v14, %v2777_v63  ;;  %v7452_v17 = vsel %vm4308_vm8, %v3027_v20, %v7383_v9  ;;  %v3993_v2 = vpop.f32.mrb[87].mxu0  ;;  %v7775_v43 = vld [vmem:[#allocation8_spill] sm:$0xff] }
 0x333   : > { %v3033_v46 = vsel %vm970_vm1, %v2963_v23, -inf  ;;  %v3032_v27 = vmax.f32 %v3030_v11, %v3031_v10  ;;  %v4134_v5 = vadd.f32 %v4102_v45, %v4070_v15  ;;  %v2860_v16 = vmax.f32 %v7437_v48, 0.0  ;;  %v7776_v23 = vld [vmem:[#allocation17_spill] sm:$0xff]  ;;  %v7777_v45 = vld [vmem:[#allocation18_spill] sm:$0xff] }
 0x334   : > { %v4243_v37 = vmax.f32 %v4241_v50, %v4242_v44  ;;  %v4179_v62 = vsel %vm4151_vm14, %v4135_v42, 0.0  ;;  %v7459_v11 = vadd.f32 %v7774_v12, %v6986_v13  ;;  %v2889_v15 = vmax.f32 %v2783_v28, 0.0  ;;  %v7778_v28 = vld [vmem:[#allocation11_spill] sm:$0xff] }
 0x335   : > { %v3034_v51 = vmax.f32 %v3032_v27, %v3033_v46  ;;  %v4247_v39 = vsel %vm970_vm1, %v4134_v5, -inf  ;;  %v2888_v52 = vmax.f32 %v2778_v18, 0.0  ;;  %v3999_v9 = vadd.f32 %v5209_v41, %v6986_v13  ;;  %v5106_v57 = vpop.f32.mrb[84].mxu1 }
 0x336   : > { %v4248_v60 = vmax.f32 %v4246_v29, %v4247_v39  ;;  %v7465_v55 = vsel %vm4308_vm8, %v4243_v37, %v7396_v53  ;;  %v4249_v1 = vsel %vm970_vm1, %v4179_v62, -inf  ;;  %v2921_v56 = vadd.f32 %v2889_v15, %v2857_v26  ;;  %v2787_v27 = vpop.f32.mrb[85].mxu1 }
 0x337   : > { %v3035_v7 = vrot.slane %v3034_v51, 4  ;;  %v2920_v49 = vadd.f32 %v2888_v52, %v2856_v58  ;;  %v3994_v25 = vadd.f32 %v6986_v13, %v3993_v2  ;;  %v7475_v29 = vadd.f32 %v6986_v13, %v7775_v43 }
 0x338   : > { %v4250_v4 = vmax.f32 %v4248_v60, %v4249_v1  ;;  %v4105_v33 = vmax.f32 %v3999_v9, 0.0  ;;  %v4077_v53 = vmax.f32 %v7459_v11, 0.0  ;;  %v3042_v61 = vsel %vm970_vm1, %v2921_v56, -inf }
 0x339   : > { %v3036_v31 = vmax.f32 %v3034_v51, %v3035_v7  ;;  %v3041_v20 = vsel %vm970_vm1, %v2920_v49, -inf  ;;  %v4104_v47 = vmax.f32 %v3994_v25, 0.0  ;;  %v7484_v10 = vadd.f32 %v7776_v23, %v6981_v14  ;;  %v5212_v38 = vpop.f32.mrb[88].mxu0  ;;  %v7779_v49 = vld [vmem:[#allocation10_spill] sm:$0xff] }
 0x33a   : > { %v4251_v50 = vrot.slane %v4250_v4, 4  ;;  %v3043_v8 = vmax.f32 %v3041_v20, %v3042_v61  ;;  %v4137_v58 = vadd.f32 %v4105_v33, %v4073_v36  ;;  %v7488_v21 = vadd.f32 %v6981_v14, %v7777_v45  ;;  %v4003_v15 = vpop.f32.mrb[89].mxu0 }
 0x33b   : > { %v3037_v26 = vrot.slane %v3036_v31, 2  ;;  %v4136_v44 = vadd.f32 %v4104_v47, %v4072_v3  ;;  %v2793_v46 = vadd.f32 %v5106_v57, %v6981_v14  ;;  %v2788_v36 = vadd.f32 %v6981_v14, %v2787_v27 }
 0x33c   : > { %v4252_v63 = vmax.f32 %v4250_v4, %v4251_v50  ;;  %v4258_v40 = vsel %vm970_vm1, %v4137_v58, -inf  ;;  %v4076_v5 = vmax.f32 %v7475_v29, 0.0  ;;  %v7498_v18 = vadd.f32 %v7778_v28, %v6986_v13 }
 0x33d   : > { %v3038_v42 = vmax.f32 %v3036_v31, %v3037_v26  ;;  %v4257_v37 = vsel %vm970_vm1, %v4136_v44, -inf  ;;  %v2891_v51 = vmax.f32 %v2793_v46, 0.0  ;;  %v2890_v39 = vmax.f32 %v2788_v36, 0.0  ;;  %v5109_v31 = vpop.f32.mrb[86].mxu1 }
 0x33e   : > { %v4253_v62 = vrot.slane %v4252_v63, 2  ;;  %v4259_v12 = vmax.f32 %v4257_v37, %v4258_v40  ;;  %v2863_v52 = vmax.f32 %v7484_v10, 0.0  ;;  %v4009_v7 = vadd.f32 %v5212_v38, %v6986_v13  ;;  %v2797_v47 = vpop.f32.mrb[87].mxu1  ;;  %v7780_v37 = vld [vmem:[#allocation23_spill] sm:$0xff] }
 0x33f   : > { %v3039_v3 = vrot.slane %v3038_v42, 1  ;;  %v2923_v41 = vadd.f32 %v2891_v51, %v2859_v22  ;;  %v4004_v60 = vadd.f32 %v6986_v13, %v4003_v15  ;;  %v2862_v9 = vmax.f32 %v7488_v21, 0.0 }
 0x340   : > { %v4254_v1 = vmax.f32 %v4252_v63, %v4253_v62  ;;  %v2922_v56 = vadd.f32 %v2890_v39, %v2858_v35  ;;  %v7511_v25 = vadd.f32 %v6986_v13, %v7779_v49  ;;  %v4107_v34 = vmax.f32 %v4009_v7, 0.0  ;;  %v7781_v7 = vld [vmem:[#allocation24_spill] sm:$0xff] }
 0x341   : > { %v3040_v2 = vmax.f32 %v3038_v42, %v3039_v3  ;;  %v2967_v43 = vsel %vm2935_vm13, %v2923_v41, 0.0  ;;  %v4106_v22 = vmax.f32 %v4004_v60, 0.0  ;;  %v4079_v4 = vmax.f32 %v7498_v18, 0.0  ;;  %v5215_v46 = vpop.f32.mrb[90].mxu0  ;;  %v7784_v18 = vld [vmem:[#allocation15_spill] sm:$0xff] }
 0x342   : > { %v4255_v33 = vrot.slane %v4254_v1, 1  ;;  %v3044_v61 = vsel %vm970_vm1, %v2922_v56, -inf  ;;  %v2803_v20 = vadd.f32 %v5109_v31, %v6981_v14  ;;  %v4139_v35 = vadd.f32 %v4107_v34, %v4075_v30  ;;  %v4013_v63 = vpop.f32.mrb[91].mxu0  ;;  %v7782_v34 = vld [vmem:[#allocation13_spill] sm:$0xff] }
 0x343   : > { %v3045_v19 = vmax.f32 %v3043_v8, %v3044_v61  ;;  %v4138_v26 = vadd.f32 %v4106_v22, %v4074_v59  ;;  %v2798_v50 = vadd.f32 %v6981_v14, %v2797_v47  ;;  %v3046_v57 = vsel %vm970_vm1, %v2967_v43, -inf  ;;  %v7567_v43 = vld [vmem:[%s7649_s2 + $0x2] ss:$0 sm:$0xff] }
 0x344   : > { %v4256_v58 = vmax.f32 %v4254_v1, %v4255_v33  ;;  %v2893_v23 = vmax.f32 %v2803_v20, 0.0  ;;  %v7526_v45 = vsel %vm4310_vm9, %v3040_v2, %v7452_v17  ;;  %v4183_v8 = vsel %vm4151_vm14, %v4139_v35, 0.0 }
 0x345   : > { %v3047_v44 = vmax.f32 %v3045_v19, %v3046_v57  ;;  %v4260_v32 = vsel %vm970_vm1, %v4138_v26, -inf  ;;  %v2892_v30 = vmax.f32 %v2798_v50, 0.0  ;;  %v4262_v6 = vsel %vm970_vm1, %v4183_v8, -inf }
 0x346   : > { %v4261_v59 = vmax.f32 %v4259_v12, %v4260_v32  ;;  %v2925_v27 = vadd.f32 %v2893_v23, %v2861_v54  ;;  %v4019_v42 = vadd.f32 %v5215_v46, %v6986_v13  ;;  %v4014_v36 = vadd.f32 %v6986_v13, %v4013_v63  ;;  %v5112_v12 = vpop.f32.mrb[88].mxu1  ;;  %v7783_v23 = vld [vmem:[#allocation12_spill] sm:$0xff] }
 0x347   : > { %v3048_v40 = vrot.slane %v3047_v44, 4  ;;  %v2924_v17 = vadd.f32 %v2892_v30, %v2860_v16  ;;  %v7540_v28 = vsel %vm4310_vm9, %v4256_v58, %v7465_v55  ;;  %v7544_v51 = vadd.f32 %v7780_v37, %v6981_v14  ;;  %v7554_v14 = vld [vmem:[%s7649_s2 + $0x1] ss:$0 sm:$0xff]  ;;  %v2807_v41 = vpop.f32.mrb[89].mxu1 }
 0x348   : > { %v4263_v38 = vmax.f32 %v4261_v59, %v4262_v6  ;;  %v3055_v0 = vsel %vm970_vm1, %v2925_v27, -inf  ;;  %v4109_v54 = vmax.f32 %v4019_v42, 0.0  ;;  %v4078_v3 = vmax.f32 %v7511_v25, 0.0 }
 0x349   : > { %v3049_v62 = vmax.f32 %v3047_v44, %v3048_v40  ;;  %v3054_v48 = vsel %vm970_vm1, %v2924_v17, -inf  ;;  %v4108_v16 = vmax.f32 %v4014_v36, 0.0  ;;  %v2813_v15 = vadd.f32 %v7554_v14, %v5112_v12  ;;  %v5218_v33 = vpop.f32.mrb[92].mxu0 }
 0x34a   : > { %v4264_v13 = vrot.slane %v4263_v38, 4  ;;  %v3056_v39 = vmax.f32 %v3054_v48, %v3055_v0  ;;  %v4141_v55 = vadd.f32 %v4109_v54, %v4077_v53  ;;  %v2658_v60 = vadd.f32 %v7554_v14, %v7781_v7  ;;  %v4023_v35 = vpop.f32.mrb[93].mxu0 }
 0x34b   : > { %v3050_v2 = vrot.slane %v3049_v62, 2  ;;  %v4140_v1 = vadd.f32 %v4108_v16, %v4076_v5  ;;  %v2808_v56 = vadd.f32 %v7554_v14, %v2807_v41  ;;  %v2865_v11 = vmax.f32 %v7544_v51, 0.0 }
 0x34c   : > { %v4265_v53 = vmax.f32 %v4263_v38, %v4264_v13  ;;  %v4271_v49 = vsel %vm970_vm1, %v4141_v55, -inf  ;;  %v2895_v25 = vmax.f32 %v2813_v15, 0.0  ;;  %v7571_v22 = vadd.f32 %v7567_v43, %v7782_v34 }
 0x34d   : > { %v3051_v31 = vmax.f32 %v3049_v62, %v3050_v2  ;;  %v4270_v29 = vsel %vm970_vm1, %v4140_v1, -inf  ;;  %v2894_v5 = vmax.f32 %v2808_v56, 0.0  ;;  %v4029_v19 = vadd.f32 %v7567_v43, %v5218_v33  ;;  %v5115_v6 = vpop.f32.mrb[90].mxu1  ;;  %v7785_v62 = vld [vmem:[#allocation14_spill] sm:$0xff] }
 0x34e   : > { %v4266_v61 = vrot.slane %v4265_v53, 2  ;;  %v4272_v20 = vmax.f32 %v4270_v29, %v4271_v49  ;;  %v2927_v47 = vadd.f32 %v2895_v25, %v2863_v52  ;;  %v2864_v26 = vmax.f32 %v2658_v60, 0.0  ;;  %v2817_v63 = vpop.f32.mrb[91].mxu1 }
 0x34f   : > { %v3052_v50 = vrot.slane %v3051_v31, 1  ;;  %v2926_v58 = vadd.f32 %v2894_v5, %v2862_v9  ;;  %v4024_v57 = vadd.f32 %v7567_v43, %v4023_v35  ;;  %v3874_v44 = vadd.f32 %v7567_v43, %v7783_v23 }
 0x350   : > { %v4267_v8 = vmax.f32 %v4265_v53, %v4266_v61  ;;  %v2971_v32 = vsel %vm2935_vm13, %v2927_v47, 0.0  ;;  %v4111_v30 = vmax.f32 %v4029_v19, 0.0  ;;  %v4081_v10 = vmax.f32 %v7571_v22, 0.0 }
 0x351   : > { %v3057_v52 = vsel %vm970_vm1, %v2926_v58, -inf  ;;  %v4110_v46 = vmax.f32 %v4024_v57, 0.0  ;;  %v3053_v59 = vmax.f32 %v3051_v31, %v3052_v50  ;;  %v2823_v42 = vadd.f32 %v7554_v14, %v5115_v6  ;;  %v5221_v12 = vpop.f32.mrb[94].mxu0 }
 0x352   : > { %v4268_v27 = vrot.slane %v4267_v8, 1  ;;  %v3058_v21 = vmax.f32 %v3056_v39, %v3057_v52  ;;  %v4143_v9 = vadd.f32 %v4111_v30, %v4079_v4  ;;  %v3059_v40 = vsel %vm970_vm1, %v2971_v32, -inf  ;;  %v4033_v15 = vpop.f32.mrb[95].mxu0 }
 0x353   : > { %v4142_v17 = vadd.f32 %v4110_v46, %v4078_v3  ;;  %v2818_v36 = vadd.f32 %v7554_v14, %v2817_v63  ;;  %v7593_v37 = vsel %vm4312_vm10, %v3053_v59, %v7526_v45  ;;  %v2897_v0 = vmax.f32 %v2823_v42, 0.0 }
 0x354   : > { %v3060_v51 = vmax.f32 %v3058_v21, %v3059_v40  ;;  %v4187_v38 = vsel %vm4151_vm14, %v4143_v9, 0.0  ;;  %v4269_v54 = vmax.f32 %v4267_v8, %v4268_v27  ;;  %v2673_v4 = vadd.f32 %v7554_v14, %v7784_v18 }
 0x355   : > { %v2668_v48 = vadd.f32 %v7554_v14, %v7785_v62  ;;  %v4273_v3 = vsel %vm970_vm1, %v4142_v17, -inf  ;;  %v2896_v16 = vmax.f32 %v2818_v36, 0.0  ;;  %v2929_v45 = vadd.f32 %v2897_v0, %v2865_v11  ;;  %v5118_v31 = vpop.f32.mrb[92].mxu1 }
 0x356   : > { %v3061_v13 = vrot.slane %v3060_v51, 4  ;;  %v4274_v39 = vmax.f32 %v4272_v20, %v4273_v3  ;;  %v4039_v55 = vadd.f32 %v7567_v43, %v5221_v12  ;;  %v4275_v41 = vsel %vm970_vm1, %v4187_v38, -inf  ;;  %v2827_v20 = vpop.f32.mrb[93].mxu1 }
 0x357   : > { %v2928_v7 = vadd.f32 %v2896_v16, %v2864_v26  ;;  %v4034_v60 = vadd.f32 %v7567_v43, %v4033_v15  ;;  %v4349_v2 = vsel %vm4312_vm10, %v4269_v54, %v7540_v28  ;;  %v3068_v53 = vsel %vm970_vm1, %v2929_v45, -inf  ;;  %v7786_v26 = vld [vmem:[#allocation19_spill] sm:$0xff] }
 0x358   : > { %v3062_v1 = vmax.f32 %v3060_v51, %v3061_v13  ;;  %v4276_v56 = vmax.f32 %v4274_v39, %v4275_v41  ;;  %v4113_v49 = vmax.f32 %v4039_v55, 0.0  ;;  %v4080_v25 = vmax.f32 %v3874_v44, 0.0  ;;  %v7787_v44 = vld [vmem:[#allocation16_spill] sm:$0xff] }
 0x359   : > { %v2867_v34 = vmax.f32 %v2673_v4, 0.0  ;;  %v3067_v11 = vsel %vm970_vm1, %v2928_v7, -inf  ;;  %v4112_v22 = vmax.f32 %v4034_v60, 0.0  ;;  %v2866_v47 = vmax.f32 %v2668_v48, 0.0  ;;  %v5224_v52 = vpop.f32.mrb[96].mxu0 }
 0x35a   : > { %v3063_v29 = vrot.slane %v3062_v1, 2  ;;  %v4277_v5 = vrot.slane %v4276_v56, 4  ;;  %v3069_v33 = vmax.f32 %v3067_v11, %v3068_v53  ;;  %v4145_v61 = vadd.f32 %v4113_v49, %v4081_v10 }
 0x35b   : > { %v4144_v19 = vadd.f32 %v4112_v22, %v4080_v25  ;;  %v2833_v28 = vadd.f32 %v7554_v14, %v5118_v31  ;;  %v2828_v35 = vadd.f32 %v7554_v14, %v2827_v20  ;;  %v3889_v50 = vadd.f32 %v7567_v43, %v7786_v26  ;;  %v4043_v14 = vpop.f32.mrb[97].mxu0 }
 0x35c   : > { %v3064_v58 = vmax.f32 %v3062_v1, %v3063_v29  ;;  %v4278_v57 = vmax.f32 %v4276_v56, %v4277_v5  ;;  %v4284_v23 = vsel %vm970_vm1, %v4145_v61, -inf  ;;  %v3884_v8 = vadd.f32 %v7567_v43, %v7787_v44 }
 0x35d   : > { %v4283_v32 = vsel %vm970_vm1, %v4144_v19, -inf  ;;  %v2899_v30 = vmax.f32 %v2833_v28, 0.0  ;;  %v2898_v10 = vmax.f32 %v2828_v35, 0.0  ;;  %v4049_v59 = vadd.f32 %v7567_v43, %v5224_v52  ;;  %v4698_v19 = vld [vmem:[%s7650_s3 + $0x30] ss:$0 sm:$0xff] }
 0x35e   : > { %v4279_v46 = vrot.slane %v4278_v57, 2  ;;  %v4285_v6 = vmax.f32 %v4283_v32, %v4284_v23  ;;  %v3065_v27 = vrot.slane %v3064_v58, 1  ;;  %v4044_v42 = vadd.f32 %v7567_v43, %v4043_v14 }
 0x35f   : > { %v2931_v21 = vadd.f32 %v2899_v30, %v2867_v34  ;;  %v2930_v9 = vadd.f32 %v2898_v10, %v2866_v47  ;;  %v4083_v63 = vmax.f32 %v3889_v50, 0.0  ;;  %v4115_v17 = vmax.f32 %v4049_v59, 0.0 }
 0x360   : > { %v4280_v40 = vmax.f32 %v4278_v57, %v4279_v46  ;;  %v3066_v36 = vmax.f32 %v3064_v58, %v3065_v27  ;;  %v4082_v51 = vmax.f32 %v3884_v8, 0.0  ;;  %v4114_v54 = vmax.f32 %v4044_v42, 0.0 }
 0x361   : > { %v2975_v38 = vsel %vm2935_vm13, %v2931_v21, 0.0  ;;  %v3070_v0 = vsel %vm970_vm1, %v2930_v9, -inf  ;;  %v4147_v4 = vadd.f32 %v4115_v17, %v4083_v63  ;;  %v5306_v56 = vmov 0.0  }
 0x362   : > { %v3071_v18 = vmax.f32 %v3069_v33, %v3070_v0  ;;  %v4332_v62 = vsel %vm4314_vm11, %v3066_v36, %v7593_v37  ;;  %v3072_v48 = vsel %vm970_vm1, %v2975_v38, -inf  ;;  %v4146_v3 = vadd.f32 %v4114_v54, %v4082_v51  ;;  %5237 = vmatprep.mubr.msk.f32.mxu1 %vm5305_vm15, %v5306_v56  ;;  %v7788_v33 = vld [vmem:[#allocation3_spill] sm:$0xff] }
 0x363   : > { %v4281_v43 = vrot.slane %v4280_v40, 1  ;;  %v4191_v12 = vsel %vm4151_vm14, %v4147_v4, 0.0 }
 0x364   : > { %v3073_v16 = vmax.f32 %v3071_v18, %v3072_v48  ;;  %v4286_v13 = vsel %vm970_vm1, %v4146_v3, -inf  ;;  %v4288_v15 = vsel %vm970_vm1, %v4191_v12, -inf }
 0x365   : > { %v4282_v39 = vmax.f32 %v4280_v40, %v4281_v43  ;;  %v4287_v55 = vmax.f32 %v4285_v6, %v4286_v13 }
 0x366   : > { %v3074_v45 = vrot.slane %v3073_v16, 4 }
 0x367   : > { %v4350_v41 = vsel %vm4314_vm11, %v4282_v39, %v4349_v2  ;;  %v4289_v60 = vmax.f32 %v4287_v55, %v4288_v15 }
 0x368   : > { %v3075_v7 = vmax.f32 %v3073_v16, %v3074_v45 }
 0x369   : > { %v4290_v37 = vrot.slane %v4289_v60, 4 }
 0x36a   : > { %v3076_v1 = vrot.slane %v3075_v7, 2 }
 0x36b   : > { %v4291_v53 = vmax.f32 %v4289_v60, %v4290_v37 }
 0x36c   : > { %v3077_v49 = vmax.f32 %v3075_v7, %v3076_v1 }
 0x36d   : > { %v4292_v25 = vrot.slane %v4291_v53, 2 }
 0x36e   : > { %v3078_v24 = vrot.slane %v3077_v49, 1 }
 0x36f   : > { %v4293_v11 = vmax.f32 %v4291_v53, %v4292_v25 }
 0x370   : > { %v3079_v34 = vmax.f32 %v3077_v49, %v3078_v24 }
 0x371   : > { %v4294_v31 = vrot.slane %v4293_v11, 1 }
 0x372   : > { %v4333_v22 = vsel %vm4316_vm12, %v3079_v34, %v4332_v62 }
 0x373   : > { %4334 = vrot.lane.b32.xlu0 %v4333_v22, %s5300_s27  ;;  %v4295_v2 = vmax.f32 %v4293_v11, %v4294_v31 }
 0x375   : > { %v4351_v29 = vsel %vm4316_vm12, %v4295_v2, %v4350_v41 }
 0x376   : > { %4352 = vrot.lane.b32.xlu1 %v4351_v29, %s5303_s24 }
 0x3e5   : > { %v4335_v5 = vpop.permute.xlu0 %4334 }
 0x3e6   : > { %v4355_v61 = vsel %vm970_vm1, %v7788_v33, %v4335_v5 }
 0x3e8   : > { %v4353_v20 = vpop.permute.xlu1 %4352 }
 0x3e9   : > { %v4356_v47 = vsel %vm2258_vm3, %v4355_v61, %v4353_v20 }
 0x3ea   : > { %5238 = vmatmul.mubr.msk.f32.vlgmr.msra.gmra.mrb[94].mxu1 %vm4368_vm0, %v4356_v47 }
 0x4bd   : > { %v4438_v28 = vpop.f32.mrb[94].mxu1 }
 0x4be   : > { %v4439_v35 = vadd.f32 %v4698_v19, %v4438_v28  ;;  %v5239_v26 = vpop.f32.mrb[95].mxu1 }
 0x4c0   : > { %4442 = vst [vmem:[%s195_s6] sm:$0xff] %v4439_v35 }
 0x4c1 PF: > { %s14_s15 = sadd.s32 1, %s5298_s15  }
 0x4c2   : > { %p11_p4 = scmp.ge.s32.totalorder %s14_s15, 5  }
 0x4c4   :  { %13 = sbr.rel (!%p11_p4) target bundleno = 1 (0x1), region = 66 }

</bundles_post_ra>
